<compile_context>
chip_gen: v5e
topology: v5e:2x2
jax: 0.10.0
libtpu: 0.0.40
codegen_flags: <defaults>
</compile_context>

<pallas_src>
import numpy as np
import jax
import jax.numpy as jnp
from jax.experimental import pallas as pl
from jax.experimental.pallas import tpu as pltpu


def _round_up(x, m):
    return ((x + m - 1) // m) * m


def _pick_row_tiles(R, L, itemsize, n_bufs, max_bytes=12 << 20):
    """Fixed, generation-safe 2-D tiles for row-affine kernels.

    Tiles are chosen so the pipelined working set (n_bufs big blocks) stays
    well under the 32 MiB default scoped VMEM on every TPU generation
    (and v7x's 64 MiB physical VMEM)."""
    tr = R if R <= 256 else 256
    tl = L if L <= 1024 else min(_round_up(L, 128), 16384)
    while tr * tl * itemsize * n_bufs > max_bytes and tl % 256 == 0 and tl > 512:
        tl //= 2
    while tr * tl * itemsize * n_bufs > max_bytes and tr % 16 == 0 and tr > 8:
        tr //= 2
    return tr, tl


# ----------------------------------------------------------------------------
# Kernel 1: row-wise affine  y[r, :] = x[r, :] * p[r, 0] + p[r, 1]
# Used for pixel normalization on the (B*C, H*W) layout (pure reshape).
# ----------------------------------------------------------------------------
def _row_affine_kernel(x_ref, p_ref, o_ref):
    p = p_ref[...]
    o_ref[...] = x_ref[...] * p[:, 0:1] + p[:, 1:2]


def row_affine(x_rl, scale_r, bias_r):
    R, L = x_rl.shape
    dt = x_rl.dtype
    itemsize = np.dtype(dt).itemsize
    params = jnp.stack([scale_r, bias_r], axis=1).astype(dt)          # (R, 2)
    tr, tl = _pick_row_tiles(R, L, itemsize, n_bufs=4)
    grid = (pl.cdiv(R, tr), pl.cdiv(L, tl))
    cost = pl.CostEstimate(flops=2 * R * L, transcendentals=0,
                           bytes_accessed=(2 * R * L + 2 * R) * itemsize)
    return pl.pallas_call(
        _row_affine_kernel,
        out_shape=jax.ShapeDtypeStruct((R, L), dt),
        grid_spec=pltpu.PrefetchScalarGridSpec(
            num_scalar_prefetch=0,
            grid=grid,
            in_specs=[pl.BlockSpec((tr, tl), lambda i, j: (i, j)),
                      pl.BlockSpec((tr, 2), lambda i, j: (i, 0))],
            out_specs=pl.BlockSpec((tr, tl), lambda i, j: (i, j)),
        ),
        compiler_params=pltpu.CompilerParams(
            dimension_semantics=("parallel", "parallel")),
        cost_estimate=cost,
    )(x_rl, params)


# ----------------------------------------------------------------------------
# Kernel 2: fused dual affine (affine_rpn + affine_rcnn share one read of res4)
# Layout: (B*C, H*W) — a pure reshape of NCHW, no HBM transpose passes.
# Params packed into one (B*C, 4) array: [s1, b1, s2, b2].
# ----------------------------------------------------------------------------
def _dual_row_affine_kernel(x_ref, p_ref, o1_ref, o2_ref):
    x = x_ref[...]
    p = p_ref[...]
    o1_ref[...] = x * p[:, 0:1] + p[:, 1:2]
    o2_ref[...] = x * p[:, 2:3] + p[:, 3:4]


def dual_affine(feat_nchw, p1, p2):
    B, C, H, W = feat_nchw.shape
    R, L = B * C, H * W
    dt = feat_nchw.dtype
    itemsize = np.dtype(dt).itemsize
    x = feat_nchw.reshape(R, L)                                       # no transpose
    params = jnp.stack([jnp.tile(p1["w"], B), jnp.tile(p1["b"], B),
                        jnp.tile(p2["w"], B), jnp.tile(p2["b"], B)],
                       axis=1).astype(dt)                             # (R, 4)
    tr, tl = _pick_row_tiles(R, L, itemsize, n_bufs=6)
    grid = (pl.cdiv(R, tr), pl.cdiv(L, tl))
    cost = pl.CostEstimate(flops=4 * R * L, transcendentals=0,
                           bytes_accessed=(3 * R * L + 4 * R) * itemsize)
    o1, o2 = pl.pallas_call(
        _dual_row_affine_kernel,
        out_shape=(jax.ShapeDtypeStruct((R, L), dt),
                   jax.ShapeDtypeStruct((R, L), dt)),
        grid_spec=pltpu.PrefetchScalarGridSpec(
            num_scalar_prefetch=0,
            grid=grid,
            in_specs=[pl.BlockSpec((tr, tl), lambda i, j: (i, j)),
                      pl.BlockSpec((tr, 4), lambda i, j: (i, 0))],
            out_specs=[pl.BlockSpec((tr, tl), lambda i, j: (i, j))] * 2,
        ),
        compiler_params=pltpu.CompilerParams(
            dimension_semantics=("parallel", "parallel")),
        cost_estimate=cost,
    )(x, params)
    return o1.reshape(B, C, H, W), o2.reshape(B, C, H, W)


# ----------------------------------------------------------------------------
# Kernel 3: fused distillation loss per scale (transposed per-image layout)
#   diff^T = lhs @ rhs   with  lhs = [W_proj | -emb_adj^T]   (sem_pad, C+nrows)
#                              rhs = [vis ; onehot(cls)]     (C+nrows, tile)
#   out   += diff^T * diff^T   (lane-dense (sem_pad, tile) partial sums)
# Conv bias folded into emb_adj; padded pixels map to a zero embedding row and
# zero vis, so they contribute exactly 0.  Final reduce + mean in JAX.
# ----------------------------------------------------------------------------
def _kd_distill_kernel(vis_ref, cls_ref, lhs_ref, out_ref):
    j = pl.program_id(1)

    @pl.when(j == 0)
    def _():
        out_ref[...] = jnp.zeros_like(out_ref)

    vis = vis_ref[0].astype(jnp.bfloat16)                    # (C, tl)
    cls = cls_ref[0]                                         # (1, tl) int32
    nrows = lhs_ref.shape[1] - vis.shape[0]
    row_iota = jax.lax.broadcasted_iota(jnp.int32, (nrows, cls.shape[1]), 0)
    onehot = (row_iota == cls).astype(jnp.bfloat16)          # (nrows, tl)
    rhs = jnp.concatenate([vis, onehot], axis=0)             # (C+nrows, tl)
    diff = jnp.dot(lhs_ref[...], rhs,
                   preferred_element_type=jnp.float32)       # (sem_pad, tl) f32
    out_ref[...] += (diff * diff)[None]


def _kd_hw_tiles(HW, C, sem_pad, max_cap=2048, budget=16 << 20):
    """Pixel-tile size: pad HW to a multiple of 128, pick the largest exact
    tile that keeps vis/out double-buffered blocks under the VMEM budget."""
    hw_pad = _round_up(HW, 128)
    cap = max(128, min(max_cap,
                       (budget // (8 * (C + sem_pad + 1))) // 128 * 128))
    n128 = hw_pad // 128
    d_best = 1
    for d in range(1, n128 + 1):
        if n128 % d == 0 and d * 128 <= cap:
            d_best = d
    tl = d_best * 128
    if tl < min(cap, 512) and hw_pad > cap:      # awkward divisors: pad to tile
        tl = cap
        hw_pad = _round_up(HW, tl)
    return hw_pad, tl, hw_pad // tl


def kd_distill_mse(vis_nchw, cls_map_bhw, weight_oc, bias_o, embed_table):
    """vis_nchw: (B,C,H,W) f32; cls_map_bhw: (B,H,W) int32 in [0, num_classes]
    (num_classes == background row of embed_table). Returns scalar MSE loss."""
    B, C, H, W = vis_nchw.shape
    sem_dim = embed_table.shape[1]
    HW = H * W

    # Fold the conv bias into the embedding rows (loss only sees proj - sem),
    # append a zero row so padded pixels (vis = 0) contribute exactly 0, and
    # pad the row count to a multiple of 16 for clean bf16 sublane tiling.
    emb_adj = embed_table - bias_o.reshape(1, sem_dim)
    pad_row = int(embed_table.shape[0])                  # == num_classes + 1
    nrows = pad_row + 1
    nrows_pad = _round_up(nrows, 16)
    emb_full = jnp.zeros((nrows_pad, sem_dim), jnp.float32).at[:nrows - 1].set(emb_adj)

    # Fused lhs = [W_proj | -emb_full^T]; pad sem rows for MXU N-alignment.
    sem_pad = _round_up(sem_dim, 128) if sem_dim >= 128 else _round_up(sem_dim, 8)
    lhs = jnp.concatenate([weight_oc, -emb_full.T], axis=1)     # (sem_dim, K)
    K = C + nrows_pad
    if sem_pad != sem_dim:
        lhs = jnp.pad(lhs, ((0, sem_pad - sem_dim), (0, 0)))
    lhs = lhs.astype(jnp.bfloat16)

    hw_pad, tl, n_hw = _kd_hw_tiles(HW, C, sem_pad)

    vis_p = vis_nchw.reshape(B, C, HW)                    # pure reshape
    cls_p = cls_map_bhw.reshape(B, 1, HW).astype(jnp.int32)   # lane-dense cls
    if hw_pad != HW:
        vis_p = jnp.pad(vis_p, ((0, 0), (0, 0), (0, hw_pad - HW)))
        cls_p = jnp.pad(cls_p, ((0, 0), (0, 0), (0, hw_pad - HW)),
                        constant_values=pad_row)

    cost = pl.CostEstimate(
        flops=2 * B * hw_pad * sem_pad * (K + 1),
        transcendentals=0,
        bytes_accessed=(4 * B * C * hw_pad + 4 * B * hw_pad
                        + 2 * sem_pad * K + 4 * B * sem_pad * tl))

    out = pl.pallas_call(
        _kd_distill_kernel,
        out_shape=jax.ShapeDtypeStruct((B, sem_pad, tl), jnp.float32),
        grid_spec=pltpu.PrefetchScalarGridSpec(
            num_scalar_prefetch=0,
            grid=(B, n_hw),
            in_specs=[
                pl.BlockSpec((1, C, tl), lambda b, j: (b, 0, j)),
                pl.BlockSpec((1, 1, tl), lambda b, j: (b, 0, j)),
                pl.BlockSpec((sem_pad, K), lambda b, j: (0, 0)),
            ],
            out_specs=pl.BlockSpec((1, sem_pad, tl), lambda b, j: (b, 0, 0)),
        ),
        compiler_params=pltpu.CompilerParams(
            dimension_semantics=("parallel", "arbitrary")),
        cost_estimate=cost,
    )(vis_p, cls_p, lhs)

    # F.mse_loss (mean) over B * semantic_dim * H * W elements (unpadded);
    # padded pixel columns and padded sem rows contribute exactly 0 to the sum.
    return jnp.sum(out) / (B * HW * sem_dim)


# ----------------------------------------------------------------------------
# Module glue (parameter init, box painting, forward orchestration)
# ----------------------------------------------------------------------------
def init_params(key, *, num_classes, semantic_dim, scale_channels):
    ks = jax.random.split(key, 4)
    c4 = scale_channels["res4"]
    params = {
        # Detectron2 defaults for PIXEL_MEAN / PIXEL_STD
        "pixel_mean": jnp.array([103.53, 116.28, 123.675], jnp.float32),
        "pixel_std": jnp.array([57.375, 57.12, 58.395], jnp.float32),
        # AffineLayer init: weight = ones, bias = zeros
        "affine_rpn": {"w": jnp.ones((c4,), jnp.float32), "b": jnp.zeros((c4,), jnp.float32)},
        "affine_rcnn": {"w": jnp.ones((c4,), jnp.float32), "b": jnp.zeros((c4,), jnp.float32)},
        "class_embedding": jax.random.normal(ks[0], (num_classes, semantic_dim), jnp.float32),
        "bg_feature": jax.random.normal(ks[1], (1, semantic_dim), jnp.float32),
        "vis2sem_proj": {},
    }
    for i, (scale, c) in enumerate(scale_channels.items()):
        kw, kb = jax.random.split(jax.random.fold_in(ks[2], i))
        params["vis2sem_proj"][scale] = {
            "w": jax.random.normal(kw, (semantic_dim, c), jnp.float32) / np.sqrt(c),
            "b": jax.random.normal(kb, (semantic_dim,), jnp.float32) * 0.01,
        }
    # TODO(synk): sem2vis_proj / combined2sem_proj are unused in this forward path; omitted.
    return params


def preprocess_image(params, images_nchw):
    # normalize_fn: (x - pixel_mean) / pixel_std as x * (1/std) + (-mean/std),
    # laid out as (B*C, H*W) — lane-dense wide stores, no transpose.
    # TODO(synk): ImageList.from_tensors padding to size_divisibility omitted
    # (synthetic image size already divisible).
    B, C, H, W = images_nchw.shape
    inv_std = 1.0 / params["pixel_std"]
    scale = jnp.tile(inv_std, B)                               # (B*C,)
    bias = jnp.tile(-params["pixel_mean"] * inv_std, B)        # (B*C,)
    y = row_affine(images_nchw.reshape(B * C, H * W), scale, bias)
    return y.reshape(B, C, H, W)


def build_class_index_map(gt_boxes_per_img, gt_classes_per_img, hw, stride,
                          num_classes, expand_rate=1.0):
    # Mirrors _expand_bbox + the box-painting loop of _generate_semantic_features,
    # producing a per-pixel class index (num_classes == background).
    H, W = hw
    cmap = np.full((H, W), num_classes, dtype=np.int32)
    for box, c in zip(gt_boxes_per_img, gt_classes_per_img):
        x1, y1, x2, y2 = [v / stride for v in box]
        w, h = x2 - x1, y2 - y1
        xc, yc = (x1 + x2) / 2.0, (y1 + y2) / 2.0
        w, h = w * expand_rate, h * expand_rate
        X1 = int(max(0, xc - w / 2.0))
        Y1 = int(max(0, yc - h / 2.0))
        X2 = int(min(W, xc + w / 2.0))
        Y2 = int(min(H, yc + h / 2.0))
        cmap[Y1:Y2, X1:X2] = int(c)
    return cmap


def build_class_maps(features, gt_boxes, gt_classes, scale_strides, num_classes):
    # Host precompute (once per batch), kept out of the jitted device path.
    # TODO(synk): a vectorized jnp box-paint would allow tracing gt under jit.
    maps = {}
    for scale, feat in features.items():
        B, _, H, W = feat.shape
        maps[scale] = jnp.asarray(np.stack([
            build_class_index_map(gt_boxes[i], gt_classes[i], (H, W),
                                  scale_strides[scale], num_classes)
            for i in range(B)]))
    return maps


def forward_training(params, batched_images, backbone_features, cls_maps):
    images = preprocess_image(params, batched_images)
    # TODO(synk): backbone (ResNet), RPN (proposal_generator) and ROI heads are
    # external detectron2 builds with no clean Pallas equivalent; backbone
    # features are supplied as inputs and proposal/detector losses are skipped.
    embed_table = jnp.concatenate(
        [params["class_embedding"], params["bg_feature"]], axis=0)
    kd_loss = {}
    # TODO(synk): the three per-scale KD calls could be merged into a single
    # scalar-prefetch-driven pallas_call; kept separate because C/HW differ per
    # scale and per-call launch overhead (~1 us total) is negligible here.
    for scale, feat in backbone_features.items():
        p = params["vis2sem_proj"][scale]
        kd_loss[f"loss_rpn_{scale}"] = kd_distill_mse(
            feat, cls_maps[scale], p["w"], p["b"], embed_table)
    # decouple_layer forward is identity (gradient scaling only — forward-only here).
    feat_rpn, feat_rcnn = dual_affine(backbone_features["res4"],
                                      params["affine_rpn"], params["affine_rcnn"])
    return kd_loss, feat_rpn, feat_rcnn, images


# ----------------------------------------------------------------------------
if __name__ == "__main__":
    key = jax.random.PRNGKey(0)
    num_classes = 7          # background index = 7 -> 8-row embedding table
    semantic_dim = 128       # synthetic small stand-in for glove(300)/clip(512)
    B = 2
    img_h = img_w = 128
    scale_channels = {"res2": 16, "res3": 32, "res4": 64}
    scale_strides = {"res2": 4, "res3": 8, "res4": 16}

    params = init_params(key, num_classes=num_classes, semantic_dim=semantic_dim,
                         scale_channels=scale_channels)

    k_img, k2, k3, k4 = jax.random.split(jax.random.fold_in(key, 1), 4)
    images = jax.random.uniform(k_img, (B, 3, img_h, img_w), jnp.float32, 0.0, 255.0)
    backbone_features = {
        "res2": jax.random.normal(k2, (B, 16, img_h // 4, img_w // 4), jnp.float32),
        "res3": jax.random.normal(k3, (B, 32, img_h // 8, img_w // 8), jnp.float32),
        "res4": jax.random.normal(k4, (B, 64, img_h // 16, img_w // 16), jnp.float32),
    }
    # deterministic synthetic gt instances (image-space xyxy boxes + class ids)
    gt_boxes = [
        [(8.0, 8.0, 72.0, 64.0), (40.0, 48.0, 120.0, 120.0)],
        [(16.0, 24.0, 96.0, 112.0)],
    ]
    gt_classes = [[1, 3], [5]]

    # host precompute of per-pixel class maps, then one jitted device forward
    cls_maps = build_class_maps(backbone_features, gt_boxes, gt_classes,
                                scale_strides, num_classes)
    fwd = jax.jit(forward_training)
    kd_loss, feat_rpn, feat_rcnn, norm_images = fwd(
        params, images, backbone_features, cls_maps)
    jax.block_until_ready((kd_loss, feat_rpn, feat_rcnn, norm_images))

    # --- pure-JAX reference checks ------------------------------------------
    embed_table = jnp.concatenate([params["class_embedding"], params["bg_feature"]], axis=0)
    for scale, feat in backbone_features.items():
        Bc, C, H, W = feat.shape
        p = params["vis2sem_proj"][scale]
        vis_flat = jnp.transpose(feat, (0, 2, 3, 1)).reshape(-1, C)
        proj = vis_flat @ p["w"].T + p["b"]
        sem = embed_table[np.asarray(cls_maps[scale]).reshape(-1)]
        ref = jnp.mean((proj - sem) ** 2)
        got = kd_loss[f"loss_rpn_{scale}"]
        # kernel uses bf16 MXU inputs (f32 accumulation) -> compare at 1e-2
        assert np.allclose(np.asarray(got), np.asarray(ref), rtol=1e-2, atol=1e-4), \
            (scale, float(got), float(ref))

    mean = params["pixel_mean"].reshape(1, 3, 1, 1)
    std = params["pixel_std"].reshape(1, 3, 1, 1)
    assert np.allclose(np.asarray(norm_images), np.asarray((images - mean) / std),
                       rtol=1e-5, atol=1e-4)

    # AffineLayer init is identity (w=1, b=0)
    assert np.allclose(np.asarray(feat_rpn), np.asarray(backbone_features["res4"]),
                       rtol=1e-5, atol=1e-5)
    assert np.allclose(np.asarray(feat_rcnn), np.asarray(backbone_features["res4"]),
                       rtol=1e-5, atol=1e-5)

    # stronger dual_affine check with non-trivial scale/bias
    ka, kb2, kc, kd = jax.random.split(jax.random.fold_in(key, 2), 4)
    pa = {"w": jax.random.normal(ka, (64,), jnp.float32),
          "b": jax.random.normal(kb2, (64,), jnp.float32)}
    pb = {"w": jax.random.normal(kc, (64,), jnp.float32),
          "b": jax.random.normal(kd, (64,), jnp.float32)}
    o1, o2 = dual_affine(backbone_features["res4"], pa, pb)
    r4 = backbone_features["res4"]
    ref1 = r4 * pa["w"].reshape(1, -1, 1, 1) + pa["b"].reshape(1, -1, 1, 1)
    ref2 = r4 * pb["w"].reshape(1, -1, 1, 1) + pb["b"].reshape(1, -1, 1, 1)
    assert np.allclose(np.asarray(o1), np.asarray(ref1), rtol=1e-5, atol=1e-5)
    assert np.allclose(np.asarray(o2), np.asarray(ref2), rtol=1e-5, atol=1e-5)

    print("KERNEL_OK")
</pallas_src>

<mosaic_0001>
module attributes {stable_mosaic.version = 11 : i64} {
  func.func @_kd_distill_kernel(%arg0: i32, %arg1: i32, %arg2: memref<1x16x1024xf32, #tpu.memory_space<vmem>>, %arg3: memref<1x1x1024xi32, #tpu.memory_space<vmem>>, %arg4: memref<128x32xbf16, #tpu.memory_space<vmem>>, %arg5: memref<1x128x1024xf32, #tpu.memory_space<vmem>>) attributes {dimension_semantics = [#tpu.dimension_semantics<parallel>, #tpu.dimension_semantics<arbitrary>], iteration_bounds = array<i64: 2, 1>, scalar_prefetch = 0 : i64, scratch_operands = 0 : i64, tpu.core_type = #tpu.core_type<tc>, window_params = [{transform_indices = @transform_0, window_bounds = array<i64: 1, 16, 1024>}, {transform_indices = @transform_1, window_bounds = array<i64: 1, 1, 1024>}, {pipeline_mode = #tpu.pipeline_mode<synchronous>, transform_indices = @transform_2, window_bounds = array<i64: 128, 32>}, {transform_indices = @transform_3, window_bounds = array<i64: 1, 128, 1024>}]} {
    %c0_i32 = arith.constant 0 : i32
    %0 = arith.cmpi eq, %arg1, %c0_i32 : i32
    %1 = arith.extui %0 : i1 to i32
    %c0_i32_0 = arith.constant 0 : i32
    %2 = arith.cmpi ne, %1, %c0_i32_0 : i32
    scf.if %2 {
      %cst_14 = arith.constant 0.000000e+00 : f32
      %22 = vector.broadcast %cst_14 : f32 to vector<1x128x1024xf32>
      %c0_15 = arith.constant 0 : index
      %c0_16 = arith.constant 0 : index
      %c0_17 = arith.constant 0 : index
      %23 = vector.load %arg5[%c0_15, %c0_16, %c0_17] : memref<1x128x1024xf32, #tpu.memory_space<vmem>>, vector<1x128x1024xf32>
      tpu.vector_store %arg5[%c0_15, %c0_16, %c0_17], %22 {strides = array<i32>} : memref<1x128x1024xf32, #tpu.memory_space<vmem>>, vector<1x128x1024xf32>,
    } else {
    }
    %c0 = arith.constant 0 : index
    %c0_1 = arith.constant 0 : index
    %c0_2 = arith.constant 0 : index
    %3 = vector.load %arg2[%c0, %c0_1, %c0_2] : memref<1x16x1024xf32, #tpu.memory_space<vmem>>, vector<1x16x1024xf32>
    %4 = vector.shape_cast %3 : vector<1x16x1024xf32> to vector<16x1024xf32>
    %5 = arith.truncf %4 : vector<16x1024xf32> to vector<16x1024xbf16>
    %c0_3 = arith.constant 0 : index
    %c0_4 = arith.constant 0 : index
    %c0_5 = arith.constant 0 : index
    %6 = vector.load %arg3[%c0_3, %c0_4, %c0_5] : memref<1x1x1024xi32, #tpu.memory_space<vmem>>, vector<1x1x1024xi32>
    %7 = vector.shape_cast %6 : vector<1x1x1024xi32> to vector<1x1024xi32>
    %8 = tpu.iota {dimensions = array<i32: 0>} : vector<16x1024xi32>
    %9 = vector.broadcast %7 : vector<1x1024xi32> to vector<16x1024xi32>
    %10 = arith.cmpi eq, %8, %9 : vector<16x1024xi32>
    %11 = arith.extui %10 : vector<16x1024xi1> to vector<16x1024xi32>
    %12 = arith.sitofp %11 : vector<16x1024xi32> to vector<16x1024xf32>
    %13 = arith.truncf %12 : vector<16x1024xf32> to vector<16x1024xbf16>
    %14 = tpu.concatenate %5, %13 in 0 : vector<16x1024xbf16>, vector<16x1024xbf16> -> vector<32x1024xbf16>
    %c0_6 = arith.constant 0 : index
    %c0_7 = arith.constant 0 : index
    %15 = vector.load %arg4[%c0_6, %c0_7] : memref<128x32xbf16, #tpu.memory_space<vmem>>, vector<128x32xbf16>
    %cst = arith.constant dense<0.000000e+00> : vector<128x1024xf32>
    %16 = tpu.matmul %15, %14, %cst {dimension_numbers = #tpu.dot_dimension_numbers<[1], [0], [0], [1], [0, 0, 1, 1], [], []>} : vector<128x32xbf16>, vector<32x1024xbf16>, vector<128x1024xf32> -> vector<128x1024xf32>
    %c0_8 = arith.constant 0 : index
    %c0_9 = arith.constant 0 : index
    %c0_10 = arith.constant 0 : index
    %17 = vector.load %arg5[%c0_8, %c0_9, %c0_10] : memref<1x128x1024xf32, #tpu.memory_space<vmem>>, vector<1x128x1024xf32>
    %18 = arith.mulf %16, %16 : vector<128x1024xf32>
    %19 = vector.shape_cast %18 : vector<128x1024xf32> to vector<1x128x1024xf32>
    %20 = arith.addf %17, %19 : vector<1x128x1024xf32>
    %c0_11 = arith.constant 0 : index
    %c0_12 = arith.constant 0 : index
    %c0_13 = arith.constant 0 : index
    %21 = vector.load %arg5[%c0_11, %c0_12, %c0_13] : memref<1x128x1024xf32, #tpu.memory_space<vmem>>, vector<1x128x1024xf32>
    tpu.vector_store %arg5[%c0_11, %c0_12, %c0_13], %20 {strides = array<i32>} : memref<1x128x1024xf32, #tpu.memory_space<vmem>>, vector<1x128x1024xf32>,
    return
  }
  func.func @transform_0(%arg0: i32, %arg1: i32) -> (i32, i32, i32) {
    %c0_i32 = arith.constant 0 : i32
    %c0_i32_0 = arith.constant 0 : i32
    return %arg0, %c0_i32, %arg1 : i32, i32, i32
  }
  func.func @transform_1(%arg0: i32, %arg1: i32) -> (i32, i32, i32) {
    %c0_i32 = arith.constant 0 : i32
    %c0_i32_0 = arith.constant 0 : i32
    return %arg0, %c0_i32, %arg1 : i32, i32, i32
  }
  func.func @transform_2(%arg0: i32, %arg1: i32) -> (i32, i32) {
    %c0_i32 = arith.constant 0 : i32
    %c0_i32_0 = arith.constant 0 : i32
    %c0_i32_1 = arith.constant 0 : i32
    return %c0_i32, %c0_i32_0 : i32, i32
  }
  func.func @transform_3(%arg0: i32, %arg1: i32) -> (i32, i32, i32) {
    %c0_i32 = arith.constant 0 : i32
    %c0_i32_0 = arith.constant 0 : i32
    %c0_i32_1 = arith.constant 0 : i32
    return %arg0, %c0_i32, %c0_i32_0 : i32, i32, i32
  }
}

module attributes {stable_mosaic.version = 11 : i64} {
  func.func @_kd_distill_kernel(%arg0: i32, %arg1: i32, %arg2: memref<1x32x256xf32, #tpu.memory_space<vmem>>, %arg3: memref<1x1x256xi32, #tpu.memory_space<vmem>>, %arg4: memref<128x48xbf16, #tpu.memory_space<vmem>>, %arg5: memref<1x128x256xf32, #tpu.memory_space<vmem>>) attributes {dimension_semantics = [#tpu.dimension_semantics<parallel>, #tpu.dimension_semantics<arbitrary>], iteration_bounds = array<i64: 2, 1>, scalar_prefetch = 0 : i64, scratch_operands = 0 : i64, tpu.core_type = #tpu.core_type<tc>, window_params = [{transform_indices = @transform_0, window_bounds = array<i64: 1, 32, 256>}, {transform_indices = @transform_1, window_bounds = array<i64: 1, 1, 256>}, {pipeline_mode = #tpu.pipeline_mode<synchronous>, transform_indices = @transform_2, window_bounds = array<i64: 128, 48>}, {transform_indices = @transform_3, window_bounds = array<i64: 1, 128, 256>}]} {
    %c0_i32 = arith.constant 0 : i32
    %0 = arith.cmpi eq, %arg1, %c0_i32 : i32
    %1 = arith.extui %0 : i1 to i32
    %c0_i32_0 = arith.constant 0 : i32
    %2 = arith.cmpi ne, %1, %c0_i32_0 : i32
    scf.if %2 {
      %cst_14 = arith.constant 0.000000e+00 : f32
      %22 = vector.broadcast %cst_14 : f32 to vector<1x128x256xf32>
      %c0_15 = arith.constant 0 : index
      %c0_16 = arith.constant 0 : index
      %c0_17 = arith.constant 0 : index
      %23 = vector.load %arg5[%c0_15, %c0_16, %c0_17] : memref<1x128x256xf32, #tpu.memory_space<vmem>>, vector<1x128x256xf32>
      tpu.vector_store %arg5[%c0_15, %c0_16, %c0_17], %22 {strides = array<i32>} : memref<1x128x256xf32, #tpu.memory_space<vmem>>, vector<1x128x256xf32>,
    } else {
    }
    %c0 = arith.constant 0 : index
    %c0_1 = arith.constant 0 : index
    %c0_2 = arith.constant 0 : index
    %3 = vector.load %arg2[%c0, %c0_1, %c0_2] : memref<1x32x256xf32, #tpu.memory_space<vmem>>, vector<1x32x256xf32>
    %4 = vector.shape_cast %3 : vector<1x32x256xf32> to vector<32x256xf32>
    %5 = arith.truncf %4 : vector<32x256xf32> to vector<32x256xbf16>
    %c0_3 = arith.constant 0 : index
    %c0_4 = arith.constant 0 : index
    %c0_5 = arith.constant 0 : index
    %6 = vector.load %arg3[%c0_3, %c0_4, %c0_5] : memref<1x1x256xi32, #tpu.memory_space<vmem>>, vector<1x1x256xi32>
    %7 = vector.shape_cast %6 : vector<1x1x256xi32> to vector<1x256xi32>
    %8 = tpu.iota {dimensions = array<i32: 0>} : vector<16x256xi32>
    %9 = vector.broadcast %7 : vector<1x256xi32> to vector<16x256xi32>
    %10 = arith.cmpi eq, %8, %9 : vector<16x256xi32>
    %11 = arith.extui %10 : vector<16x256xi1> to vector<16x256xi32>
    %12 = arith.sitofp %11 : vector<16x256xi32> to vector<16x256xf32>
    %13 = arith.truncf %12 : vector<16x256xf32> to vector<16x256xbf16>
    %14 = tpu.concatenate %5, %13 in 0 : vector<32x256xbf16>, vector<16x256xbf16> -> vector<48x256xbf16>
    %c0_6 = arith.constant 0 : index
    %c0_7 = arith.constant 0 : index
    %15 = vector.load %arg4[%c0_6, %c0_7] : memref<128x48xbf16, #tpu.memory_space<vmem>>, vector<128x48xbf16>
    %cst = arith.constant dense<0.000000e+00> : vector<128x256xf32>
    %16 = tpu.matmul %15, %14, %cst {dimension_numbers = #tpu.dot_dimension_numbers<[1], [0], [0], [1], [0, 0, 1, 1], [], []>} : vector<128x48xbf16>, vector<48x256xbf16>, vector<128x256xf32> -> vector<128x256xf32>
    %c0_8 = arith.constant 0 : index
    %c0_9 = arith.constant 0 : index
    %c0_10 = arith.constant 0 : index
    %17 = vector.load %arg5[%c0_8, %c0_9, %c0_10] : memref<1x128x256xf32, #tpu.memory_space<vmem>>, vector<1x128x256xf32>
    %18 = arith.mulf %16, %16 : vector<128x256xf32>
    %19 = vector.shape_cast %18 : vector<128x256xf32> to vector<1x128x256xf32>
    %20 = arith.addf %17, %19 : vector<1x128x256xf32>
    %c0_11 = arith.constant 0 : index
    %c0_12 = arith.constant 0 : index
    %c0_13 = arith.constant 0 : index
    %21 = vector.load %arg5[%c0_11, %c0_12, %c0_13] : memref<1x128x256xf32, #tpu.memory_space<vmem>>, vector<1x128x256xf32>
    tpu.vector_store %arg5[%c0_11, %c0_12, %c0_13], %20 {strides = array<i32>} : memref<1x128x256xf32, #tpu.memory_space<vmem>>, vector<1x128x256xf32>,
    return
  }
  func.func @transform_0(%arg0: i32, %arg1: i32) -> (i32, i32, i32) {
    %c0_i32 = arith.constant 0 : i32
    %c0_i32_0 = arith.constant 0 : i32
    return %arg0, %c0_i32, %arg1 : i32, i32, i32
  }
  func.func @transform_1(%arg0: i32, %arg1: i32) -> (i32, i32, i32) {
    %c0_i32 = arith.constant 0 : i32
    %c0_i32_0 = arith.constant 0 : i32
    return %arg0, %c0_i32, %arg1 : i32, i32, i32
  }
  func.func @transform_2(%arg0: i32, %arg1: i32) -> (i32, i32) {
    %c0_i32 = arith.constant 0 : i32
    %c0_i32_0 = arith.constant 0 : i32
    %c0_i32_1 = arith.constant 0 : i32
    return %c0_i32, %c0_i32_0 : i32, i32
  }
  func.func @transform_3(%arg0: i32, %arg1: i32) -> (i32, i32, i32) {
    %c0_i32 = arith.constant 0 : i32
    %c0_i32_0 = arith.constant 0 : i32
    %c0_i32_1 = arith.constant 0 : i32
    return %arg0, %c0_i32, %c0_i32_0 : i32, i32, i32
  }
}

module attributes {stable_mosaic.version = 11 : i64} {
  func.func @_kd_distill_kernel(%arg0: i32, %arg1: i32, %arg2: memref<1x64x128xf32, #tpu.memory_space<vmem>>, %arg3: memref<1x1x128xi32, #tpu.memory_space<vmem>>, %arg4: memref<128x80xbf16, #tpu.memory_space<vmem>>, %arg5: memref<1x128x128xf32, #tpu.memory_space<vmem>>) attributes {dimension_semantics = [#tpu.dimension_semantics<parallel>, #tpu.dimension_semantics<arbitrary>], iteration_bounds = array<i64: 2, 1>, scalar_prefetch = 0 : i64, scratch_operands = 0 : i64, tpu.core_type = #tpu.core_type<tc>, window_params = [{transform_indices = @transform_0, window_bounds = array<i64: 1, 64, 128>}, {transform_indices = @transform_1, window_bounds = array<i64: 1, 1, 128>}, {pipeline_mode = #tpu.pipeline_mode<synchronous>, transform_indices = @transform_2, window_bounds = array<i64: 128, 80>}, {transform_indices = @transform_3, window_bounds = array<i64: 1, 128, 128>}]} {
    %c0_i32 = arith.constant 0 : i32
    %0 = arith.cmpi eq, %arg1, %c0_i32 : i32
    %1 = arith.extui %0 : i1 to i32
    %c0_i32_0 = arith.constant 0 : i32
    %2 = arith.cmpi ne, %1, %c0_i32_0 : i32
    scf.if %2 {
      %cst_14 = arith.constant 0.000000e+00 : f32
      %22 = vector.broadcast %cst_14 : f32 to vector<1x128x128xf32>
      %c0_15 = arith.constant 0 : index
      %c0_16 = arith.constant 0 : index
      %c0_17 = arith.constant 0 : index
      %23 = vector.load %arg5[%c0_15, %c0_16, %c0_17] : memref<1x128x128xf32, #tpu.memory_space<vmem>>, vector<1x128x128xf32>
      tpu.vector_store %arg5[%c0_15, %c0_16, %c0_17], %22 {strides = array<i32>} : memref<1x128x128xf32, #tpu.memory_space<vmem>>, vector<1x128x128xf32>,
    } else {
    }
    %c0 = arith.constant 0 : index
    %c0_1 = arith.constant 0 : index
    %c0_2 = arith.constant 0 : index
    %3 = vector.load %arg2[%c0, %c0_1, %c0_2] : memref<1x64x128xf32, #tpu.memory_space<vmem>>, vector<1x64x128xf32>
    %4 = vector.shape_cast %3 : vector<1x64x128xf32> to vector<64x128xf32>
    %5 = arith.truncf %4 : vector<64x128xf32> to vector<64x128xbf16>
    %c0_3 = arith.constant 0 : index
    %c0_4 = arith.constant 0 : index
    %c0_5 = arith.constant 0 : index
    %6 = vector.load %arg3[%c0_3, %c0_4, %c0_5] : memref<1x1x128xi32, #tpu.memory_space<vmem>>, vector<1x1x128xi32>
    %7 = vector.shape_cast %6 : vector<1x1x128xi32> to vector<1x128xi32>
    %8 = tpu.iota {dimensions = array<i32: 0>} : vector<16x128xi32>
    %9 = vector.broadcast %7 : vector<1x128xi32> to vector<16x128xi32>
    %10 = arith.cmpi eq, %8, %9 : vector<16x128xi32>
    %11 = arith.extui %10 : vector<16x128xi1> to vector<16x128xi32>
    %12 = arith.sitofp %11 : vector<16x128xi32> to vector<16x128xf32>
    %13 = arith.truncf %12 : vector<16x128xf32> to vector<16x128xbf16>
    %14 = tpu.concatenate %5, %13 in 0 : vector<64x128xbf16>, vector<16x128xbf16> -> vector<80x128xbf16>
    %c0_6 = arith.constant 0 : index
    %c0_7 = arith.constant 0 : index
    %15 = vector.load %arg4[%c0_6, %c0_7] : memref<128x80xbf16, #tpu.memory_space<vmem>>, vector<128x80xbf16>
    %cst = arith.constant dense<0.000000e+00> : vector<128x128xf32>
    %16 = tpu.matmul %15, %14, %cst {dimension_numbers = #tpu.dot_dimension_numbers<[1], [0], [0], [1], [0, 0, 1, 1], [], []>} : vector<128x80xbf16>, vector<80x128xbf16>, vector<128x128xf32> -> vector<128x128xf32>
    %c0_8 = arith.constant 0 : index
    %c0_9 = arith.constant 0 : index
    %c0_10 = arith.constant 0 : index
    %17 = vector.load %arg5[%c0_8, %c0_9, %c0_10] : memref<1x128x128xf32, #tpu.memory_space<vmem>>, vector<1x128x128xf32>
    %18 = arith.mulf %16, %16 : vector<128x128xf32>
    %19 = vector.shape_cast %18 : vector<128x128xf32> to vector<1x128x128xf32>
    %20 = arith.addf %17, %19 : vector<1x128x128xf32>
    %c0_11 = arith.constant 0 : index
    %c0_12 = arith.constant 0 : index
    %c0_13 = arith.constant 0 : index
    %21 = vector.load %arg5[%c0_11, %c0_12, %c0_13] : memref<1x128x128xf32, #tpu.memory_space<vmem>>, vector<1x128x128xf32>
    tpu.vector_store %arg5[%c0_11, %c0_12, %c0_13], %20 {strides = array<i32>} : memref<1x128x128xf32, #tpu.memory_space<vmem>>, vector<1x128x128xf32>,
    return
  }
  func.func @transform_0(%arg0: i32, %arg1: i32) -> (i32, i32, i32) {
    %c0_i32 = arith.constant 0 : i32
    %c0_i32_0 = arith.constant 0 : i32
    return %arg0, %c0_i32, %arg1 : i32, i32, i32
  }
  func.func @transform_1(%arg0: i32, %arg1: i32) -> (i32, i32, i32) {
    %c0_i32 = arith.constant 0 : i32
    %c0_i32_0 = arith.constant 0 : i32
    return %arg0, %c0_i32, %arg1 : i32, i32, i32
  }
  func.func @transform_2(%arg0: i32, %arg1: i32) -> (i32, i32) {
    %c0_i32 = arith.constant 0 : i32
    %c0_i32_0 = arith.constant 0 : i32
    %c0_i32_1 = arith.constant 0 : i32
    return %c0_i32, %c0_i32_0 : i32, i32
  }
  func.func @transform_3(%arg0: i32, %arg1: i32) -> (i32, i32, i32) {
    %c0_i32 = arith.constant 0 : i32
    %c0_i32_0 = arith.constant 0 : i32
    %c0_i32_1 = arith.constant 0 : i32
    return %arg0, %c0_i32, %c0_i32_0 : i32, i32, i32
  }
}

module attributes {stable_mosaic.version = 11 : i64} {
  func.func @_dual_row_affine_kernel(%arg0: i32, %arg1: i32, %arg2: memref<128x64xf32, #tpu.memory_space<vmem>>, %arg3: memref<128x4xf32, #tpu.memory_space<vmem>>, %arg4: memref<128x64xf32, #tpu.memory_space<vmem>>, %arg5: memref<128x64xf32, #tpu.memory_space<vmem>>) attributes {dimension_semantics = [#tpu.dimension_semantics<parallel>, #tpu.dimension_semantics<parallel>], iteration_bounds = array<i64: 1, 1>, scalar_prefetch = 0 : i64, scratch_operands = 0 : i64, tpu.core_type = #tpu.core_type<tc>, window_params = [{transform_indices = @transform_0, window_bounds = array<i64: 128, 64>}, {transform_indices = @transform_1, window_bounds = array<i64: 128, 4>}, {transform_indices = @transform_2, window_bounds = array<i64: 128, 64>}, {transform_indices = @transform_3, window_bounds = array<i64: 128, 64>}]} {
    %c0 = arith.constant 0 : index
    %c0_0 = arith.constant 0 : index
    %0 = vector.load %arg2[%c0, %c0_0] : memref<128x64xf32, #tpu.memory_space<vmem>>, vector<128x64xf32>
    %c0_1 = arith.constant 0 : index
    %c0_2 = arith.constant 0 : index
    %1 = vector.load %arg3[%c0_1, %c0_2] : memref<128x4xf32, #tpu.memory_space<vmem>>, vector<128x4xf32>
    %2 = vector.extract_strided_slice %1 {offsets = [0, 0], sizes = [128, 1], strides = [1, 1]} : vector<128x4xf32> to vector<128x1xf32>
    %3 = vector.broadcast %2 : vector<128x1xf32> to vector<128x64xf32>
    %4 = arith.mulf %0, %3 : vector<128x64xf32>
    %5 = vector.extract_strided_slice %1 {offsets = [0, 1], sizes = [128, 1], strides = [1, 1]} : vector<128x4xf32> to vector<128x1xf32>
    %6 = vector.broadcast %5 : vector<128x1xf32> to vector<128x64xf32>
    %7 = arith.addf %4, %6 : vector<128x64xf32>
    %c0_3 = arith.constant 0 : index
    %c0_4 = arith.constant 0 : index
    %8 = vector.load %arg4[%c0_3, %c0_4] : memref<128x64xf32, #tpu.memory_space<vmem>>, vector<128x64xf32>
    tpu.vector_store %arg4[%c0_3, %c0_4], %7 {strides = array<i32>} : memref<128x64xf32, #tpu.memory_space<vmem>>, vector<128x64xf32>,
    %9 = vector.extract_strided_slice %1 {offsets = [0, 2], sizes = [128, 1], strides = [1, 1]} : vector<128x4xf32> to vector<128x1xf32>
    %10 = vector.broadcast %9 : vector<128x1xf32> to vector<128x64xf32>
    %11 = arith.mulf %0, %10 : vector<128x64xf32>
    %12 = vector.extract_strided_slice %1 {offsets = [0, 3], sizes = [128, 1], strides = [1, 1]} : vector<128x4xf32> to vector<128x1xf32>
    %13 = vector.broadcast %12 : vector<128x1xf32> to vector<128x64xf32>
    %14 = arith.addf %11, %13 : vector<128x64xf32>
    %c0_5 = arith.constant 0 : index
    %c0_6 = arith.constant 0 : index
    %15 = vector.load %arg5[%c0_5, %c0_6] : memref<128x64xf32, #tpu.memory_space<vmem>>, vector<128x64xf32>
    tpu.vector_store %arg5[%c0_5, %c0_6], %14 {strides = array<i32>} : memref<128x64xf32, #tpu.memory_space<vmem>>, vector<128x64xf32>,
    return
  }
  func.func @transform_0(%arg0: i32, %arg1: i32) -> (i32, i32) {
    %c0_i32 = arith.constant 0 : i32
    return %arg0, %arg1 : i32, i32
  }
  func.func @transform_1(%arg0: i32, %arg1: i32) -> (i32, i32) {
    %c0_i32 = arith.constant 0 : i32
    %c0_i32_0 = arith.constant 0 : i32
    return %arg0, %c0_i32 : i32, i32
  }
  func.func @transform_2(%arg0: i32, %arg1: i32) -> (i32, i32) {
    %c0_i32 = arith.constant 0 : i32
    return %arg0, %arg1 : i32, i32
  }
  func.func @transform_3(%arg0: i32, %arg1: i32) -> (i32, i32) {
    %c0_i32 = arith.constant 0 : i32
    return %arg0, %arg1 : i32, i32
  }
}

module attributes {stable_mosaic.version = 11 : i64} {
  func.func @_row_affine_kernel(%arg0: i32, %arg1: i32, %arg2: memref<6x16384xf32, #tpu.memory_space<vmem>>, %arg3: memref<6x2xf32, #tpu.memory_space<vmem>>, %arg4: memref<6x16384xf32, #tpu.memory_space<vmem>>) attributes {dimension_semantics = [#tpu.dimension_semantics<parallel>, #tpu.dimension_semantics<parallel>], iteration_bounds = array<i64: 1, 1>, scalar_prefetch = 0 : i64, scratch_operands = 0 : i64, tpu.core_type = #tpu.core_type<tc>, window_params = [{transform_indices = @transform_0, window_bounds = array<i64: 6, 16384>}, {transform_indices = @transform_1, window_bounds = array<i64: 6, 2>}, {transform_indices = @transform_2, window_bounds = array<i64: 6, 16384>}]} {
    %c0 = arith.constant 0 : index
    %c0_0 = arith.constant 0 : index
    %0 = vector.load %arg3[%c0, %c0_0] : memref<6x2xf32, #tpu.memory_space<vmem>>, vector<6x2xf32>
    %c0_1 = arith.constant 0 : index
    %c0_2 = arith.constant 0 : index
    %1 = vector.load %arg2[%c0_1, %c0_2] : memref<6x16384xf32, #tpu.memory_space<vmem>>, vector<6x16384xf32>
    %2 = vector.extract_strided_slice %0 {offsets = [0, 0], sizes = [6, 1], strides = [1, 1]} : vector<6x2xf32> to vector<6x1xf32>
    %3 = vector.broadcast %2 : vector<6x1xf32> to vector<6x16384xf32>
    %4 = arith.mulf %1, %3 : vector<6x16384xf32>
    %5 = vector.extract_strided_slice %0 {offsets = [0, 1], sizes = [6, 1], strides = [1, 1]} : vector<6x2xf32> to vector<6x1xf32>
    %6 = vector.broadcast %5 : vector<6x1xf32> to vector<6x16384xf32>
    %7 = arith.addf %4, %6 : vector<6x16384xf32>
    %c0_3 = arith.constant 0 : index
    %c0_4 = arith.constant 0 : index
    %8 = vector.load %arg4[%c0_3, %c0_4] : memref<6x16384xf32, #tpu.memory_space<vmem>>, vector<6x16384xf32>
    tpu.vector_store %arg4[%c0_3, %c0_4], %7 {strides = array<i32>} : memref<6x16384xf32, #tpu.memory_space<vmem>>, vector<6x16384xf32>,
    return
  }
  func.func @transform_0(%arg0: i32, %arg1: i32) -> (i32, i32) {
    %c0_i32 = arith.constant 0 : i32
    return %arg0, %arg1 : i32, i32
  }
  func.func @transform_1(%arg0: i32, %arg1: i32) -> (i32, i32) {
    %c0_i32 = arith.constant 0 : i32
    %c0_i32_0 = arith.constant 0 : i32
    return %arg0, %c0_i32 : i32, i32
  }
  func.func @transform_2(%arg0: i32, %arg1: i32) -> (i32, i32) {
    %c0_i32 = arith.constant 0 : i32
    return %arg0, %arg1 : i32, i32
  }
}

</mosaic_0001>

<bundles_post_ra>
// kernel: tile.55
= control target key start
LH: loop header
LB: loop body
LE: loop exit
PB: predicated region body
PF: predicated region fallthrough
CT: control target
= control target key end

     0   :  { %s22_s0 = inlined_call_operand.vmem [shape: f32[64], index: 0, kind: input, shape index: {}]   ;;  %s23_s1 = inlined_call_operand.vmem [shape: f32[2,64], index: 1, kind: output, shape index: {}]  }
   0x1   :  { %v4_v0 = vld [vmem:[%s22_s0] ss:$0 sm:$0xff] }
   0x2   :  { %5 = vst [vmem:[%s23_s1] sm:$0x3] %v4_v0 }

// kernel: forward_training.7
= control target key start
LH: loop header
LB: loop body
LE: loop exit
PB: predicated region body
PF: predicated region fallthrough
CT: control target
= control target key end

     0   :  { %s872_s12 = smov 0   ;;  %s874_s13 = smov 0   ;;  %s987_s0 = inlined_call_operand.vmem [shape: f32[2,32,256], index: 0, kind: input, shape index: {}]   ;;  %s988_s1 = inlined_call_operand.vmem [shape: s32[2,1,256], index: 1, kind: input, shape index: {}]   ;;  %s989_s2 = inlined_call_operand.vmem [shape: bf16[128,48], index: 2, kind: input, shape index: {}]   ;;  %s990_s3 = inlined_call_operand.vmem [shape: f32[2,128,256], index: 3, kind: output, shape index: {}]  }
   0x1   :  { %s876_s14 = smov 0  }
   0x2 LB: > { %s25_s15 = sadd.s32 1, %s845_s13  ;;  %p726_p0 = scmp.ge.s32.totalorder %s849_s14, 1  ;;  %s849_s14 = sphi %s876_s14, %s13_s14   ;;  %s845_s13 = sphi %s874_s13, %s992_s13   ;;  %s841_s12 = sphi %s872_s12, %s991_s12  }
   0x3   : > { %p27_p1 = scmp.ge.s32.totalorder %s25_s15, 2  ;;  %p172_p2 = scmp.lt.s32.totalorder %s849_s14, 3 }
   0x5   : > { %s994_s15 = smov (%p27_p1, %s25_s15), 0  ;;  %p173_p3 = pnand %p726_p0, %p172_p2 }
   0x6   : > { %p209_p4 = scmp.lt.s32.totalorder (!%p173_p3), %s841_s12, 1 }
   0x7   : > { %176 = sbr.rel (%p173_p3) target bundleno = 229 (0xe5), region = 32 }
   0xc   : > { %v282_v0 = vlaneseq  ;;  %s996_s12 = smov (!%p209_p4, %s841_s12), 1  ;;  %v851_v16 = vmov 0.0   ;;  %v788_v43 = vld [vmem:[%s989_s2] sm:$0xff]  ;;  %vm387_vm4 = vcmask 392192   ;;  %v789_v45 = vld [vmem:[%s989_s2 + $0x8] sm:$0xff]  ;;  %v790_v47 = vld [vmem:[%s989_s2 + $0x10] sm:$0xff] }
   0xd   : > { %s786_s16 = sshll.u32 %s996_s12, 6  ;;  %s729_s17 = sshll.u32 %s996_s12, 1  ;;  %v792_v44 = vld [vmem:[%s989_s2 + $0x20] sm:$0xff]  ;;  %v793_v46 = vld [vmem:[%s989_s2 + $0x28] sm:$0xff]  ;;  %v794_v48 = vld [vmem:[%s989_s2 + $0x30] sm:$0xff] }
   0xe   : > { %v283_v1 = vshrl.u32 %v282_v0, 7  ;;  %s216_s20 = scalar_lea.vmem %s987_s0, %s786_s16  ;;  %s225_s23 = scalar_lea.vmem %s988_s1, %s729_s17  ;;  %v791_v49 = vld [vmem:[%s989_s2 + $0x18] sm:$0xff] }
   0xf   : > { %v281_v3 = vld [vmem:[%s225_s23] sm:$0x3]  ;;  %v274_v5 = vld [vmem:[%s216_s20 + $0x28] sm:$0xff]  ;;  %v275_v8 = vld [vmem:[%s216_s20 + $0x30] sm:$0xff]  ;;  %s787_s17 = sshll.u32 %s996_s12, 8 }
  0x10   : > { %v284_v2 = vadd.s32 8, %v283_v1  ;;  %v273_v4 = vld [vmem:[%s216_s20 + $0x20] sm:$0xff]  ;;  %v285_v6 = vperm.slane %v281_v3, 0  ;;  %v286_v7 = vperm.slane %v281_v3, 1  ;;  %v276_v9 = vld [vmem:[%s216_s20 + $0x38] sm:$0xff]  ;;  %v270_v13 = vld [vmem:[%s216_s20 + $0x8] sm:$0xff] }
  0x11   : > { %v279_v10 = vpack.c.bf16 %v274_v5, %v273_v4  ;;  %v280_v11 = vpack.c.bf16 %v276_v9, %v275_v8  ;;  %v269_v12 = vld [vmem:[%s216_s20] sm:$0xff]  ;;  %v271_v14 = vld [vmem:[%s216_s20 + $0x10] sm:$0xff]  ;;  %v272_v15 = vld [vmem:[%s216_s20 + $0x18] sm:$0xff]  ;;  %s944_s20 = scalar_lea.vmem %s990_s3, %s787_s17 }
  0x12   : > { %vm287_vm0 = vcmp.eq.s32.totalorder %v283_v1, %v285_v6  ;;  %vm288_vm1 = vcmp.eq.s32.totalorder %v283_v1, %v286_v7  ;;  %vm289_vm2 = vcmp.eq.s32.totalorder %v284_v2, %v285_v6  ;;  %vm290_vm3 = vcmp.eq.s32.totalorder %v284_v2, %v286_v7  ;;  %v795_v50 = vld [vmem:[%s989_s2 + $0x38] sm:$0xff] }
  0x13   : > { %v732_v17 = vsel %vm287_vm0, 1.0, %v851_v16  ;;  %v733_v18 = vsel %vm288_vm1, 1.0, %v851_v16  ;;  %v734_v19 = vsel %vm289_vm2, 1.0, %v851_v16  ;;  %v735_v20 = vsel %vm290_vm3, 1.0, %v851_v16 }
  0x14   : > { %v299_v21 = vpack.c.bf16 %v733_v18, %v732_v17  ;;  %v300_v22 = vpack.c.bf16 %v735_v20, %v734_v19  ;;  %v309_v23 = vunpack.c.l.b16 %v279_v10  ;;  %v311_v24 = vunpack.c.l.b16 %v280_v11 }
  0x15   : > { %v277_v25 = vpack.c.bf16 %v270_v13, %v269_v12  ;;  %v278_v26 = vpack.c.bf16 %v272_v15, %v271_v14  ;;  %v310_v31 = vunpack.c.h.b16 %v279_v10  ;;  %v312_v32 = vunpack.c.h.b16 %v280_v11 }
  0x16   : > { %v323_v27 = vunpack.c.l.b16 %v299_v21  ;;  %v325_v28 = vunpack.c.l.b16 %v300_v22  ;;  %v324_v29 = vunpack.c.h.b16 %v299_v21  ;;  %v326_v30 = vunpack.c.h.b16 %v300_v22 }
  0x17   : > { %v315_v35 = vpack.c.b16 %v311_v24, %v309_v23  ;;  %v305_v36 = vunpack.c.l.b16 %v277_v25  ;;  %v307_v37 = vunpack.c.l.b16 %v278_v26  ;;  %v316_v38 = vpack.c.b16 %v312_v32, %v310_v31 }
  0x18   : > { %v327_v33 = vpack.c.b16 %v325_v28, %v323_v27  ;;  %v328_v34 = vpack.c.b16 %v326_v30, %v324_v29  ;;  %v306_v39 = vunpack.c.h.b16 %v277_v25  ;;  %v308_v40 = vunpack.c.h.b16 %v278_v26 }
  0x19   : > { %v313_v41 = vpack.c.b16 %v307_v37, %v305_v36 }
  0x1a   : > { %417 = vmatpush.bf16.msra.mxu0 %v327_v33  ;;  %796 = vmatpush.bf16.msra.mxu2 %v327_v33  ;;  %v314_v42 = vpack.c.b16 %v308_v40, %v306_v39 }
  0x1b   : > { %466 = vmatpush.bf16.msra.mxu1 %v328_v34  ;;  %799 = vmatpush.bf16.msra.mxu3 %v328_v34 }
  0x1e   : > { %418 = vmatpush.bf16.msra.mxu0 %v315_v35  ;;  %797 = vmatpush.bf16.msra.mxu2 %v315_v35 }
  0x1f   : > { %467 = vmatpush.bf16.msra.mxu1 %v316_v38  ;;  %800 = vmatpush.bf16.msra.mxu3 %v316_v38 }
  0x22   : > { %419 = vmatpush.bf16.msra.mxu0 %v313_v41  ;;  %798 = vmatpush.bf16.msra.mxu2 %v313_v41 }
  0x23   : > { %468 = vmatpush.bf16.msra.mxu1 %v314_v42  ;;  %801 = vmatpush.bf16.msra.mxu3 %v314_v42 }
  0x25   : > { %768 = vmatmul.msk.bf16.vlgmr.msra.gmra.mxu0 %vm387_vm4, %v788_v43  ;;  %772 = vmatmul.msk.bf16.vlgmr.msra.gmra.mxu2 %vm387_vm4, %v792_v44 }
  0x26   : > { %776 = vmatmul.msk.bf16.vlgmr.msra.gmra.mxu1 %vm387_vm4, %v788_v43  ;;  %780 = vmatmul.msk.bf16.vlgmr.msra.gmra.mxu3 %vm387_vm4, %v792_v44 }
  0x35   : > { %769 = vmatmul.msk.bf16.gmra.mxu0 %vm387_vm4, %v789_v45  ;;  %773 = vmatmul.msk.bf16.gmra.mxu2 %vm387_vm4, %v793_v46 }
  0x36   : > { %777 = vmatmul.msk.bf16.gmra.mxu1 %vm387_vm4, %v789_v45  ;;  %781 = vmatmul.msk.bf16.gmra.mxu3 %vm387_vm4, %v793_v46 }
  0x45   : > { %770 = vmatmul.msk.bf16.gmra.mxu0 %vm387_vm4, %v790_v47  ;;  %774 = vmatmul.msk.bf16.gmra.mxu2 %vm387_vm4, %v794_v48 }
  0x46   : > { %778 = vmatmul.msk.bf16.gmra.mxu1 %vm387_vm4, %v790_v47  ;;  %782 = vmatmul.msk.bf16.gmra.mxu3 %vm387_vm4, %v794_v48 }
  0x55   : > { %771 = vmatmul.msk.bf16.gmra.mxu0 %vm387_vm4, %v791_v49  ;;  %775 = vmatmul.msk.bf16.gmra.mxu2 %vm387_vm4, %v795_v50 }
  0x56   : > { %779 = vmatmul.msk.bf16.gmra.mxu1 %vm387_vm4, %v791_v49  ;;  %783 = vmatmul.msk.bf16.gmra.mxu3 %vm387_vm4, %v795_v50 }
  0xa2   : > { %v421_v51 = vpop.f32.mrf.mxu0 }
  0xa3   : > { %v542_v52 = vmul.f32 %v421_v51, %v421_v51  ;;  %v470_v53 = vpop.f32.mrf.mxu1 }
  0xa4   : > { %v543_v54 = vmul.f32 %v470_v53, %v470_v53 }
  0xa5   : > { %606 = vst [vmem:[%s944_s20] sm:$0xff] %v542_v52 }
  0xa6   : > { %607 = vst [vmem:[%s944_s20 + $0x8] sm:$0xff] %v543_v54 }
  0xa8   : > { %v441_v55 = vpop.f32.mrf.mxu2 }
  0xa9   : > { %v558_v56 = vmul.f32 %v441_v55, %v441_v55  ;;  %v490_v57 = vpop.f32.mrf.mxu3 }
  0xaa   : > { %v559_v58 = vmul.f32 %v490_v57, %v490_v57  ;;  %v423_v59 = vpop.f32.mrf.mxu0 }
  0xab   : > { %v544_v60 = vmul.f32 %v423_v59, %v423_v59  ;;  %v472_v61 = vpop.f32.mrf.mxu1  ;;  %622 = vst [vmem:[%s944_s20 + $0x80] sm:$0xff] %v558_v56 }
  0xac   : > { %v545_v62 = vmul.f32 %v472_v61, %v472_v61  ;;  %623 = vst [vmem:[%s944_s20 + $0x88] sm:$0xff] %v559_v58 }
  0xad   : > { %608 = vst [vmem:[%s944_s20 + $0x10] sm:$0xff] %v544_v60 }
  0xae   : > { %609 = vst [vmem:[%s944_s20 + $0x18] sm:$0xff] %v545_v62 }
  0xb0   : > { %v443_v63 = vpop.f32.mrf.mxu2 }
  0xb1   : > { %v560_v0 = vmul.f32 %v443_v63, %v443_v63  ;;  %v492_v1 = vpop.f32.mrf.mxu3 }
  0xb2   : > { %v561_v2 = vmul.f32 %v492_v1, %v492_v1  ;;  %v426_v3 = vpop.f32.mrf.mxu0 }
  0xb3   : > { %v546_v4 = vmul.f32 %v426_v3, %v426_v3  ;;  %v475_v5 = vpop.f32.mrf.mxu1  ;;  %624 = vst [vmem:[%s944_s20 + $0x90] sm:$0xff] %v560_v0 }
  0xb4   : > { %v547_v6 = vmul.f32 %v475_v5, %v475_v5  ;;  %625 = vst [vmem:[%s944_s20 + $0x98] sm:$0xff] %v561_v2 }
  0xb5   : > { %610 = vst [vmem:[%s944_s20 + $0x20] sm:$0xff] %v546_v4 }
  0xb6   : > { %611 = vst [vmem:[%s944_s20 + $0x28] sm:$0xff] %v547_v6 }
  0xb8   : > { %v446_v7 = vpop.f32.mrf.mxu2 }
  0xb9   : > { %v562_v8 = vmul.f32 %v446_v7, %v446_v7  ;;  %v495_v9 = vpop.f32.mrf.mxu3 }
  0xba   : > { %v563_v10 = vmul.f32 %v495_v9, %v495_v9  ;;  %v428_v11 = vpop.f32.mrf.mxu0 }
  0xbb   : > { %v548_v12 = vmul.f32 %v428_v11, %v428_v11  ;;  %v477_v13 = vpop.f32.mrf.mxu1  ;;  %626 = vst [vmem:[%s944_s20 + $0xa0] sm:$0xff] %v562_v8 }
  0xbc   : > { %v549_v14 = vmul.f32 %v477_v13, %v477_v13  ;;  %627 = vst [vmem:[%s944_s20 + $0xa8] sm:$0xff] %v563_v10 }
  0xbd   : > { %612 = vst [vmem:[%s944_s20 + $0x30] sm:$0xff] %v548_v12 }
  0xbe   : > { %613 = vst [vmem:[%s944_s20 + $0x38] sm:$0xff] %v549_v14 }
  0xc0   : > { %v448_v15 = vpop.f32.mrf.mxu2 }
  0xc1   : > { %v564_v16 = vmul.f32 %v448_v15, %v448_v15  ;;  %v497_v17 = vpop.f32.mrf.mxu3 }
  0xc2   : > { %v565_v18 = vmul.f32 %v497_v17, %v497_v17  ;;  %v431_v19 = vpop.f32.mrf.mxu0 }
  0xc3   : > { %v550_v20 = vmul.f32 %v431_v19, %v431_v19  ;;  %v480_v21 = vpop.f32.mrf.mxu1  ;;  %628 = vst [vmem:[%s944_s20 + $0xb0] sm:$0xff] %v564_v16 }
  0xc4   : > { %v551_v22 = vmul.f32 %v480_v21, %v480_v21  ;;  %629 = vst [vmem:[%s944_s20 + $0xb8] sm:$0xff] %v565_v18 }
  0xc5   : > { %614 = vst [vmem:[%s944_s20 + $0x40] sm:$0xff] %v550_v20 }
  0xc6   : > { %615 = vst [vmem:[%s944_s20 + $0x48] sm:$0xff] %v551_v22 }
  0xc8   : > { %v451_v23 = vpop.f32.mrf.mxu2 }
  0xc9   : > { %v566_v24 = vmul.f32 %v451_v23, %v451_v23  ;;  %v500_v25 = vpop.f32.mrf.mxu3 }
  0xca   : > { %v567_v26 = vmul.f32 %v500_v25, %v500_v25  ;;  %v433_v27 = vpop.f32.mrf.mxu0 }
  0xcb   : > { %v552_v28 = vmul.f32 %v433_v27, %v433_v27  ;;  %v482_v29 = vpop.f32.mrf.mxu1  ;;  %630 = vst [vmem:[%s944_s20 + $0xc0] sm:$0xff] %v566_v24 }
  0xcc   : > { %v553_v30 = vmul.f32 %v482_v29, %v482_v29  ;;  %631 = vst [vmem:[%s944_s20 + $0xc8] sm:$0xff] %v567_v26 }
  0xcd   : > { %616 = vst [vmem:[%s944_s20 + $0x50] sm:$0xff] %v552_v28 }
  0xce   : > { %617 = vst [vmem:[%s944_s20 + $0x58] sm:$0xff] %v553_v30 }
  0xd0   : > { %v453_v31 = vpop.f32.mrf.mxu2 }
  0xd1   : > { %v568_v32 = vmul.f32 %v453_v31, %v453_v31  ;;  %v502_v33 = vpop.f32.mrf.mxu3 }
  0xd2   : > { %v569_v34 = vmul.f32 %v502_v33, %v502_v33  ;;  %v436_v35 = vpop.f32.mrf.mxu0 }
  0xd3   : > { %v554_v36 = vmul.f32 %v436_v35, %v436_v35  ;;  %v485_v37 = vpop.f32.mrf.mxu1  ;;  %632 = vst [vmem:[%s944_s20 + $0xd0] sm:$0xff] %v568_v32 }
  0xd4   : > { %v555_v38 = vmul.f32 %v485_v37, %v485_v37  ;;  %633 = vst [vmem:[%s944_s20 + $0xd8] sm:$0xff] %v569_v34 }
  0xd5   : > { %618 = vst [vmem:[%s944_s20 + $0x60] sm:$0xff] %v554_v36 }
  0xd6   : > { %619 = vst [vmem:[%s944_s20 + $0x68] sm:$0xff] %v555_v38 }
  0xd8   : > { %v456_v39 = vpop.f32.mrf.mxu2 }
  0xd9   : > { %v570_v40 = vmul.f32 %v456_v39, %v456_v39  ;;  %v505_v41 = vpop.f32.mrf.mxu3 }
  0xda   : > { %v571_v42 = vmul.f32 %v505_v41, %v505_v41  ;;  %v438_v43 = vpop.f32.mrf.mxu0 }
  0xdb   : > { %v556_v44 = vmul.f32 %v438_v43, %v438_v43  ;;  %v487_v45 = vpop.f32.mrf.mxu1  ;;  %634 = vst [vmem:[%s944_s20 + $0xe0] sm:$0xff] %v570_v40 }
  0xdc   : > { %v557_v46 = vmul.f32 %v487_v45, %v487_v45  ;;  %635 = vst [vmem:[%s944_s20 + $0xe8] sm:$0xff] %v571_v42 }
  0xdd   : > { %620 = vst [vmem:[%s944_s20 + $0x70] sm:$0xff] %v556_v44 }
  0xde   : > { %621 = vst [vmem:[%s944_s20 + $0x78] sm:$0xff] %v557_v46 }
  0xe0   : > { %v458_v47 = vpop.f32.mrf.mxu2 }
  0xe1   : > { %v572_v48 = vmul.f32 %v458_v47, %v458_v47  ;;  %v507_v49 = vpop.f32.mrf.mxu3 }
  0xe2   : > { %v573_v50 = vmul.f32 %v507_v49, %v507_v49 }
  0xe3   : > { %636 = vst [vmem:[%s944_s20 + $0xf0] sm:$0xff] %v572_v48 }
  0xe4   : > { %637 = vst [vmem:[%s944_s20 + $0xf8] sm:$0xff] %v573_v50 }
  0xe5 PF: > { %s13_s14 = sadd.s32 1, %s849_s14   ;;  %s991_s12 = smov %s845_s13 }
  0xe6   : > { %p10_p5 = scmp.ge.s32.totalorder %s13_s14, 4   ;;  %s992_s13 = smov %s994_s15 }
  0xe8   :  { %12 = sbr.rel (!%p10_p5) target bundleno = 2 (0x2), region = 69 }

// kernel: tile.59
= control target key start
LH: loop header
LB: loop body
LE: loop exit
PB: predicated region body
PF: predicated region fallthrough
CT: control target
= control target key end

     0   :  { %vm7_vm0 = vcmask 523264   ;;  %vm13_vm1 = vcmask 1048064   ;;  %s39_s0 = inlined_call_operand.vmem [shape: f32[2,64], index: 0, kind: input, shape index: {}]   ;;  %s40_s1 = inlined_call_operand.vmem [shape: f32[128,1], index: 1, kind: output, shape index: {}]  }
   0x1   :  { %v4_v0 = vld [vmem:[%s39_s0] sm:$0x3]  ;;  %s22_s0 = smov 64  }
   0x2   :  { %5 = vst [vmem:[#allocation1] sm:$0x3] %v4_v0 }
   0x9   :  { %v10_v1 = vld [vmem:[#allocation1 + $0x1] sm:$0x1]   ;;  %v6_v2 = vld [vmem:[#allocation1] sm:$0x1]  }
   0xa   :  { %11 = vrot.lane.b32.xlu0 %v10_v1, %s22_s0  ;;  %8 = vst.msk [vmem:[#allocation0] sm:$0x1] %vm7_vm0, %v6_v2  }
  0x7c   :  { %v12_v3 = vpop.permute.xlu0 %11  }
  0x7d   :  { %14 = vst.msk [vmem:[#allocation0] sm:$0x1] %vm13_vm1, %v12_v3  }
  0x84   :  { %v17_v4 = vld [vmem:[#allocation0] sm:$0x1] }
  0x85   :  { %20 = vst [vmem:[%s40_s1] sm:$0x1] %v17_v4 }

// kernel: forward_training.6
= control target key start
LH: loop header
LB: loop body
LE: loop exit
PB: predicated region body
PF: predicated region fallthrough
CT: control target
= control target key end

     0   :  { %s1810_s12 = smov 0   ;;  %s1812_s13 = smov 0   ;;  %s2214_s0 = inlined_call_operand.vmem [shape: f32[2,16,1024], index: 0, kind: input, shape index: {}]   ;;  %s2215_s1 = inlined_call_operand.vmem [shape: s32[2,1,1024], index: 1, kind: input, shape index: {}]   ;;  %s2216_s2 = inlined_call_operand.vmem [shape: bf16[128,32], index: 2, kind: input, shape index: {}]   ;;  %s2217_s3 = inlined_call_operand.vmem [shape: f32[2,128,1024], index: 3, kind: output, shape index: {}]  }
   0x1   :  { %s1814_s14 = smov 0  }
   0x2 LB: > { %s25_s15 = sadd.s32 1, %s1783_s13  ;;  %p1610_p0 = scmp.ge.s32.totalorder %s1787_s14, 1  ;;  %s1787_s14 = sphi %s1814_s14, %s13_s14   ;;  %s1783_s13 = sphi %s1812_s13, %s2219_s13   ;;  %s1779_s12 = sphi %s1810_s12, %s2218_s12  }
   0x3   : > { %p27_p1 = scmp.ge.s32.totalorder %s25_s15, 2  ;;  %p172_p2 = scmp.lt.s32.totalorder %s1787_s14, 3 }
   0x5   : > { %s2221_s15 = smov (%p27_p1, %s25_s15), 0  ;;  %p173_p3 = pnand %p1610_p0, %p172_p2 }
   0x6   : > { %p209_p4 = scmp.lt.s32.totalorder (!%p173_p3), %s1779_s12, 1 }
   0x7   : > { %176 = sbr.rel (%p173_p3) target bundleno = 421 (0x1a5), region = 32 }
   0xc   : > { %v390_v0 = vlaneseq  ;;  %s2223_s12 = smov (!%p209_p4, %s1779_s12), 1  ;;  %v1789_v16 = vmov 0.0   ;;  %v1888_v63 = vld [vmem:[%s2216_s2] sm:$0xff]  ;;  %vm593_vm12 = vcmask 261120  }
   0xd   : > { %s1730_s16 = sshll.u32 %s2223_s12, 7  ;;  %s1613_s17 = sshll.u32 %s2223_s12, 3 }
   0xe   : > { %v1830_v1 = vshrl.u32 %v390_v0, 7  ;;  %s1837_s20 = scalar_lea.vmem %s2214_s0, %s1730_s16  ;;  %s225_s23 = scalar_lea.vmem %s2215_s1, %s1613_s17 }
   0xf   : > { %v1845_v3 = vld [vmem:[%s225_s23] sm:$0xff]  ;;  %v366_v5 = vld [vmem:[%s1837_s20 + $0x8] sm:$0xff]  ;;  %v367_v33 = vld [vmem:[%s1837_s20 + $0x10] sm:$0xff]  ;;  %s1731_s17 = sshll.u32 %s2223_s12, 10 }
  0x10   : > { %v1843_v2 = vadd.s32 8, %v1830_v1  ;;  %v365_v4 = vld [vmem:[%s1837_s20] sm:$0xff]  ;;  %v393_v6 = vperm.slane %v1845_v3, 0  ;;  %v394_v7 = vperm.slane %v1845_v3, 1  ;;  %v395_v8 = vperm.slane %v1845_v3, 2  ;;  %v374_v11 = vld [vmem:[%s1837_s20 + $0x48] sm:$0xff] }
  0x11   : > { %v396_v9 = vperm.slane %v1845_v3, 3  ;;  %v373_v10 = vld [vmem:[%s1837_s20 + $0x40] sm:$0xff]  ;;  %v381_v12 = vpack.c.bf16 %v366_v5, %v365_v4  ;;  %v399_v14 = vperm.slane %v1845_v3, 6  ;;  %v400_v15 = vperm.slane %v1845_v3, 7  ;;  %v368_v34 = vld [vmem:[%s1837_s20 + $0x18] sm:$0xff]  ;;  %v375_v39 = vld [vmem:[%s1837_s20 + $0x50] sm:$0xff] }
  0x12   : > { %v385_v13 = vpack.c.bf16 %v374_v11, %v373_v10  ;;  %vm401_vm0 = vcmp.eq.s32.totalorder %v1830_v1, %v393_v6  ;;  %vm402_vm1 = vcmp.eq.s32.totalorder %v1830_v1, %v394_v7  ;;  %vm409_vm2 = vcmp.eq.s32.totalorder %v1843_v2, %v393_v6  ;;  %v376_v40 = vld [vmem:[%s1837_s20 + $0x58] sm:$0xff] }
  0x13   : > { %vm410_vm3 = vcmp.eq.s32.totalorder %v1843_v2, %v394_v7  ;;  %v1616_v17 = vsel %vm401_vm0, 1.0, %v1789_v16  ;;  %v1617_v18 = vsel %vm402_vm1, 1.0, %v1789_v16  ;;  %v1624_v19 = vsel %vm409_vm2, 1.0, %v1789_v16 }
  0x14   : > { %v1625_v20 = vsel %vm410_vm3, 1.0, %v1789_v16  ;;  %v449_v21 = vpack.c.bf16 %v1617_v18, %v1616_v17  ;;  %vm403_vm4 = vcmp.eq.s32.totalorder %v1830_v1, %v395_v8  ;;  %vm404_vm5 = vcmp.eq.s32.totalorder %v1830_v1, %v396_v9 }
  0x15   : > { %v453_v22 = vpack.c.bf16 %v1625_v20, %v1624_v19  ;;  %vm411_vm6 = vcmp.eq.s32.totalorder %v1843_v2, %v395_v8  ;;  %vm412_vm7 = vcmp.eq.s32.totalorder %v1843_v2, %v396_v9  ;;  %v1618_v23 = vsel %vm403_vm4, 1.0, %v1789_v16 }
  0x16   : > { %v1619_v24 = vsel %vm404_vm5, 1.0, %v1789_v16  ;;  %v505_v25 = vunpack.c.l.b16 %v449_v21  ;;  %v506_v27 = vunpack.c.h.b16 %v449_v21  ;;  %v1626_v29 = vsel %vm411_vm6, 1.0, %v1789_v16 }
  0x17   : > { %v513_v26 = vunpack.c.l.b16 %v453_v22  ;;  %v514_v28 = vunpack.c.h.b16 %v453_v22  ;;  %v1627_v30 = vsel %vm412_vm7, 1.0, %v1789_v16  ;;  %v450_v31 = vpack.c.bf16 %v1619_v24, %v1618_v23  ;;  %v1911_v22 = vld [vmem:[%s2216_s2 + $0x8] sm:$0xff]  ;;  %v1924_v23 = vld [vmem:[%s2216_s2 + $0x10] sm:$0xff] }
  0x18   : > { %v465_v32 = vunpack.c.l.b16 %v381_v12  ;;  %v454_v37 = vpack.c.bf16 %v1627_v30, %v1626_v29  ;;  %v473_v38 = vunpack.c.l.b16 %v385_v13  ;;  %v466_v43 = vunpack.c.h.b16 %v381_v12  ;;  %v371_v24 = vld [vmem:[%s1837_s20 + $0x30] sm:$0xff]  ;;  %v369_v29 = vld [vmem:[%s1837_s20 + $0x20] sm:$0xff]  ;;  %v370_v30 = vld [vmem:[%s1837_s20 + $0x28] sm:$0xff] }
  0x19   : > { %v521_v35 = vpack.c.b16 %v513_v26, %v505_v25  ;;  %v522_v36 = vpack.c.b16 %v514_v28, %v506_v27  ;;  %v507_v41 = vunpack.c.l.b16 %v450_v31  ;;  %v508_v42 = vunpack.c.h.b16 %v450_v31  ;;  %v372_v25 = vld [vmem:[%s1837_s20 + $0x38] sm:$0xff]  ;;  %v379_v26 = vld [vmem:[%s1837_s20 + $0x70] sm:$0xff] }
  0x1a   : > { %v474_v44 = vunpack.c.h.b16 %v385_v13  ;;  %v515_v45 = vunpack.c.l.b16 %v454_v37  ;;  %v516_v46 = vunpack.c.h.b16 %v454_v37  ;;  %v481_v47 = vpack.c.b16 %v473_v38, %v465_v32  ;;  %v380_v27 = vld [vmem:[%s1837_s20 + $0x78] sm:$0xff]  ;;  %v377_v32 = vld [vmem:[%s1837_s20 + $0x60] sm:$0xff] }
  0x1b   : > { %624 = vmatpush.bf16.msra.mxu0 %v521_v35  ;;  %673 = vmatpush.bf16.msra.mxu1 %v522_v36  ;;  %v382_v48 = vpack.c.bf16 %v368_v34, %v367_v33  ;;  %v386_v50 = vpack.c.bf16 %v376_v40, %v375_v39  ;;  %vm407_vm8 = vcmp.eq.s32.totalorder %v1830_v1, %v399_v14  ;;  %v397_v4 = vperm.slane %v1845_v3, 4  ;;  %v378_v33 = vld [vmem:[%s1837_s20 + $0x68] sm:$0xff]  ;;  %s2011_s20 = scalar_lea.vmem %s2217_s3, %s1731_s17 }
  0x1c   : > { %v482_v49 = vpack.c.b16 %v474_v44, %v466_v43  ;;  %vm408_vm9 = vcmp.eq.s32.totalorder %v1830_v1, %v400_v15  ;;  %v523_v51 = vpack.c.b16 %v515_v45, %v507_v41  ;;  %v524_v52 = vpack.c.b16 %v516_v46, %v508_v42 }
  0x1d   : > { %v467_v53 = vunpack.c.l.b16 %v382_v48  ;;  %v468_v54 = vunpack.c.h.b16 %v382_v48  ;;  %v475_v55 = vunpack.c.l.b16 %v386_v50  ;;  %v476_v56 = vunpack.c.h.b16 %v386_v50  ;;  %v1945_v48 = vld [vmem:[%s2216_s2 + $0x18] sm:$0xff]  ;;  %v1971_v50 = vld [vmem:[%s2216_s2 + $0x28] sm:$0xff] }
  0x1e   : > { %vm415_vm10 = vcmp.eq.s32.totalorder %v1843_v2, %v399_v14  ;;  %vm416_vm11 = vcmp.eq.s32.totalorder %v1843_v2, %v400_v15  ;;  %722 = vmatpush.bf16.msra.mxu2 %v523_v51  ;;  %771 = vmatpush.bf16.msra.mxu3 %v524_v52  ;;  %v1622_v57 = vsel %vm407_vm8, 1.0, %v1789_v16  ;;  %v1623_v58 = vsel %vm408_vm9, 1.0, %v1789_v16  ;;  %v1984_v51 = vld [vmem:[%s2216_s2 + $0x30] sm:$0xff]  ;;  %v1997_v52 = vld [vmem:[%s2216_s2 + $0x38] sm:$0xff] }
  0x1f   : > { %v1630_v59 = vsel %vm415_vm10, 1.0, %v1789_v16  ;;  %v1631_v60 = vsel %vm416_vm11, 1.0, %v1789_v16  ;;  %625 = vmatpush.bf16.msra.mxu0 %v481_v47  ;;  %674 = vmatpush.bf16.msra.mxu1 %v482_v49  ;;  %v483_v61 = vpack.c.b16 %v475_v55, %v467_v53  ;;  %v484_v62 = vpack.c.b16 %v476_v56, %v468_v54  ;;  %v1958_v49 = vld [vmem:[%s2216_s2 + $0x20] sm:$0xff] }
  0x20   : > { %v452_v0 = vpack.c.bf16 %v1623_v58, %v1622_v57  ;;  %v456_v5 = vpack.c.bf16 %v1631_v60, %v1630_v59  ;;  %v398_v6 = vperm.slane %v1845_v3, 5  ;;  %vm405_vm13 = vcmp.eq.s32.totalorder %v1830_v1, %v397_v4 }
  0x21   : > { %vm413_vm14 = vcmp.eq.s32.totalorder %v1843_v2, %v397_v4  ;;  %v1620_v3 = vsel %vm405_vm13, 1.0, %v1789_v16  ;;  %v384_v28 = vpack.c.bf16 %v372_v25, %v371_v24  ;;  %v388_v31 = vpack.c.bf16 %v380_v27, %v379_v26 }
  0x22   : > { %v511_v7 = vunpack.c.l.b16 %v452_v0  ;;  %v512_v8 = vunpack.c.h.b16 %v452_v0  ;;  %723 = vmatpush.bf16.msra.mxu2 %v483_v61  ;;  %772 = vmatpush.bf16.msra.mxu3 %v484_v62  ;;  %v519_v9 = vunpack.c.l.b16 %v456_v5  ;;  %v520_v10 = vunpack.c.h.b16 %v456_v5 }
  0x23   : > { %vm406_vm15 = vcmp.eq.s32.totalorder %v1830_v1, %v398_v6  ;;  %vm414_vm0 = vcmp.eq.s32.totalorder %v1843_v2, %v398_v6  ;;  %1664 = vmatmul.msk.bf16.vlgmr.msra.gmra.mxu0 %vm593_vm12, %v1888_v63  ;;  %1672 = vmatmul.msk.bf16.vlgmr.msra.gmra.mxu1 %vm593_vm12, %v1888_v63  ;;  %v1628_v12 = vsel %vm413_vm14, 1.0, %v1789_v16  ;;  %v383_v34 = vpack.c.bf16 %v370_v30, %v369_v29 }
  0x24   : > { %v1621_v11 = vsel %vm406_vm15, 1.0, %v1789_v16  ;;  %v1629_v13 = vsel %vm414_vm0, 1.0, %v1789_v16  ;;  %v527_v14 = vpack.c.b16 %v519_v9, %v511_v7  ;;  %v528_v15 = vpack.c.b16 %v520_v10, %v512_v8 }
  0x25   : > { %v451_v17 = vpack.c.bf16 %v1621_v11, %v1620_v3  ;;  %v455_v1 = vpack.c.bf16 %v1629_v13, %v1628_v12  ;;  %1680 = vmatmul.msk.bf16.vlgmr.msra.gmra.mxu2 %vm593_vm12, %v1888_v63  ;;  %1688 = vmatmul.msk.bf16.vlgmr.msra.gmra.mxu3 %vm593_vm12, %v1888_v63  ;;  %v471_v35 = vunpack.c.l.b16 %v384_v28  ;;  %v472_v36 = vunpack.c.h.b16 %v384_v28 }
  0x26   : > { %918 = vmatpush.bf16.msrb.mxu2 %v527_v14  ;;  %967 = vmatpush.bf16.msrb.mxu3 %v528_v15  ;;  %v387_v37 = vpack.c.bf16 %v378_v33, %v377_v32  ;;  %v479_v38 = vunpack.c.l.b16 %v388_v31  ;;  %v480_v39 = vunpack.c.h.b16 %v388_v31  ;;  %v469_v40 = vunpack.c.l.b16 %v383_v34 }
  0x27   : > { %v509_v2 = vunpack.c.l.b16 %v451_v17  ;;  %v517_v18 = vunpack.c.l.b16 %v455_v1  ;;  %v510_v19 = vunpack.c.h.b16 %v451_v17  ;;  %v518_v20 = vunpack.c.h.b16 %v455_v1 }
  0x28   : > { %v470_v41 = vunpack.c.h.b16 %v383_v34  ;;  %v477_v42 = vunpack.c.l.b16 %v387_v37  ;;  %v478_v43 = vunpack.c.h.b16 %v387_v37  ;;  %v487_v44 = vpack.c.b16 %v479_v38, %v471_v35 }
  0x29   : > { %v525_v21 = vpack.c.b16 %v517_v18, %v509_v2  ;;  %v526_v16 = vpack.c.b16 %v518_v20, %v510_v19  ;;  %v488_v45 = vpack.c.b16 %v480_v39, %v472_v36 }
  0x2a   : > { %v485_v46 = vpack.c.b16 %v477_v42, %v469_v40  ;;  %v486_v47 = vpack.c.b16 %v478_v43, %v470_v41  ;;  %919 = vmatpush.bf16.msrb.mxu2 %v487_v44 }
  0x2b   : > { %820 = vmatpush.bf16.msrb.mxu0 %v525_v21  ;;  %869 = vmatpush.bf16.msrb.mxu1 %v526_v16 }
  0x2c   : > { %968 = vmatpush.bf16.msrb.mxu3 %v488_v45 }
  0x2f   : > { %821 = vmatpush.bf16.msrb.mxu0 %v485_v46  ;;  %870 = vmatpush.bf16.msrb.mxu1 %v486_v47 }
  0x33   : > { %1665 = vmatmul.msk.bf16.gmra.mxu0 %vm593_vm12, %v1911_v22  ;;  %1673 = vmatmul.msk.bf16.gmra.mxu1 %vm593_vm12, %v1911_v22 }
  0x35   : > { %1681 = vmatmul.msk.bf16.gmra.mxu2 %vm593_vm12, %v1911_v22  ;;  %1689 = vmatmul.msk.bf16.gmra.mxu3 %vm593_vm12, %v1911_v22 }
  0x43   : > { %1666 = vmatmul.msk.bf16.gmra.mxu0 %vm593_vm12, %v1924_v23  ;;  %1674 = vmatmul.msk.bf16.gmra.mxu1 %vm593_vm12, %v1924_v23 }
  0x45   : > { %1682 = vmatmul.msk.bf16.gmra.mxu2 %vm593_vm12, %v1924_v23  ;;  %1690 = vmatmul.msk.bf16.gmra.mxu3 %vm593_vm12, %v1924_v23 }
  0x53   : > { %1667 = vmatmul.msk.bf16.gmra.mxu0 %vm593_vm12, %v1945_v48  ;;  %1675 = vmatmul.msk.bf16.gmra.mxu1 %vm593_vm12, %v1945_v48 }
  0x55   : > { %1683 = vmatmul.msk.bf16.gmra.mxu2 %vm593_vm12, %v1945_v48  ;;  %1691 = vmatmul.msk.bf16.gmra.mxu3 %vm593_vm12, %v1945_v48 }
  0x63   : > { %1668 = vmatmul.msk.bf16.gmra.mxu0 %vm593_vm12, %v1958_v49  ;;  %1676 = vmatmul.msk.bf16.gmra.mxu1 %vm593_vm12, %v1958_v49 }
  0x65   : > { %1684 = vmatmul.msk.bf16.gmra.mxu2 %vm593_vm12, %v1958_v49  ;;  %1692 = vmatmul.msk.bf16.gmra.mxu3 %vm593_vm12, %v1958_v49 }
  0x73   : > { %1669 = vmatmul.msk.bf16.gmra.mxu0 %vm593_vm12, %v1971_v50  ;;  %1677 = vmatmul.msk.bf16.gmra.mxu1 %vm593_vm12, %v1971_v50 }
  0x75   : > { %1685 = vmatmul.msk.bf16.gmra.mxu2 %vm593_vm12, %v1971_v50  ;;  %1693 = vmatmul.msk.bf16.gmra.mxu3 %vm593_vm12, %v1971_v50 }
  0x83   : > { %1670 = vmatmul.msk.bf16.gmra.mxu0 %vm593_vm12, %v1984_v51  ;;  %1678 = vmatmul.msk.bf16.gmra.mxu1 %vm593_vm12, %v1984_v51 }
  0x85   : > { %1686 = vmatmul.msk.bf16.gmra.mxu2 %vm593_vm12, %v1984_v51  ;;  %1694 = vmatmul.msk.bf16.gmra.mxu3 %vm593_vm12, %v1984_v51 }
  0x93   : > { %1671 = vmatmul.msk.bf16.gmra.mxu0 %vm593_vm12, %v1997_v52  ;;  %1679 = vmatmul.msk.bf16.gmra.mxu1 %vm593_vm12, %v1997_v52 }
  0x95   : > { %1687 = vmatmul.msk.bf16.gmra.mxu2 %vm593_vm12, %v1997_v52  ;;  %1695 = vmatmul.msk.bf16.gmra.mxu3 %vm593_vm12, %v1997_v52 }
  0xa0   : > { %v627_v53 = vpop.f32.mrf.mxu0  ;;  %v676_v54 = vpop.f32.mrf.mxu1 }
  0xa1   : > { %v1138_v55 = vmul.f32 %v627_v53, %v627_v53  ;;  %v1139_v56 = vmul.f32 %v676_v54, %v676_v54 }
  0xa3   : > { %1696 = vmatmul.msk.bf16.vlgmr.msrb.gmra.mxu0 %vm593_vm12, %v1888_v63  ;;  %1704 = vmatmul.msk.bf16.vlgmr.msrb.gmra.mxu1 %vm593_vm12, %v1888_v63  ;;  %1394 = vst [vmem:[%s2011_s20] sm:$0xff] %v1138_v55 }
  0xa4   : > { %1395 = vst [vmem:[%s2011_s20 + $0x8] sm:$0xff] %v1139_v56 }
  0xa5   : > { %1712 = vmatmul.msk.bf16.vlgmr.msrb.gmra.mxu2 %vm593_vm12, %v1888_v63  ;;  %1720 = vmatmul.msk.bf16.vlgmr.msrb.gmra.mxu3 %vm593_vm12, %v1888_v63 }
  0xa8   : > { %v725_v57 = vpop.f32.mrf.mxu2  ;;  %v774_v58 = vpop.f32.mrf.mxu3 }
  0xa9   : > { %v1140_v59 = vmul.f32 %v725_v57, %v725_v57  ;;  %v1141_v60 = vmul.f32 %v774_v58, %v774_v58  ;;  %v629_v61 = vpop.f32.mrf.mxu0  ;;  %v678_v62 = vpop.f32.mrf.mxu1 }
  0xaa   : > { %v1146_v0 = vmul.f32 %v629_v61, %v629_v61  ;;  %v1147_v4 = vmul.f32 %v678_v62, %v678_v62 }
  0xab   : > { %1396 = vst [vmem:[%s2011_s20 + $0x10] sm:$0xff] %v1140_v59 }
  0xac   : > { %1397 = vst [vmem:[%s2011_s20 + $0x18] sm:$0xff] %v1141_v60 }
  0xad   : > { %1402 = vst [vmem:[%s2011_s20 + $0x40] sm:$0xff] %v1146_v0 }
  0xae   : > { %1403 = vst [vmem:[%s2011_s20 + $0x48] sm:$0xff] %v1147_v4 }
  0xb0   : > { %v727_v5 = vpop.f32.mrf.mxu2  ;;  %v776_v6 = vpop.f32.mrf.mxu3 }
  0xb1   : > { %v1148_v63 = vmul.f32 %v727_v5, %v727_v5  ;;  %v1149_v7 = vmul.f32 %v776_v6, %v776_v6  ;;  %v632_v8 = vpop.f32.mrf.mxu0  ;;  %v681_v9 = vpop.f32.mrf.mxu1 }
  0xb2   : > { %v1154_v10 = vmul.f32 %v632_v8, %v632_v8  ;;  %v1155_v3 = vmul.f32 %v681_v9, %v681_v9 }
  0xb3   : > { %1697 = vmatmul.msk.bf16.gmra.mxu0 %vm593_vm12, %v1911_v22  ;;  %1705 = vmatmul.msk.bf16.gmra.mxu1 %vm593_vm12, %v1911_v22  ;;  %1404 = vst [vmem:[%s2011_s20 + $0x50] sm:$0xff] %v1148_v63 }
  0xb4   : > { %1405 = vst [vmem:[%s2011_s20 + $0x58] sm:$0xff] %v1149_v7 }
  0xb5   : > { %1713 = vmatmul.msk.bf16.gmra.mxu2 %vm593_vm12, %v1911_v22  ;;  %1721 = vmatmul.msk.bf16.gmra.mxu3 %vm593_vm12, %v1911_v22  ;;  %1410 = vst [vmem:[%s2011_s20 + $0x80] sm:$0xff] %v1154_v10 }
  0xb6   : > { %1411 = vst [vmem:[%s2011_s20 + $0x88] sm:$0xff] %v1155_v3 }
  0xb8   : > { %v730_v11 = vpop.f32.mrf.mxu2  ;;  %v779_v12 = vpop.f32.mrf.mxu3 }
  0xb9   : > { %v1156_v13 = vmul.f32 %v730_v11, %v730_v11  ;;  %v1157_v14 = vmul.f32 %v779_v12, %v779_v12  ;;  %v634_v15 = vpop.f32.mrf.mxu0  ;;  %v683_v17 = vpop.f32.mrf.mxu1 }
  0xba   : > { %v1162_v1 = vmul.f32 %v634_v15, %v634_v15  ;;  %v1163_v2 = vmul.f32 %v683_v17, %v683_v17 }
  0xbb   : > { %1412 = vst [vmem:[%s2011_s20 + $0x90] sm:$0xff] %v1156_v13 }
  0xbc   : > { %1413 = vst [vmem:[%s2011_s20 + $0x98] sm:$0xff] %v1157_v14 }
  0xbd   : > { %1418 = vst [vmem:[%s2011_s20 + $0xc0] sm:$0xff] %v1162_v1 }
  0xbe   : > { %1419 = vst [vmem:[%s2011_s20 + $0xc8] sm:$0xff] %v1163_v2 }
  0xc0   : > { %v732_v18 = vpop.f32.mrf.mxu2  ;;  %v781_v19 = vpop.f32.mrf.mxu3 }
  0xc1   : > { %v1164_v20 = vmul.f32 %v732_v18, %v732_v18  ;;  %v1165_v21 = vmul.f32 %v781_v19, %v781_v19  ;;  %v637_v16 = vpop.f32.mrf.mxu0  ;;  %v686_v22 = vpop.f32.mrf.mxu1 }
  0xc2   : > { %v1170_v24 = vmul.f32 %v637_v16, %v637_v16  ;;  %v1171_v25 = vmul.f32 %v686_v22, %v686_v22 }
  0xc3   : > { %1698 = vmatmul.msk.bf16.gmra.mxu0 %vm593_vm12, %v1924_v23  ;;  %1706 = vmatmul.msk.bf16.gmra.mxu1 %vm593_vm12, %v1924_v23  ;;  %1420 = vst [vmem:[%s2011_s20 + $0xd0] sm:$0xff] %v1164_v20 }
  0xc4   : > { %1421 = vst [vmem:[%s2011_s20 + $0xd8] sm:$0xff] %v1165_v21 }
  0xc5   : > { %1714 = vmatmul.msk.bf16.gmra.mxu2 %vm593_vm12, %v1924_v23  ;;  %1722 = vmatmul.msk.bf16.gmra.mxu3 %vm593_vm12, %v1924_v23  ;;  %1426 = vst [vmem:[%s2011_s20 + $0x100] sm:$0xff] %v1170_v24 }
  0xc6   : > { %1427 = vst [vmem:[%s2011_s20 + $0x108] sm:$0xff] %v1171_v25 }
  0xc8   : > { %v735_v26 = vpop.f32.mrf.mxu2  ;;  %v784_v27 = vpop.f32.mrf.mxu3 }
  0xc9   : > { %v1172_v28 = vmul.f32 %v735_v26, %v735_v26  ;;  %v1173_v29 = vmul.f32 %v784_v27, %v784_v27  ;;  %v639_v30 = vpop.f32.mrf.mxu0  ;;  %v688_v31 = vpop.f32.mrf.mxu1 }
  0xca   : > { %v1178_v32 = vmul.f32 %v639_v30, %v639_v30  ;;  %v1179_v33 = vmul.f32 %v688_v31, %v688_v31 }
  0xcb   : > { %1428 = vst [vmem:[%s2011_s20 + $0x110] sm:$0xff] %v1172_v28 }
  0xcc   : > { %1429 = vst [vmem:[%s2011_s20 + $0x118] sm:$0xff] %v1173_v29 }
  0xcd   : > { %1434 = vst [vmem:[%s2011_s20 + $0x140] sm:$0xff] %v1178_v32 }
  0xce   : > { %1435 = vst [vmem:[%s2011_s20 + $0x148] sm:$0xff] %v1179_v33 }
  0xd0   : > { %v737_v23 = vpop.f32.mrf.mxu2  ;;  %v786_v34 = vpop.f32.mrf.mxu3 }
  0xd1   : > { %v1180_v35 = vmul.f32 %v737_v23, %v737_v23  ;;  %v1181_v36 = vmul.f32 %v786_v34, %v786_v34  ;;  %v642_v37 = vpop.f32.mrf.mxu0  ;;  %v691_v38 = vpop.f32.mrf.mxu1 }
  0xd2   : > { %v1186_v39 = vmul.f32 %v642_v37, %v642_v37  ;;  %v1187_v40 = vmul.f32 %v691_v38, %v691_v38 }
  0xd3   : > { %1699 = vmatmul.msk.bf16.gmra.mxu0 %vm593_vm12, %v1945_v48  ;;  %1707 = vmatmul.msk.bf16.gmra.mxu1 %vm593_vm12, %v1945_v48  ;;  %1436 = vst [vmem:[%s2011_s20 + $0x150] sm:$0xff] %v1180_v35 }
  0xd4   : > { %1437 = vst [vmem:[%s2011_s20 + $0x158] sm:$0xff] %v1181_v36 }
  0xd5   : > { %1715 = vmatmul.msk.bf16.gmra.mxu2 %vm593_vm12, %v1945_v48  ;;  %1723 = vmatmul.msk.bf16.gmra.mxu3 %vm593_vm12, %v1945_v48  ;;  %1442 = vst [vmem:[%s2011_s20 + $0x180] sm:$0xff] %v1186_v39 }
  0xd6   : > { %1443 = vst [vmem:[%s2011_s20 + $0x188] sm:$0xff] %v1187_v40 }
  0xd8   : > { %v740_v41 = vpop.f32.mrf.mxu2  ;;  %v789_v42 = vpop.f32.mrf.mxu3 }
  0xd9   : > { %v1188_v43 = vmul.f32 %v740_v41, %v740_v41  ;;  %v1189_v44 = vmul.f32 %v789_v42, %v789_v42  ;;  %v644_v45 = vpop.f32.mrf.mxu0  ;;  %v693_v46 = vpop.f32.mrf.mxu1 }
  0xda   : > { %v1194_v47 = vmul.f32 %v644_v45, %v644_v45  ;;  %v1195_v53 = vmul.f32 %v693_v46, %v693_v46 }
  0xdb   : > { %1444 = vst [vmem:[%s2011_s20 + $0x190] sm:$0xff] %v1188_v43 }
  0xdc   : > { %1445 = vst [vmem:[%s2011_s20 + $0x198] sm:$0xff] %v1189_v44 }
  0xdd   : > { %1450 = vst [vmem:[%s2011_s20 + $0x1c0] sm:$0xff] %v1194_v47 }
  0xde   : > { %1451 = vst [vmem:[%s2011_s20 + $0x1c8] sm:$0xff] %v1195_v53 }
  0xe0   : > { %v742_v48 = vpop.f32.mrf.mxu2  ;;  %v791_v54 = vpop.f32.mrf.mxu3 }
  0xe1   : > { %v1196_v55 = vmul.f32 %v742_v48, %v742_v48  ;;  %v1197_v56 = vmul.f32 %v791_v54, %v791_v54  ;;  %v647_v57 = vpop.f32.mrf.mxu0  ;;  %v696_v58 = vpop.f32.mrf.mxu1 }
  0xe2   : > { %v1202_v59 = vmul.f32 %v647_v57, %v647_v57  ;;  %v1203_v60 = vmul.f32 %v696_v58, %v696_v58 }
  0xe3   : > { %1700 = vmatmul.msk.bf16.gmra.mxu0 %vm593_vm12, %v1958_v49  ;;  %1708 = vmatmul.msk.bf16.gmra.mxu1 %vm593_vm12, %v1958_v49  ;;  %1452 = vst [vmem:[%s2011_s20 + $0x1d0] sm:$0xff] %v1196_v55 }
  0xe4   : > { %1453 = vst [vmem:[%s2011_s20 + $0x1d8] sm:$0xff] %v1197_v56 }
  0xe5   : > { %1716 = vmatmul.msk.bf16.gmra.mxu2 %vm593_vm12, %v1958_v49  ;;  %1724 = vmatmul.msk.bf16.gmra.mxu3 %vm593_vm12, %v1958_v49  ;;  %1458 = vst [vmem:[%s2011_s20 + $0x200] sm:$0xff] %v1202_v59 }
  0xe6   : > { %1459 = vst [vmem:[%s2011_s20 + $0x208] sm:$0xff] %v1203_v60 }
  0xe8   : > { %v745_v61 = vpop.f32.mrf.mxu2  ;;  %v794_v62 = vpop.f32.mrf.mxu3 }
  0xe9   : > { %v1204_v0 = vmul.f32 %v745_v61, %v745_v61  ;;  %v1205_v4 = vmul.f32 %v794_v62, %v794_v62  ;;  %v649_v5 = vpop.f32.mrf.mxu0  ;;  %v698_v6 = vpop.f32.mrf.mxu1 }
  0xea   : > { %v1210_v63 = vmul.f32 %v649_v5, %v649_v5  ;;  %v1211_v7 = vmul.f32 %v698_v6, %v698_v6 }
  0xeb   : > { %1460 = vst [vmem:[%s2011_s20 + $0x210] sm:$0xff] %v1204_v0 }
  0xec   : > { %1461 = vst [vmem:[%s2011_s20 + $0x218] sm:$0xff] %v1205_v4 }
  0xed   : > { %1466 = vst [vmem:[%s2011_s20 + $0x240] sm:$0xff] %v1210_v63 }
  0xee   : > { %1467 = vst [vmem:[%s2011_s20 + $0x248] sm:$0xff] %v1211_v7 }
  0xf0   : > { %v747_v49 = vpop.f32.mrf.mxu2  ;;  %v796_v8 = vpop.f32.mrf.mxu3 }
  0xf1   : > { %v1212_v9 = vmul.f32 %v747_v49, %v747_v49  ;;  %v1213_v10 = vmul.f32 %v796_v8, %v796_v8  ;;  %v652_v3 = vpop.f32.mrf.mxu0  ;;  %v701_v11 = vpop.f32.mrf.mxu1 }
  0xf2   : > { %v1218_v12 = vmul.f32 %v652_v3, %v652_v3  ;;  %v1219_v13 = vmul.f32 %v701_v11, %v701_v11 }
  0xf3   : > { %1701 = vmatmul.msk.bf16.gmra.mxu0 %vm593_vm12, %v1971_v50  ;;  %1709 = vmatmul.msk.bf16.gmra.mxu1 %vm593_vm12, %v1971_v50  ;;  %1468 = vst [vmem:[%s2011_s20 + $0x250] sm:$0xff] %v1212_v9 }
  0xf4   : > { %1469 = vst [vmem:[%s2011_s20 + $0x258] sm:$0xff] %v1213_v10 }
  0xf5   : > { %1717 = vmatmul.msk.bf16.gmra.mxu2 %vm593_vm12, %v1971_v50  ;;  %1725 = vmatmul.msk.bf16.gmra.mxu3 %vm593_vm12, %v1971_v50  ;;  %1474 = vst [vmem:[%s2011_s20 + $0x280] sm:$0xff] %v1218_v12 }
  0xf6   : > { %1475 = vst [vmem:[%s2011_s20 + $0x288] sm:$0xff] %v1219_v13 }
  0xf8   : > { %v750_v14 = vpop.f32.mrf.mxu2  ;;  %v799_v15 = vpop.f32.mrf.mxu3 }
  0xf9   : > { %v1220_v17 = vmul.f32 %v750_v14, %v750_v14  ;;  %v1221_v1 = vmul.f32 %v799_v15, %v799_v15  ;;  %v654_v2 = vpop.f32.mrf.mxu0  ;;  %v703_v18 = vpop.f32.mrf.mxu1 }
  0xfa   : > { %v1226_v19 = vmul.f32 %v654_v2, %v654_v2  ;;  %v1227_v20 = vmul.f32 %v703_v18, %v703_v18 }
  0xfb   : > { %1476 = vst [vmem:[%s2011_s20 + $0x290] sm:$0xff] %v1220_v17 }
  0xfc   : > { %1477 = vst [vmem:[%s2011_s20 + $0x298] sm:$0xff] %v1221_v1 }
  0xfd   : > { %1482 = vst [vmem:[%s2011_s20 + $0x2c0] sm:$0xff] %v1226_v19 }
  0xfe   : > { %1483 = vst [vmem:[%s2011_s20 + $0x2c8] sm:$0xff] %v1227_v20 }
 0x100   : > { %v752_v50 = vpop.f32.mrf.mxu2  ;;  %v801_v21 = vpop.f32.mrf.mxu3 }
 0x101   : > { %v1228_v16 = vmul.f32 %v752_v50, %v752_v50  ;;  %v1229_v22 = vmul.f32 %v801_v21, %v801_v21  ;;  %v657_v24 = vpop.f32.mrf.mxu0  ;;  %v706_v25 = vpop.f32.mrf.mxu1 }
 0x102   : > { %v1234_v26 = vmul.f32 %v657_v24, %v657_v24  ;;  %v1235_v27 = vmul.f32 %v706_v25, %v706_v25 }
 0x103   : > { %1702 = vmatmul.msk.bf16.gmra.mxu0 %vm593_vm12, %v1984_v51  ;;  %1710 = vmatmul.msk.bf16.gmra.mxu1 %vm593_vm12, %v1984_v51  ;;  %1484 = vst [vmem:[%s2011_s20 + $0x2d0] sm:$0xff] %v1228_v16 }
 0x104   : > { %1485 = vst [vmem:[%s2011_s20 + $0x2d8] sm:$0xff] %v1229_v22 }
 0x105   : > { %1718 = vmatmul.msk.bf16.gmra.mxu2 %vm593_vm12, %v1984_v51  ;;  %1726 = vmatmul.msk.bf16.gmra.mxu3 %vm593_vm12, %v1984_v51  ;;  %1490 = vst [vmem:[%s2011_s20 + $0x300] sm:$0xff] %v1234_v26 }
 0x106   : > { %1491 = vst [vmem:[%s2011_s20 + $0x308] sm:$0xff] %v1235_v27 }
 0x108   : > { %v755_v28 = vpop.f32.mrf.mxu2  ;;  %v804_v29 = vpop.f32.mrf.mxu3 }
 0x109   : > { %v1236_v30 = vmul.f32 %v755_v28, %v755_v28  ;;  %v1237_v31 = vmul.f32 %v804_v29, %v804_v29  ;;  %v659_v32 = vpop.f32.mrf.mxu0  ;;  %v708_v33 = vpop.f32.mrf.mxu1 }
 0x10a   : > { %v1242_v23 = vmul.f32 %v659_v32, %v659_v32  ;;  %v1243_v34 = vmul.f32 %v708_v33, %v708_v33 }
 0x10b   : > { %1492 = vst [vmem:[%s2011_s20 + $0x310] sm:$0xff] %v1236_v30 }
 0x10c   : > { %1493 = vst [vmem:[%s2011_s20 + $0x318] sm:$0xff] %v1237_v31 }
 0x10d   : > { %1498 = vst [vmem:[%s2011_s20 + $0x340] sm:$0xff] %v1242_v23 }
 0x10e   : > { %1499 = vst [vmem:[%s2011_s20 + $0x348] sm:$0xff] %v1243_v34 }
 0x110   : > { %v757_v51 = vpop.f32.mrf.mxu2  ;;  %v806_v35 = vpop.f32.mrf.mxu3 }
 0x111   : > { %v1244_v36 = vmul.f32 %v757_v51, %v757_v51  ;;  %v1245_v37 = vmul.f32 %v806_v35, %v806_v35  ;;  %v662_v38 = vpop.f32.mrf.mxu0  ;;  %v711_v39 = vpop.f32.mrf.mxu1 }
 0x112   : > { %v1250_v40 = vmul.f32 %v662_v38, %v662_v38  ;;  %v1251_v41 = vmul.f32 %v711_v39, %v711_v39 }
 0x113   : > { %1703 = vmatmul.msk.bf16.gmra.mxu0 %vm593_vm12, %v1997_v52  ;;  %1711 = vmatmul.msk.bf16.gmra.mxu1 %vm593_vm12, %v1997_v52  ;;  %1500 = vst [vmem:[%s2011_s20 + $0x350] sm:$0xff] %v1244_v36 }
 0x114   : > { %1501 = vst [vmem:[%s2011_s20 + $0x358] sm:$0xff] %v1245_v37 }
 0x115   : > { %1719 = vmatmul.msk.bf16.gmra.mxu2 %vm593_vm12, %v1997_v52  ;;  %1727 = vmatmul.msk.bf16.gmra.mxu3 %vm593_vm12, %v1997_v52  ;;  %1506 = vst [vmem:[%s2011_s20 + $0x380] sm:$0xff] %v1250_v40 }
 0x116   : > { %1507 = vst [vmem:[%s2011_s20 + $0x388] sm:$0xff] %v1251_v41 }
 0x118   : > { %v760_v42 = vpop.f32.mrf.mxu2  ;;  %v809_v43 = vpop.f32.mrf.mxu3 }
 0x119   : > { %v1252_v44 = vmul.f32 %v760_v42, %v760_v42  ;;  %v1253_v45 = vmul.f32 %v809_v43, %v809_v43  ;;  %v664_v46 = vpop.f32.mrf.mxu0  ;;  %v713_v47 = vpop.f32.mrf.mxu1 }
 0x11a   : > { %v1258_v53 = vmul.f32 %v664_v46, %v664_v46  ;;  %v1259_v48 = vmul.f32 %v713_v47, %v713_v47 }
 0x11b   : > { %1508 = vst [vmem:[%s2011_s20 + $0x390] sm:$0xff] %v1252_v44 }
 0x11c   : > { %1509 = vst [vmem:[%s2011_s20 + $0x398] sm:$0xff] %v1253_v45 }
 0x11d   : > { %1514 = vst [vmem:[%s2011_s20 + $0x3c0] sm:$0xff] %v1258_v53 }
 0x11e   : > { %1515 = vst [vmem:[%s2011_s20 + $0x3c8] sm:$0xff] %v1259_v48 }
 0x120   : > { %v762_v52 = vpop.f32.mrf.mxu2  ;;  %v811_v54 = vpop.f32.mrf.mxu3 }
 0x121   : > { %v1260_v55 = vmul.f32 %v762_v52, %v762_v52  ;;  %v1261_v56 = vmul.f32 %v811_v54, %v811_v54  ;;  %v823_v57 = vpop.f32.mrf.mxu0  ;;  %v872_v58 = vpop.f32.mrf.mxu1 }
 0x122   : > { %v1142_v59 = vmul.f32 %v823_v57, %v823_v57  ;;  %v1143_v60 = vmul.f32 %v872_v58, %v872_v58 }
 0x123   : > { %1516 = vst [vmem:[%s2011_s20 + $0x3d0] sm:$0xff] %v1260_v55 }
 0x124   : > { %1517 = vst [vmem:[%s2011_s20 + $0x3d8] sm:$0xff] %v1261_v56 }
 0x125   : > { %1398 = vst [vmem:[%s2011_s20 + $0x20] sm:$0xff] %v1142_v59 }
 0x126   : > { %1399 = vst [vmem:[%s2011_s20 + $0x28] sm:$0xff] %v1143_v60 }
 0x128   : > { %v921_v61 = vpop.f32.mrf.mxu2  ;;  %v970_v62 = vpop.f32.mrf.mxu3 }
 0x129   : > { %v1144_v0 = vmul.f32 %v921_v61, %v921_v61  ;;  %v1145_v4 = vmul.f32 %v970_v62, %v970_v62  ;;  %v825_v5 = vpop.f32.mrf.mxu0  ;;  %v874_v6 = vpop.f32.mrf.mxu1 }
 0x12a   : > { %v1150_v63 = vmul.f32 %v825_v5, %v825_v5  ;;  %v1151_v7 = vmul.f32 %v874_v6, %v874_v6 }
 0x12b   : > { %1400 = vst [vmem:[%s2011_s20 + $0x30] sm:$0xff] %v1144_v0 }
 0x12c   : > { %1401 = vst [vmem:[%s2011_s20 + $0x38] sm:$0xff] %v1145_v4 }
 0x12d   : > { %1406 = vst [vmem:[%s2011_s20 + $0x60] sm:$0xff] %v1150_v63 }
 0x12e   : > { %1407 = vst [vmem:[%s2011_s20 + $0x68] sm:$0xff] %v1151_v7 }
 0x130   : > { %v923_v49 = vpop.f32.mrf.mxu2  ;;  %v972_v8 = vpop.f32.mrf.mxu3 }
 0x131   : > { %v1152_v9 = vmul.f32 %v923_v49, %v923_v49  ;;  %v1153_v10 = vmul.f32 %v972_v8, %v972_v8  ;;  %v828_v3 = vpop.f32.mrf.mxu0  ;;  %v877_v11 = vpop.f32.mrf.mxu1 }
 0x132   : > { %v1158_v12 = vmul.f32 %v828_v3, %v828_v3  ;;  %v1159_v13 = vmul.f32 %v877_v11, %v877_v11 }
 0x133   : > { %1408 = vst [vmem:[%s2011_s20 + $0x70] sm:$0xff] %v1152_v9 }
 0x134   : > { %1409 = vst [vmem:[%s2011_s20 + $0x78] sm:$0xff] %v1153_v10 }
 0x135   : > { %1414 = vst [vmem:[%s2011_s20 + $0xa0] sm:$0xff] %v1158_v12 }
 0x136   : > { %1415 = vst [vmem:[%s2011_s20 + $0xa8] sm:$0xff] %v1159_v13 }
 0x138   : > { %v926_v14 = vpop.f32.mrf.mxu2  ;;  %v975_v15 = vpop.f32.mrf.mxu3 }
 0x139   : > { %v1160_v17 = vmul.f32 %v926_v14, %v926_v14  ;;  %v1161_v1 = vmul.f32 %v975_v15, %v975_v15  ;;  %v830_v2 = vpop.f32.mrf.mxu0  ;;  %v879_v18 = vpop.f32.mrf.mxu1 }
 0x13a   : > { %v1166_v19 = vmul.f32 %v830_v2, %v830_v2  ;;  %v1167_v20 = vmul.f32 %v879_v18, %v879_v18 }
 0x13b   : > { %1416 = vst [vmem:[%s2011_s20 + $0xb0] sm:$0xff] %v1160_v17 }
 0x13c   : > { %1417 = vst [vmem:[%s2011_s20 + $0xb8] sm:$0xff] %v1161_v1 }
 0x13d   : > { %1422 = vst [vmem:[%s2011_s20 + $0xe0] sm:$0xff] %v1166_v19 }
 0x13e   : > { %1423 = vst [vmem:[%s2011_s20 + $0xe8] sm:$0xff] %v1167_v20 }
 0x140   : > { %v928_v50 = vpop.f32.mrf.mxu2  ;;  %v977_v21 = vpop.f32.mrf.mxu3 }
 0x141   : > { %v1168_v16 = vmul.f32 %v928_v50, %v928_v50  ;;  %v1169_v22 = vmul.f32 %v977_v21, %v977_v21  ;;  %v833_v24 = vpop.f32.mrf.mxu0  ;;  %v882_v25 = vpop.f32.mrf.mxu1 }
 0x142   : > { %v1174_v26 = vmul.f32 %v833_v24, %v833_v24  ;;  %v1175_v27 = vmul.f32 %v882_v25, %v882_v25 }
 0x143   : > { %1424 = vst [vmem:[%s2011_s20 + $0xf0] sm:$0xff] %v1168_v16 }
 0x144   : > { %1425 = vst [vmem:[%s2011_s20 + $0xf8] sm:$0xff] %v1169_v22 }
 0x145   : > { %1430 = vst [vmem:[%s2011_s20 + $0x120] sm:$0xff] %v1174_v26 }
 0x146   : > { %1431 = vst [vmem:[%s2011_s20 + $0x128] sm:$0xff] %v1175_v27 }
 0x148   : > { %v931_v28 = vpop.f32.mrf.mxu2  ;;  %v980_v29 = vpop.f32.mrf.mxu3 }
 0x149   : > { %v1176_v30 = vmul.f32 %v931_v28, %v931_v28  ;;  %v1177_v31 = vmul.f32 %v980_v29, %v980_v29  ;;  %v835_v32 = vpop.f32.mrf.mxu0  ;;  %v884_v33 = vpop.f32.mrf.mxu1 }
 0x14a   : > { %v1182_v23 = vmul.f32 %v835_v32, %v835_v32  ;;  %v1183_v34 = vmul.f32 %v884_v33, %v884_v33 }
 0x14b   : > { %1432 = vst [vmem:[%s2011_s20 + $0x130] sm:$0xff] %v1176_v30 }
 0x14c   : > { %1433 = vst [vmem:[%s2011_s20 + $0x138] sm:$0xff] %v1177_v31 }
 0x14d   : > { %1438 = vst [vmem:[%s2011_s20 + $0x160] sm:$0xff] %v1182_v23 }
 0x14e   : > { %1439 = vst [vmem:[%s2011_s20 + $0x168] sm:$0xff] %v1183_v34 }
 0x150   : > { %v933_v51 = vpop.f32.mrf.mxu2  ;;  %v982_v35 = vpop.f32.mrf.mxu3 }
 0x151   : > { %v1184_v36 = vmul.f32 %v933_v51, %v933_v51  ;;  %v1185_v37 = vmul.f32 %v982_v35, %v982_v35  ;;  %v838_v38 = vpop.f32.mrf.mxu0  ;;  %v887_v39 = vpop.f32.mrf.mxu1 }
 0x152   : > { %v1190_v40 = vmul.f32 %v838_v38, %v838_v38  ;;  %v1191_v41 = vmul.f32 %v887_v39, %v887_v39 }
 0x153   : > { %1440 = vst [vmem:[%s2011_s20 + $0x170] sm:$0xff] %v1184_v36 }
 0x154   : > { %1441 = vst [vmem:[%s2011_s20 + $0x178] sm:$0xff] %v1185_v37 }
 0x155   : > { %1446 = vst [vmem:[%s2011_s20 + $0x1a0] sm:$0xff] %v1190_v40 }
 0x156   : > { %1447 = vst [vmem:[%s2011_s20 + $0x1a8] sm:$0xff] %v1191_v41 }
 0x158   : > { %v936_v42 = vpop.f32.mrf.mxu2  ;;  %v985_v43 = vpop.f32.mrf.mxu3 }
 0x159   : > { %v1192_v44 = vmul.f32 %v936_v42, %v936_v42  ;;  %v1193_v45 = vmul.f32 %v985_v43, %v985_v43  ;;  %v840_v46 = vpop.f32.mrf.mxu0  ;;  %v889_v47 = vpop.f32.mrf.mxu1 }
 0x15a   : > { %v1198_v53 = vmul.f32 %v840_v46, %v840_v46  ;;  %v1199_v48 = vmul.f32 %v889_v47, %v889_v47 }
 0x15b   : > { %1448 = vst [vmem:[%s2011_s20 + $0x1b0] sm:$0xff] %v1192_v44 }
 0x15c   : > { %1449 = vst [vmem:[%s2011_s20 + $0x1b8] sm:$0xff] %v1193_v45 }
 0x15d   : > { %1454 = vst [vmem:[%s2011_s20 + $0x1e0] sm:$0xff] %v1198_v53 }
 0x15e   : > { %1455 = vst [vmem:[%s2011_s20 + $0x1e8] sm:$0xff] %v1199_v48 }
 0x160   : > { %v938_v52 = vpop.f32.mrf.mxu2  ;;  %v987_v54 = vpop.f32.mrf.mxu3 }
 0x161   : > { %v1200_v55 = vmul.f32 %v938_v52, %v938_v52  ;;  %v1201_v56 = vmul.f32 %v987_v54, %v987_v54  ;;  %v843_v57 = vpop.f32.mrf.mxu0  ;;  %v892_v58 = vpop.f32.mrf.mxu1 }
 0x162   : > { %v1206_v59 = vmul.f32 %v843_v57, %v843_v57  ;;  %v1207_v60 = vmul.f32 %v892_v58, %v892_v58 }
 0x163   : > { %1456 = vst [vmem:[%s2011_s20 + $0x1f0] sm:$0xff] %v1200_v55 }
 0x164   : > { %1457 = vst [vmem:[%s2011_s20 + $0x1f8] sm:$0xff] %v1201_v56 }
 0x165   : > { %1462 = vst [vmem:[%s2011_s20 + $0x220] sm:$0xff] %v1206_v59 }
 0x166   : > { %1463 = vst [vmem:[%s2011_s20 + $0x228] sm:$0xff] %v1207_v60 }
 0x168   : > { %v941_v61 = vpop.f32.mrf.mxu2  ;;  %v990_v62 = vpop.f32.mrf.mxu3 }
 0x169   : > { %v1208_v0 = vmul.f32 %v941_v61, %v941_v61  ;;  %v1209_v4 = vmul.f32 %v990_v62, %v990_v62  ;;  %v845_v5 = vpop.f32.mrf.mxu0  ;;  %v894_v6 = vpop.f32.mrf.mxu1 }
 0x16a   : > { %v1214_v63 = vmul.f32 %v845_v5, %v845_v5  ;;  %v1215_v7 = vmul.f32 %v894_v6, %v894_v6 }
 0x16b   : > { %1464 = vst [vmem:[%s2011_s20 + $0x230] sm:$0xff] %v1208_v0 }
 0x16c   : > { %1465 = vst [vmem:[%s2011_s20 + $0x238] sm:$0xff] %v1209_v4 }
 0x16d   : > { %1470 = vst [vmem:[%s2011_s20 + $0x260] sm:$0xff] %v1214_v63 }
 0x16e   : > { %1471 = vst [vmem:[%s2011_s20 + $0x268] sm:$0xff] %v1215_v7 }
 0x170   : > { %v943_v49 = vpop.f32.mrf.mxu2  ;;  %v992_v8 = vpop.f32.mrf.mxu3 }
 0x171   : > { %v1216_v9 = vmul.f32 %v943_v49, %v943_v49  ;;  %v1217_v10 = vmul.f32 %v992_v8, %v992_v8  ;;  %v848_v3 = vpop.f32.mrf.mxu0  ;;  %v897_v11 = vpop.f32.mrf.mxu1 }
 0x172   : > { %v1222_v12 = vmul.f32 %v848_v3, %v848_v3  ;;  %v1223_v13 = vmul.f32 %v897_v11, %v897_v11 }
 0x173   : > { %1472 = vst [vmem:[%s2011_s20 + $0x270] sm:$0xff] %v1216_v9 }
 0x174   : > { %1473 = vst [vmem:[%s2011_s20 + $0x278] sm:$0xff] %v1217_v10 }
 0x175   : > { %1478 = vst [vmem:[%s2011_s20 + $0x2a0] sm:$0xff] %v1222_v12 }
 0x176   : > { %1479 = vst [vmem:[%s2011_s20 + $0x2a8] sm:$0xff] %v1223_v13 }
 0x178   : > { %v946_v14 = vpop.f32.mrf.mxu2  ;;  %v995_v15 = vpop.f32.mrf.mxu3 }
 0x179   : > { %v1224_v17 = vmul.f32 %v946_v14, %v946_v14  ;;  %v1225_v1 = vmul.f32 %v995_v15, %v995_v15  ;;  %v850_v2 = vpop.f32.mrf.mxu0  ;;  %v899_v18 = vpop.f32.mrf.mxu1 }
 0x17a   : > { %v1230_v19 = vmul.f32 %v850_v2, %v850_v2  ;;  %v1231_v20 = vmul.f32 %v899_v18, %v899_v18 }
 0x17b   : > { %1480 = vst [vmem:[%s2011_s20 + $0x2b0] sm:$0xff] %v1224_v17 }
 0x17c   : > { %1481 = vst [vmem:[%s2011_s20 + $0x2b8] sm:$0xff] %v1225_v1 }
 0x17d   : > { %1486 = vst [vmem:[%s2011_s20 + $0x2e0] sm:$0xff] %v1230_v19 }
 0x17e   : > { %1487 = vst [vmem:[%s2011_s20 + $0x2e8] sm:$0xff] %v1231_v20 }
 0x180   : > { %v948_v50 = vpop.f32.mrf.mxu2  ;;  %v997_v21 = vpop.f32.mrf.mxu3 }
 0x181   : > { %v1232_v16 = vmul.f32 %v948_v50, %v948_v50  ;;  %v1233_v22 = vmul.f32 %v997_v21, %v997_v21  ;;  %v853_v24 = vpop.f32.mrf.mxu0  ;;  %v902_v25 = vpop.f32.mrf.mxu1 }
 0x182   : > { %v1238_v26 = vmul.f32 %v853_v24, %v853_v24  ;;  %v1239_v27 = vmul.f32 %v902_v25, %v902_v25 }
 0x183   : > { %1488 = vst [vmem:[%s2011_s20 + $0x2f0] sm:$0xff] %v1232_v16 }
 0x184   : > { %1489 = vst [vmem:[%s2011_s20 + $0x2f8] sm:$0xff] %v1233_v22 }
 0x185   : > { %1494 = vst [vmem:[%s2011_s20 + $0x320] sm:$0xff] %v1238_v26 }
 0x186   : > { %1495 = vst [vmem:[%s2011_s20 + $0x328] sm:$0xff] %v1239_v27 }
 0x188   : > { %v951_v28 = vpop.f32.mrf.mxu2  ;;  %v1000_v29 = vpop.f32.mrf.mxu3 }
 0x189   : > { %v1240_v30 = vmul.f32 %v951_v28, %v951_v28  ;;  %v1241_v31 = vmul.f32 %v1000_v29, %v1000_v29  ;;  %v855_v32 = vpop.f32.mrf.mxu0  ;;  %v904_v33 = vpop.f32.mrf.mxu1 }
 0x18a   : > { %v1246_v23 = vmul.f32 %v855_v32, %v855_v32  ;;  %v1247_v34 = vmul.f32 %v904_v33, %v904_v33 }
 0x18b   : > { %1496 = vst [vmem:[%s2011_s20 + $0x330] sm:$0xff] %v1240_v30 }
 0x18c   : > { %1497 = vst [vmem:[%s2011_s20 + $0x338] sm:$0xff] %v1241_v31 }
 0x18d   : > { %1502 = vst [vmem:[%s2011_s20 + $0x360] sm:$0xff] %v1246_v23 }
 0x18e   : > { %1503 = vst [vmem:[%s2011_s20 + $0x368] sm:$0xff] %v1247_v34 }
 0x190   : > { %v953_v51 = vpop.f32.mrf.mxu2  ;;  %v1002_v35 = vpop.f32.mrf.mxu3 }
 0x191   : > { %v1248_v36 = vmul.f32 %v953_v51, %v953_v51  ;;  %v1249_v37 = vmul.f32 %v1002_v35, %v1002_v35  ;;  %v858_v38 = vpop.f32.mrf.mxu0  ;;  %v907_v39 = vpop.f32.mrf.mxu1 }
 0x192   : > { %v1254_v40 = vmul.f32 %v858_v38, %v858_v38  ;;  %v1255_v41 = vmul.f32 %v907_v39, %v907_v39 }
 0x193   : > { %1504 = vst [vmem:[%s2011_s20 + $0x370] sm:$0xff] %v1248_v36 }
 0x194   : > { %1505 = vst [vmem:[%s2011_s20 + $0x378] sm:$0xff] %v1249_v37 }
 0x195   : > { %1510 = vst [vmem:[%s2011_s20 + $0x3a0] sm:$0xff] %v1254_v40 }
 0x196   : > { %1511 = vst [vmem:[%s2011_s20 + $0x3a8] sm:$0xff] %v1255_v41 }
 0x198   : > { %v956_v42 = vpop.f32.mrf.mxu2  ;;  %v1005_v43 = vpop.f32.mrf.mxu3 }
 0x199   : > { %v1256_v44 = vmul.f32 %v956_v42, %v956_v42  ;;  %v1257_v45 = vmul.f32 %v1005_v43, %v1005_v43  ;;  %v860_v46 = vpop.f32.mrf.mxu0  ;;  %v909_v47 = vpop.f32.mrf.mxu1 }
 0x19a   : > { %v1262_v53 = vmul.f32 %v860_v46, %v860_v46  ;;  %v1263_v48 = vmul.f32 %v909_v47, %v909_v47 }
 0x19b   : > { %1512 = vst [vmem:[%s2011_s20 + $0x3b0] sm:$0xff] %v1256_v44 }
 0x19c   : > { %1513 = vst [vmem:[%s2011_s20 + $0x3b8] sm:$0xff] %v1257_v45 }
 0x19d   : > { %1518 = vst [vmem:[%s2011_s20 + $0x3e0] sm:$0xff] %v1262_v53 }
 0x19e   : > { %1519 = vst [vmem:[%s2011_s20 + $0x3e8] sm:$0xff] %v1263_v48 }
 0x1a0   : > { %v958_v52 = vpop.f32.mrf.mxu2  ;;  %v1007_v54 = vpop.f32.mrf.mxu3 }
 0x1a1   : > { %v1264_v55 = vmul.f32 %v958_v52, %v958_v52  ;;  %v1265_v56 = vmul.f32 %v1007_v54, %v1007_v54 }
 0x1a3   : > { %1520 = vst [vmem:[%s2011_s20 + $0x3f0] sm:$0xff] %v1264_v55 }
 0x1a4   : > { %1521 = vst [vmem:[%s2011_s20 + $0x3f8] sm:$0xff] %v1265_v56 }
 0x1a5 PF: > { %s13_s14 = sadd.s32 1, %s1787_s14   ;;  %s2218_s12 = smov %s1783_s13 }
 0x1a6   : > { %p10_p5 = scmp.ge.s32.totalorder %s13_s14, 4   ;;  %s2219_s13 = smov %s2221_s15 }
 0x1a8   :  { %12 = sbr.rel (!%p10_p5) target bundleno = 2 (0x2), region = 69 }

// kernel: forward_training.8
= control target key start
LH: loop header
LB: loop body
LE: loop exit
PB: predicated region body
PF: predicated region fallthrough
CT: control target
= control target key end

     0   :  { %s723_s12 = smov 0   ;;  %s725_s13 = smov 0   ;;  %s824_s0 = inlined_call_operand.vmem [shape: f32[2,64,128], index: 0, kind: input, shape index: {}]   ;;  %s825_s1 = inlined_call_operand.vmem [shape: s32[2,1,128], index: 1, kind: input, shape index: {}]   ;;  %s826_s2 = inlined_call_operand.vmem [shape: bf16[128,80], index: 2, kind: input, shape index: {}]   ;;  %s827_s3 = inlined_call_operand.vmem [shape: f32[2,128,128], index: 3, kind: output, shape index: {}]  }
   0x1   :  { %s727_s14 = smov 0  }
   0x2 LB: > { %s25_s15 = sadd.s32 1, %s696_s13  ;;  %p578_p0 = scmp.ge.s32.totalorder %s700_s14, 1  ;;  %s700_s14 = sphi %s727_s14, %s13_s14   ;;  %s696_s13 = sphi %s725_s13, %s829_s13   ;;  %s692_s12 = sphi %s723_s12, %s828_s12  }
   0x3   : > { %p27_p1 = scmp.ge.s32.totalorder %s25_s15, 2  ;;  %p167_p2 = scmp.lt.s32.totalorder %s700_s14, 3 }
   0x5   : > { %s831_s15 = smov (%p27_p1, %s25_s15), 0  ;;  %p168_p3 = pnand %p578_p0, %p167_p2 }
   0x6   : > { %p200_p4 = scmp.lt.s32.totalorder (!%p168_p3), %s692_s12, 1 }
   0x7   : > { %171 = sbr.rel (%p168_p3) target bundleno = 206 (0xce), region = 32 }
   0xc   : > { %v257_v0 = vlaneseq  ;;  %s833_s12 = smov (!%p200_p4, %s692_s12), 1  ;;  %v702_v10 = vmov 0.0   ;;  %v629_v40 = vld [vmem:[%s826_s2] sm:$0xff]  ;;  %v631_v41 = vld [vmem:[%s826_s2 + $0x10] sm:$0xff]  ;;  %vm355_vm2 = vcmask 654336   ;;  %v630_v44 = vld [vmem:[%s826_s2 + $0x8] sm:$0xff] }
   0xd   : > { %s627_s16 = sshll.u32 %s833_s12, 6  ;;  %s213_s19 = scalar_lea.vmem %s825_s1, %s833_s12  ;;  %v633_v42 = vld [vmem:[%s826_s2 + $0x20] sm:$0xff]  ;;  %v635_v43 = vld [vmem:[%s826_s2 + $0x30] sm:$0xff]  ;;  %v632_v45 = vld [vmem:[%s826_s2 + $0x18] sm:$0xff] }
   0xe   : > { %v258_v1 = vshrl.u32 %v257_v0, 7  ;;  %s751_s22 = scalar_lea.vmem %s824_s0, %s627_s16  ;;  %v677_v3 = vld [vmem:[%s213_s19] ss:$0 sm:$0xff]  ;;  %v634_v46 = vld [vmem:[%s826_s2 + $0x28] sm:$0xff]  ;;  %v636_v47 = vld [vmem:[%s826_s2 + $0x38] sm:$0xff]  ;;  %s628_s16 = sshll.u32 %s833_s12, 7 }
   0xf   : > { %v246_v4 = vld [vmem:[%s751_s22 + $0x30] sm:$0xff]  ;;  %v247_v5 = vld [vmem:[%s751_s22 + $0x38] sm:$0xff]  ;;  %v244_v8 = vld [vmem:[%s751_s22 + $0x20] sm:$0xff]  ;;  %s797_s19 = scalar_lea.vmem %s827_s3, %s628_s16 }
  0x10   : > { %v259_v2 = vadd.s32 8, %v258_v1  ;;  %vm261_vm0 = vcmp.eq.s32.totalorder %v258_v1, %v677_v3  ;;  %v254_v6 = vpack.c.bf16 %v246_v4, %v246_v4  ;;  %v255_v7 = vpack.c.bf16 %v247_v5, %v247_v5  ;;  %v245_v9 = vld [vmem:[%s751_s22 + $0x28] sm:$0xff]  ;;  %v242_v21 = vld [vmem:[%s751_s22 + $0x10] sm:$0xff]  ;;  %v243_v22 = vld [vmem:[%s751_s22 + $0x18] sm:$0xff] }
  0x11   : > { %v583_v11 = vsel %vm261_vm0, 1.0, %v702_v10  ;;  %v252_v15 = vpack.c.bf16 %v244_v8, %v244_v8  ;;  %v253_v16 = vpack.c.bf16 %v245_v9, %v245_v9  ;;  %v250_v27 = vpack.c.bf16 %v242_v21, %v242_v21  ;;  %v240_v29 = vld [vmem:[%s751_s22] sm:$0xff]  ;;  %v241_v30 = vld [vmem:[%s751_s22 + $0x8] sm:$0xff] }
  0x12   : > { %vm262_vm1 = vcmp.eq.s32.totalorder %v259_v2, %v677_v3  ;;  %v267_v13 = vpack.c.bf16 %v583_v11, %v583_v11  ;;  %v283_v19 = vunpack.c.l.b16 %v254_v6  ;;  %v284_v20 = vunpack.c.l.b16 %v255_v7 }
  0x13   : > { %v584_v12 = vsel %vm262_vm1, 1.0, %v702_v10  ;;  %v281_v24 = vunpack.c.l.b16 %v252_v15  ;;  %v282_v26 = vunpack.c.l.b16 %v253_v16  ;;  %v251_v28 = vpack.c.bf16 %v243_v22, %v243_v22 }
  0x14   : > { %v268_v14 = vpack.c.bf16 %v584_v12, %v584_v12  ;;  %v295_v17 = vunpack.c.l.b16 %v267_v13  ;;  %v288_v25 = vpack.c.b16 %v284_v20, %v283_v19  ;;  %v248_v31 = vpack.c.bf16 %v240_v29, %v240_v29 }
  0x15   : > { %v287_v32 = vpack.c.b16 %v282_v26, %v281_v24  ;;  %v279_v33 = vunpack.c.l.b16 %v250_v27  ;;  %v280_v34 = vunpack.c.l.b16 %v251_v28  ;;  %v249_v35 = vpack.c.bf16 %v241_v30, %v241_v30 }
  0x16   : > { %v296_v18 = vunpack.c.l.b16 %v268_v14  ;;  %v277_v37 = vunpack.c.l.b16 %v248_v31 }
  0x17   : > { %v286_v36 = vpack.c.b16 %v280_v34, %v279_v33  ;;  %v278_v38 = vunpack.c.l.b16 %v249_v35 }
  0x18   : > { %v297_v23 = vpack.c.b16 %v296_v18, %v295_v17 }
  0x19   : > { %v285_v39 = vpack.c.b16 %v278_v38, %v277_v37 }
  0x1a   : > { %383 = vmatpush.bf16.msra.mxu0 %v297_v23  ;;  %637 = vmatpush.bf16.msra.mxu1 %v297_v23 }
  0x1b   : > { %638 = vmatpush.bf16.msra.mxu2 %v297_v23  ;;  %639 = vmatpush.bf16.msra.mxu3 %v297_v23 }
  0x1e   : > { %384 = vmatpush.bf16.msra.mxu0 %v288_v25  ;;  %640 = vmatpush.bf16.msra.mxu1 %v288_v25 }
  0x1f   : > { %641 = vmatpush.bf16.msra.mxu2 %v288_v25  ;;  %642 = vmatpush.bf16.msra.mxu3 %v288_v25 }
  0x22   : > { %385 = vmatpush.bf16.msra.mxu0 %v287_v32  ;;  %643 = vmatpush.bf16.msra.mxu1 %v287_v32 }
  0x23   : > { %644 = vmatpush.bf16.msra.mxu2 %v287_v32  ;;  %645 = vmatpush.bf16.msra.mxu3 %v287_v32 }
  0x26   : > { %386 = vmatpush.bf16.msra.mxu0 %v286_v36  ;;  %646 = vmatpush.bf16.msra.mxu1 %v286_v36 }
  0x27   : > { %647 = vmatpush.bf16.msra.mxu2 %v286_v36  ;;  %648 = vmatpush.bf16.msra.mxu3 %v286_v36 }
  0x2a   : > { %387 = vmatpush.bf16.msra.mxu0 %v285_v39  ;;  %649 = vmatpush.bf16.msra.mxu1 %v285_v39 }
  0x2b   : > { %650 = vmatpush.bf16.msra.mxu2 %v285_v39  ;;  %651 = vmatpush.bf16.msra.mxu3 %v285_v39 }
  0x2d   : > { %617 = vmatmul.msk.bf16.vlgmr.msra.gmra.mxu0 %vm355_vm2, %v629_v40  ;;  %619 = vmatmul.msk.bf16.vlgmr.msra.gmra.mxu1 %vm355_vm2, %v631_v41 }
  0x2e   : > { %621 = vmatmul.msk.bf16.vlgmr.msra.gmra.mxu2 %vm355_vm2, %v633_v42  ;;  %623 = vmatmul.msk.bf16.vlgmr.msra.gmra.mxu3 %vm355_vm2, %v635_v43 }
  0x3d   : > { %618 = vmatmul.msk.bf16.gmra.mxu0 %vm355_vm2, %v630_v44  ;;  %620 = vmatmul.msk.bf16.gmra.mxu1 %vm355_vm2, %v632_v45 }
  0x3e   : > { %622 = vmatmul.msk.bf16.gmra.mxu2 %vm355_vm2, %v634_v46  ;;  %624 = vmatmul.msk.bf16.gmra.mxu3 %vm355_vm2, %v636_v47 }
  0xaa   : > { %v389_v48 = vpop.f32.mrf.mxu0  ;;  %v399_v49 = vpop.f32.mrf.mxu1 }
  0xab   : > { %v445_v50 = vmul.f32 %v389_v48, %v389_v48  ;;  %v449_v51 = vmul.f32 %v399_v49, %v399_v49 }
  0xad   : > { %477 = vst [vmem:[%s797_s19] sm:$0xff] %v445_v50 }
  0xae   : > { %481 = vst [vmem:[%s797_s19 + $0x20] sm:$0xff] %v449_v51 }
  0xb1   : > { %v409_v52 = vpop.f32.mrf.mxu2  ;;  %v419_v53 = vpop.f32.mrf.mxu3 }
  0xb2   : > { %v453_v54 = vmul.f32 %v409_v52, %v409_v52  ;;  %v457_v55 = vmul.f32 %v419_v53, %v419_v53  ;;  %v391_v56 = vpop.f32.mrf.mxu0  ;;  %v401_v57 = vpop.f32.mrf.mxu1 }
  0xb3   : > { %v446_v58 = vmul.f32 %v391_v56, %v391_v56  ;;  %v450_v59 = vmul.f32 %v401_v57, %v401_v57 }
  0xb4   : > { %485 = vst [vmem:[%s797_s19 + $0x40] sm:$0xff] %v453_v54 }
  0xb5   : > { %489 = vst [vmem:[%s797_s19 + $0x60] sm:$0xff] %v457_v55 }
  0xb6   : > { %478 = vst [vmem:[%s797_s19 + $0x8] sm:$0xff] %v446_v58 }
  0xb7   : > { %482 = vst [vmem:[%s797_s19 + $0x28] sm:$0xff] %v450_v59 }
  0xb9   : > { %v411_v60 = vpop.f32.mrf.mxu2  ;;  %v421_v61 = vpop.f32.mrf.mxu3 }
  0xba   : > { %v454_v62 = vmul.f32 %v411_v60, %v411_v60  ;;  %v458_v63 = vmul.f32 %v421_v61, %v421_v61  ;;  %v394_v0 = vpop.f32.mrf.mxu0  ;;  %v404_v1 = vpop.f32.mrf.mxu1 }
  0xbb   : > { %v447_v2 = vmul.f32 %v394_v0, %v394_v0  ;;  %v451_v3 = vmul.f32 %v404_v1, %v404_v1 }
  0xbc   : > { %486 = vst [vmem:[%s797_s19 + $0x48] sm:$0xff] %v454_v62 }
  0xbd   : > { %490 = vst [vmem:[%s797_s19 + $0x68] sm:$0xff] %v458_v63 }
  0xbe   : > { %479 = vst [vmem:[%s797_s19 + $0x10] sm:$0xff] %v447_v2 }
  0xbf   : > { %483 = vst [vmem:[%s797_s19 + $0x30] sm:$0xff] %v451_v3 }
  0xc1   : > { %v414_v4 = vpop.f32.mrf.mxu2  ;;  %v424_v5 = vpop.f32.mrf.mxu3 }
  0xc2   : > { %v455_v6 = vmul.f32 %v414_v4, %v414_v4  ;;  %v459_v7 = vmul.f32 %v424_v5, %v424_v5  ;;  %v396_v8 = vpop.f32.mrf.mxu0  ;;  %v406_v9 = vpop.f32.mrf.mxu1 }
  0xc3   : > { %v448_v10 = vmul.f32 %v396_v8, %v396_v8  ;;  %v452_v11 = vmul.f32 %v406_v9, %v406_v9 }
  0xc4   : > { %487 = vst [vmem:[%s797_s19 + $0x50] sm:$0xff] %v455_v6 }
  0xc5   : > { %491 = vst [vmem:[%s797_s19 + $0x70] sm:$0xff] %v459_v7 }
  0xc6   : > { %480 = vst [vmem:[%s797_s19 + $0x18] sm:$0xff] %v448_v10 }
  0xc7   : > { %484 = vst [vmem:[%s797_s19 + $0x38] sm:$0xff] %v452_v11 }
  0xc9   : > { %v416_v12 = vpop.f32.mrf.mxu2  ;;  %v426_v13 = vpop.f32.mrf.mxu3 }
  0xca   : > { %v456_v14 = vmul.f32 %v416_v12, %v416_v12  ;;  %v460_v15 = vmul.f32 %v426_v13, %v426_v13 }
  0xcc   : > { %488 = vst [vmem:[%s797_s19 + $0x58] sm:$0xff] %v456_v14 }
  0xcd   : > { %492 = vst [vmem:[%s797_s19 + $0x78] sm:$0xff] %v460_v15 }
  0xce PF: > { %s13_s14 = sadd.s32 1, %s700_s14   ;;  %s828_s12 = smov %s696_s13 }
  0xcf   : > { %p10_p5 = scmp.ge.s32.totalorder %s13_s14, 4   ;;  %s829_s13 = smov %s831_s15 }
  0xd1   :  { %12 = sbr.rel (!%p10_p5) target bundleno = 2 (0x2), region = 69 }

// kernel: tile.37
= control target key start
LH: loop header
LB: loop body
LE: loop exit
PB: predicated region body
PF: predicated region fallthrough
CT: control target
= control target key end

     0   :  { %s22_s0 = inlined_call_operand.vmem [shape: f32[3], index: 0, kind: input, shape index: {}]   ;;  %s23_s1 = inlined_call_operand.vmem [shape: f32[2,3], index: 1, kind: output, shape index: {}]  }
   0x1   :  { %v4_v0 = vld [vmem:[%s22_s0] ss:$0 sm:$0xff] }
   0x2   :  { %5 = vst [vmem:[%s23_s1] sm:$0x3] %v4_v0 }

// kernel: tile.39
= control target key start
LH: loop header
LB: loop body
LE: loop exit
PB: predicated region body
PF: predicated region fallthrough
CT: control target
= control target key end

     0   :  { %vm7_vm0 = vcmask 23552   ;;  %vm13_vm1 = vcmask 48152   ;;  %s39_s0 = inlined_call_operand.vmem [shape: f32[2,3], index: 0, kind: input, shape index: {}]   ;;  %s40_s1 = inlined_call_operand.vmem [shape: f32[6,1], index: 1, kind: output, shape index: {}]  }
   0x1   :  { %v4_v0 = vld [vmem:[%s39_s0] sm:$0x3]  ;;  %s22_s0 = smov 3  }
   0x2   :  { %5 = vst [vmem:[#allocation1] sm:$0x3] %v4_v0 }
   0x9   :  { %v10_v1 = vld [vmem:[#allocation1 + $0x1] sm:$0x1]   ;;  %v6_v2 = vld [vmem:[#allocation1] sm:$0x1]  }
   0xa   :  { %11 = vrot.lane.b32.xlu0 %v10_v1, %s22_s0  ;;  %8 = vst.msk [vmem:[#allocation0] sm:$0x1] %vm7_vm0, %v6_v2  }
  0x7c   :  { %v12_v3 = vpop.permute.xlu0 %11  }
  0x7d   :  { %14 = vst.msk [vmem:[#allocation0] sm:$0x1] %vm13_vm1, %v12_v3  }
  0x84   :  { %v17_v4 = vld [vmem:[#allocation0] sm:$0x1] }
  0x85   :  { %20 = vst [vmem:[%s40_s1] sm:$0x1] %v17_v4 }

// kernel: forward_training.9
= control target key start
LH: loop header
LB: loop body
LE: loop exit
PB: predicated region body
PF: predicated region fallthrough
CT: control target
= control target key end

     0   :  { %v438_v0 = vmov 0   ;;  %v439_v17 = vmov 1   ;;  %v440_v18 = vmov 2   ;;  %v441_v28 = vmov 3   ;;  %s867_s1 = inlined_call_operand.vmem [shape: f32[128,4], index: 1, kind: input, shape index: {}]   ;;  %s868_s0 = inlined_call_operand.vmem [shape: f32[128,64], index: 0, kind: input, shape index: {}]   ;;  %s869_s2 = inlined_call_operand.vmem [shape: f32[128,64], index: 2, kind: output, shape index: {0}]   ;;  %s870_s3 = inlined_call_operand.vmem [shape: f32[128,64], index: 3, kind: output, shape index: {1}]  }
   0x1   :  { %428 = vset.pattern.permute.xlu2 %v438_v0  ;;  %427 = vset.pattern.permute.xlu1 %v438_v0  ;;  %v465_v1 = vld [vmem:[%s867_s1 + $0x20] sm:$0xff]  ;;  %v470_v2 = vld [vmem:[%s867_s1 + $0x10] sm:$0xff]  ;;  %v483_v4 = vld [vmem:[%s867_s1 + $0x28] sm:$0xff]  ;;  %vm221_vm0 = vcmask 523264  }
   0x2   :  { %v475_v3 = vld [vmem:[%s867_s1] sm:$0xff]  ;;  %426 = vset.pattern.permute.xlu0 %v438_v0  ;;  %67 = vperm.xlu2 %428, %v465_v1   ;;  %v488_v5 = vld [vmem:[%s867_s1 + $0x18] sm:$0xff]  ;;  %v493_v6 = vld [vmem:[%s867_s1 + $0x8] sm:$0xff] }
   0x3   :  { %57 = vperm.xlu1 %427, %v470_v2   ;;  %47 = vperm.xlu0 %426, %v475_v3   ;;  %v501_v7 = vld [vmem:[%s867_s1 + $0x40] sm:$0xff]  ;;  %v506_v8 = vld [vmem:[%s867_s1 + $0x38] sm:$0xff]  ;;  %v511_v9 = vld [vmem:[%s867_s1 + $0x30] sm:$0xff] }
   0x4   :  { %v519_v10 = vld [vmem:[%s867_s1 + $0x58] sm:$0xff]  ;;  %v524_v11 = vld [vmem:[%s867_s1 + $0x50] sm:$0xff]  ;;  %v529_v12 = vld [vmem:[%s867_s1 + $0x48] sm:$0xff] }
   0x5   :  { %v537_v13 = vld [vmem:[%s867_s1 + $0x70] sm:$0xff]  ;;  %v542_v14 = vld [vmem:[%s867_s1 + $0x68] sm:$0xff]  ;;  %v547_v15 = vld [vmem:[%s867_s1 + $0x60] sm:$0xff] }
   0x6   :  { %v555_v16 = vld [vmem:[%s867_s1 + $0x78] sm:$0xff]  ;;  %v603_v29 = vld [vmem:[%s868_s0 + $0x8] sm:$0xff]  ;;  %v618_v35 = vld [vmem:[%s868_s0 + $0x20] sm:$0xff] }
   0x7   :  { %v633_v41 = vld [vmem:[%s868_s0 + $0x30] sm:$0xff]  ;;  %v648_v47 = vld [vmem:[%s868_s0] sm:$0xff]  ;;  %v653_v48 = vld [vmem:[%s868_s0 + $0x48] sm:$0xff] }
   0x8   :  { %v667_v56 = vld [vmem:[%s868_s0 + $0x18] sm:$0xff]  ;;  %v672_v57 = vld [vmem:[%s868_s0 + $0x60] sm:$0xff]  ;;  %v681_v58 = vld [vmem:[%s868_s0 + $0x10] sm:$0xff] }
   0xa   :  { %72 = vperm.xlu2 %428, %v483_v4  }
   0xb   :  { %62 = vperm.xlu1 %427, %v488_v5   ;;  %52 = vperm.xlu0 %426, %v493_v6  }
  0x12   :  { %87 = vperm.xlu2 %428, %v501_v7  }
  0x13   :  { %82 = vperm.xlu1 %427, %v506_v8   ;;  %77 = vperm.xlu0 %426, %v511_v9  }
  0x1a   :  { %102 = vperm.xlu2 %428, %v519_v10  }
  0x1b   :  { %97 = vperm.xlu1 %427, %v524_v11   ;;  %92 = vperm.xlu0 %426, %v529_v12  }
  0x22   :  { %117 = vperm.xlu2 %428, %v537_v13  }
  0x23   :  { %112 = vperm.xlu1 %427, %v542_v14   ;;  %107 = vperm.xlu0 %426, %v547_v15  }
  0x2a   :  { %430 = vset.pattern.permute.xlu2 %v439_v17 }
  0x2b   :  { %429 = vset.pattern.permute.xlu1 %v439_v17  ;;  %122 = vperm.xlu0 %426, %v555_v16  }
  0x2c   :  { %146 = vperm.xlu2 %430, %v493_v6   ;;  %142 = vperm.xlu1 %429, %v475_v3  }
  0x33   :  { %431 = vset.pattern.permute.xlu0 %v439_v17 }
  0x34   :  { %158 = vperm.xlu2 %430, %v465_v1   ;;  %154 = vperm.xlu1 %429, %v488_v5  }
  0x35   :  { %150 = vperm.xlu0 %431, %v470_v2  }
  0x3c   :  { %166 = vperm.xlu2 %430, %v511_v9   ;;  %162 = vperm.xlu1 %429, %v483_v4  }
  0x3d   :  { %170 = vperm.xlu0 %431, %v506_v8  }
  0x44   :  { %178 = vperm.xlu2 %430, %v529_v12   ;;  %174 = vperm.xlu1 %429, %v501_v7  }
  0x45   :  { %182 = vperm.xlu0 %431, %v524_v11  }
  0x4c   :  { %190 = vperm.xlu2 %430, %v547_v15   ;;  %186 = vperm.xlu1 %429, %v519_v10  }
  0x4d   :  { %194 = vperm.xlu0 %431, %v542_v14  }
  0x54   :  { %202 = vperm.xlu2 %430, %v555_v16   ;;  %198 = vperm.xlu1 %429, %v537_v13  }
  0x55   :  { %432 = vset.pattern.permute.xlu0 %v440_v18 }
  0x56   :  { %239 = vperm.xlu0 %432, %v475_v3  }
  0x5c   :  { %434 = vset.pattern.permute.xlu2 %v440_v18  ;;  %433 = vset.pattern.permute.xlu1 %v440_v18  ;;  %v68_v19 = vpop.permute.xlu2 %67  ;;  %v21_v18 = vld [vmem:[%s868_s0 + $0x40] sm:$0xff] }
  0x5d   :  { %247 = vperm.xlu2 %434, %v470_v2   ;;  %243 = vperm.xlu1 %433, %v493_v6   ;;  %v129_v36 = vmul.f32 %v68_v19, %v618_v35 }
  0x5e   :  { %259 = vperm.xlu0 %432, %v483_v4  }
  0x64   :  { %v578_v20 = vpop.permute.xlu2 %72 }
  0x65   :  { %255 = vperm.xlu2 %434, %v465_v1   ;;  %251 = vperm.xlu1 %433, %v488_v5  }
  0x66   :  { %271 = vperm.xlu0 %432, %v501_v7  }
  0x6c   :  { %v583_v21 = vpop.permute.xlu2 %87 }
  0x6d   :  { %267 = vperm.xlu2 %434, %v506_v8   ;;  %263 = vperm.xlu1 %433, %v511_v9  }
  0x6e   :  { %283 = vperm.xlu0 %432, %v519_v10  }
  0x74   :  { %v588_v22 = vpop.permute.xlu2 %102 }
  0x75   :  { %v590_v23 = vpop.permute.xlu1 %57  ;;  %279 = vperm.xlu2 %434, %v524_v11   ;;  %275 = vperm.xlu1 %433, %v529_v12   ;;  %v48_v24 = vpop.permute.xlu0 %47 }
  0x76   :  { %295 = vperm.xlu0 %432, %v537_v13   ;;  %v125_v49 = vmul.f32 %v48_v24, %v648_v47  ;;  %v127_v61 = vmul.f32 %v590_v23, %v681_v58 }
  0x7c   :  { %v595_v25 = vpop.permute.xlu2 %117 }
  0x7d   :  { %v63_v26 = vpop.permute.xlu1 %62  ;;  %291 = vperm.xlu2 %434, %v542_v14   ;;  %287 = vperm.xlu1 %433, %v547_v15   ;;  %v53_v27 = vpop.permute.xlu0 %52 }
  0x7e   :  { %436 = vset.pattern.permute.xlu0 %v441_v28  ;;  %v126_v30 = vmul.f32 %v53_v27, %v603_v29  ;;  %v128_v59 = vmul.f32 %v63_v26, %v667_v56 }
  0x7f   :  { %323 = vperm.xlu0 %436, %v493_v6   ;;  %v710_v6 = vld [vmem:[%s868_s0 + $0x38] sm:$0xff] }
  0x85   :  { %v606_v31 = vpop.permute.xlu1 %82  ;;  %435 = vset.pattern.permute.xlu2 %v441_v28  ;;  %299 = vperm.xlu1 %433, %v555_v16   ;;  %v78_v32 = vpop.permute.xlu0 %77 }
  0x86   :  { %v147_v33 = vpop.permute.xlu2 %146  ;;  %319 = vperm.xlu2 %435, %v475_v3   ;;  %v131_v42 = vmul.f32 %v78_v32, %v633_v41 }
  0x87   :  { %v206_v34 = vadd.f32 %v147_v33, %v126_v30  ;;  %343 = vperm.xlu0 %436, %v511_v9   ;;  %v132_v9 = vmul.f32 %v606_v31, %v710_v6 }
  0x89   :  { %223 = vst.msk [vmem:[%s869_s2 + $0x8] sm:$0xff] %vm221_vm0, %v206_v34 }
  0x8d   :  { %v621_v37 = vpop.permute.xlu1 %97  ;;  %437 = vset.pattern.permute.xlu1 %v441_v28  ;;  %v93_v38 = vpop.permute.xlu0 %92  ;;  %v24_v28 = vld [vmem:[%s868_s0 + $0x58] sm:$0xff] }
  0x8e   :  { %v159_v39 = vpop.permute.xlu2 %158  ;;  %331 = vperm.xlu2 %435, %v488_v5   ;;  %327 = vperm.xlu1 %437, %v470_v2   ;;  %v134_v50 = vmul.f32 %v93_v38, %v653_v48  ;;  %v701_v5 = vld [vmem:[%s868_s0 + $0x78] sm:$0xff]  ;;  %v136_v30 = vmul.f32 %v588_v22, %v24_v28  ;;  %v27_v38 = vld [vmem:[%s868_s0 + $0x70] sm:$0xff] }
  0x8f   :  { %v209_v40 = vadd.f32 %v159_v39, %v129_v36  ;;  %355 = vperm.xlu0 %436, %v529_v12   ;;  %v139_v22 = vmul.f32 %v595_v25, %v27_v38 }
  0x91   :  { %226 = vst.msk [vmem:[%s869_s2 + $0x20] sm:$0xff] %vm221_vm0, %v209_v40 }
  0x95   :  { %v636_v43 = vpop.permute.xlu1 %112  ;;  %v108_v44 = vpop.permute.xlu0 %107 }
  0x96   :  { %v167_v45 = vpop.permute.xlu2 %166  ;;  %339 = vperm.xlu2 %435, %v483_v4   ;;  %335 = vperm.xlu1 %437, %v465_v1   ;;  %v137_v60 = vmul.f32 %v108_v44, %v672_v57  ;;  %v696_v4 = vld [vmem:[%s868_s0 + $0x28] sm:$0xff] }
  0x97   :  { %v211_v46 = vadd.f32 %v167_v45, %v131_v42  ;;  %367 = vperm.xlu0 %436, %v547_v15  }
  0x99   :  { %228 = vst.msk [vmem:[%s869_s2 + $0x30] sm:$0xff] %vm221_vm0, %v211_v46 }
  0x9d   :  { %v123_v51 = vpop.permute.xlu0 %122 }
  0x9e   :  { %v179_v52 = vpop.permute.xlu2 %178  ;;  %351 = vperm.xlu2 %435, %v501_v7   ;;  %347 = vperm.xlu1 %437, %v506_v8   ;;  %v143_v53 = vpop.permute.xlu1 %142  ;;  %v130_v7 = vmul.f32 %v578_v20, %v696_v4  ;;  %v140_v8 = vmul.f32 %v123_v51, %v701_v5 }
  0x9f   :  { %v214_v54 = vadd.f32 %v179_v52, %v134_v50  ;;  %v205_v55 = vadd.f32 %v143_v53, %v125_v49  ;;  %379 = vperm.xlu0 %436, %v555_v16  }
  0xa1   :  { %231 = vst.msk [vmem:[%s869_s2 + $0x48] sm:$0xff] %vm221_vm0, %v214_v54 }
  0xa2   :  { %222 = vst.msk [vmem:[%s869_s2] sm:$0xff] %vm221_vm0, %v205_v55 }
  0xa6   :  { %v191_v62 = vpop.permute.xlu2 %190  ;;  %363 = vperm.xlu2 %435, %v519_v10   ;;  %359 = vperm.xlu1 %437, %v524_v11   ;;  %v155_v63 = vpop.permute.xlu1 %154 }
  0xa7   :  { %v217_v0 = vadd.f32 %v191_v62, %v137_v60  ;;  %v208_v1 = vadd.f32 %v155_v63, %v128_v59  ;;  %v151_v2 = vpop.permute.xlu0 %150 }
  0xa8   :  { %v207_v3 = vadd.f32 %v151_v2, %v127_v61 }
  0xa9   :  { %234 = vst.msk [vmem:[%s869_s2 + $0x60] sm:$0xff] %vm221_vm0, %v217_v0 }
  0xaa   :  { %225 = vst.msk [vmem:[%s869_s2 + $0x18] sm:$0xff] %vm221_vm0, %v208_v1 }
  0xab   :  { %224 = vst.msk [vmem:[%s869_s2 + $0x10] sm:$0xff] %vm221_vm0, %v207_v3 }
  0xae   :  { %v203_v10 = vpop.permute.xlu2 %202  ;;  %375 = vperm.xlu2 %435, %v537_v13   ;;  %371 = vperm.xlu1 %437, %v542_v14   ;;  %v163_v11 = vpop.permute.xlu1 %162  ;;  %v737_v13 = vld [vmem:[%s868_s0 + $0x50] sm:$0xff]  ;;  %v133_v14 = vmul.f32 %v583_v21, %v21_v18  ;;  %v760_v21 = vld [vmem:[%s868_s0 + $0x68] sm:$0xff] }
  0xaf   :  { %v220_v12 = vadd.f32 %v203_v10, %v140_v8  ;;  %v210_v15 = vadd.f32 %v163_v11, %v130_v7  ;;  %v171_v16 = vpop.permute.xlu0 %170  ;;  %v135_v19 = vmul.f32 %v621_v37, %v737_v13  ;;  %v138_v31 = vmul.f32 %v636_v43, %v760_v21 }
  0xb0   :  { %v212_v17 = vadd.f32 %v171_v16, %v132_v9 }
  0xb1   :  { %237 = vst.msk [vmem:[%s869_s2 + $0x78] sm:$0xff] %vm221_vm0, %v220_v12 }
  0xb2   :  { %227 = vst.msk [vmem:[%s869_s2 + $0x28] sm:$0xff] %vm221_vm0, %v210_v15 }
  0xb3   :  { %229 = vst.msk [vmem:[%s869_s2 + $0x38] sm:$0xff] %vm221_vm0, %v212_v17 }
  0xb6   :  { %v175_v20 = vpop.permute.xlu1 %174 }
  0xb7   :  { %v213_v23 = vadd.f32 %v175_v20, %v133_v14  ;;  %v183_v24 = vpop.permute.xlu0 %182  ;;  %v248_v26 = vpop.permute.xlu2 %247 }
  0xb8   :  { %v215_v27 = vadd.f32 %v183_v24, %v135_v19  ;;  %v304_v15 = vmul.f32 %v248_v26, %v681_v58 }
  0xb9   :  { %230 = vst.msk [vmem:[%s869_s2 + $0x40] sm:$0xff] %vm221_vm0, %v213_v23 }
  0xba   :  { %232 = vst.msk [vmem:[%s869_s2 + $0x50] sm:$0xff] %vm221_vm0, %v215_v27 }
  0xbe   :  { %v187_v32 = vpop.permute.xlu1 %186 }
  0xbf   :  { %v216_v33 = vadd.f32 %v187_v32, %v136_v30  ;;  %v195_v34 = vpop.permute.xlu0 %194  ;;  %v256_v36 = vpop.permute.xlu2 %255 }
  0xc0   :  { %v218_v37 = vadd.f32 %v195_v34, %v138_v31 }
  0xc1   :  { %233 = vst.msk [vmem:[%s869_s2 + $0x58] sm:$0xff] %vm221_vm0, %v216_v33 }
  0xc2   :  { %235 = vst.msk [vmem:[%s869_s2 + $0x68] sm:$0xff] %vm221_vm0, %v218_v37 }
  0xc6   :  { %v199_v39 = vpop.permute.xlu1 %198 }
  0xc7   :  { %v219_v40 = vadd.f32 %v199_v39, %v139_v22  ;;  %v777_v42 = vpop.permute.xlu2 %267 }
  0xc8   :  { %v240_v43 = vpop.permute.xlu0 %239 }
  0xc9   :  { %236 = vst.msk [vmem:[%s869_s2 + $0x70] sm:$0xff] %vm221_vm0, %v219_v40  ;;  %v302_v25 = vmul.f32 %v240_v43, %v648_v47 }
  0xcf   :  { %v783_v44 = vpop.permute.xlu2 %279  ;;  %v244_v45 = vpop.permute.xlu1 %243 }
  0xd0   :  { %v260_v46 = vpop.permute.xlu0 %259  ;;  %v303_v1 = vmul.f32 %v244_v45, %v603_v29 }
  0xd1   :  { %v307_v47 = vmul.f32 %v260_v46, %v696_v4 }
  0xd7   :  { %v785_v49 = vpop.permute.xlu2 %291  ;;  %v252_v50 = vpop.permute.xlu1 %251 }
  0xd8   :  { %v272_v51 = vpop.permute.xlu0 %271  ;;  %v305_v59 = vmul.f32 %v252_v50, %v667_v56 }
  0xd9   :  { %v310_v56 = vmul.f32 %v272_v51, %v21_v18 }
  0xdf   :  { %v264_v52 = vpop.permute.xlu1 %263 }
  0xe0   :  { %v284_v53 = vpop.permute.xlu0 %283  ;;  %v320_v54 = vpop.permute.xlu2 %319  ;;  %v308_v4 = vmul.f32 %v264_v52, %v633_v41 }
  0xe1   :  { %v382_v55 = vadd.f32 %v320_v54, %v302_v25  ;;  %v313_v16 = vmul.f32 %v284_v53, %v24_v28 }
  0xe3   :  { %398 = vst.msk [vmem:[%s870_s3] sm:$0xff] %vm221_vm0, %v382_v55 }
  0xe7   :  { %v276_v60 = vpop.permute.xlu1 %275 }
  0xe8   :  { %v296_v61 = vpop.permute.xlu0 %295  ;;  %v332_v62 = vpop.permute.xlu2 %331  ;;  %v311_v17 = vmul.f32 %v276_v60, %v653_v48  ;;  %v306_v48 = vmul.f32 %v256_v36, %v618_v35  ;;  %v309_v35 = vmul.f32 %v777_v42, %v710_v6 }
  0xe9   :  { %v385_v63 = vadd.f32 %v332_v62, %v305_v59  ;;  %v316_v58 = vmul.f32 %v296_v61, %v27_v38  ;;  %v312_v38 = vmul.f32 %v783_v44, %v737_v13 }
  0xeb   :  { %401 = vst.msk [vmem:[%s870_s3 + $0x18] sm:$0xff] %vm221_vm0, %v385_v63 }
  0xef   :  { %v288_v0 = vpop.permute.xlu1 %287 }
  0xf0   :  { %v340_v2 = vpop.permute.xlu2 %339  ;;  %v314_v24 = vmul.f32 %v288_v0, %v672_v57 }
  0xf1   :  { %v387_v3 = vadd.f32 %v340_v2, %v307_v47  ;;  %v324_v7 = vpop.permute.xlu0 %323 }
  0xf2   :  { %v383_v8 = vadd.f32 %v324_v7, %v303_v1 }
  0xf3   :  { %403 = vst.msk [vmem:[%s870_s3 + $0x28] sm:$0xff] %vm221_vm0, %v387_v3 }
  0xf4   :  { %399 = vst.msk [vmem:[%s870_s3 + $0x8] sm:$0xff] %vm221_vm0, %v383_v8 }
  0xf7   :  { %v300_v9 = vpop.permute.xlu1 %299 }
  0xf8   :  { %v352_v10 = vpop.permute.xlu2 %351  ;;  %v317_v57 = vmul.f32 %v300_v9, %v701_v5  ;;  %v315_v5 = vmul.f32 %v785_v49, %v760_v21 }
  0xf9   :  { %v390_v29 = vadd.f32 %v352_v10, %v310_v56  ;;  %v344_v11 = vpop.permute.xlu0 %343 }
  0xfa   :  { %v388_v12 = vadd.f32 %v344_v11, %v308_v4 }
  0xfb   :  { %406 = vst.msk [vmem:[%s870_s3 + $0x40] sm:$0xff] %vm221_vm0, %v390_v29 }
  0xfc   :  { %404 = vst.msk [vmem:[%s870_s3 + $0x30] sm:$0xff] %vm221_vm0, %v388_v12 }
 0x100   :  { %v364_v41 = vpop.permute.xlu2 %363  ;;  %v328_v18 = vpop.permute.xlu1 %327 }
 0x101   :  { %v393_v14 = vadd.f32 %v364_v41, %v313_v16  ;;  %v384_v19 = vadd.f32 %v328_v18, %v304_v15  ;;  %v356_v20 = vpop.permute.xlu0 %355 }
 0x102   :  { %v391_v23 = vadd.f32 %v356_v20, %v311_v17 }
 0x103   :  { %409 = vst.msk [vmem:[%s870_s3 + $0x58] sm:$0xff] %vm221_vm0, %v393_v14 }
 0x104   :  { %400 = vst.msk [vmem:[%s870_s3 + $0x10] sm:$0xff] %vm221_vm0, %v384_v19 }
 0x105   :  { %407 = vst.msk [vmem:[%s870_s3 + $0x48] sm:$0xff] %vm221_vm0, %v391_v23 }
 0x108   :  { %v376_v26 = vpop.permute.xlu2 %375  ;;  %v336_v27 = vpop.permute.xlu1 %335 }
 0x109   :  { %v396_v28 = vadd.f32 %v376_v26, %v316_v58  ;;  %v386_v30 = vadd.f32 %v336_v27, %v306_v48  ;;  %v368_v31 = vpop.permute.xlu0 %367 }
 0x10a   :  { %v394_v32 = vadd.f32 %v368_v31, %v314_v24 }
 0x10b   :  { %412 = vst.msk [vmem:[%s870_s3 + $0x70] sm:$0xff] %vm221_vm0, %v396_v28 }
 0x10c   :  { %402 = vst.msk [vmem:[%s870_s3 + $0x20] sm:$0xff] %vm221_vm0, %v386_v30 }
 0x10d   :  { %410 = vst.msk [vmem:[%s870_s3 + $0x60] sm:$0xff] %vm221_vm0, %v394_v32 }
 0x110   :  { %v348_v33 = vpop.permute.xlu1 %347 }
 0x111   :  { %v389_v34 = vadd.f32 %v348_v33, %v309_v35  ;;  %v380_v36 = vpop.permute.xlu0 %379 }
 0x112   :  { %v397_v37 = vadd.f32 %v380_v36, %v317_v57 }
 0x113   :  { %405 = vst.msk [vmem:[%s870_s3 + $0x38] sm:$0xff] %vm221_vm0, %v389_v34 }
 0x114   :  { %413 = vst.msk [vmem:[%s870_s3 + $0x78] sm:$0xff] %vm221_vm0, %v397_v37 }
 0x118   :  { %v360_v6 = vpop.permute.xlu1 %359 }
 0x119   :  { %v392_v22 = vadd.f32 %v360_v6, %v312_v38 }
 0x11b   :  { %408 = vst.msk [vmem:[%s870_s3 + $0x50] sm:$0xff] %vm221_vm0, %v392_v22 }
 0x120   :  { %v372_v39 = vpop.permute.xlu1 %371 }
 0x121   :  { %v395_v40 = vadd.f32 %v372_v39, %v315_v5 }
 0x123   :  { %411 = vst.msk [vmem:[%s870_s3 + $0x68] sm:$0xff] %vm221_vm0, %v395_v40 }

// kernel: forward_training.5
= control target key start
LH: loop header
LB: loop body
LE: loop exit
PB: predicated region body
PF: predicated region fallthrough
CT: control target
= control target key end

     0   :  { %v541_v0 = vmov 0   ;;  %v542_v2 = vmov 1   ;;  %s2030_s1 = inlined_call_operand.vmem [shape: f32[6,2], index: 1, kind: input, shape index: {}]   ;;  %s2031_s0 = inlined_call_operand.vmem [shape: f32[6,16384], index: 0, kind: input, shape index: {}]   ;;  %s2032_s2 = inlined_call_operand.vmem [shape: f32[6,16384], index: 2, kind: output, shape index: {}]  }
   0x1   :  { %539 = vset.pattern.permute.xlu0 %v541_v0  ;;  %v11_v1 = vld [vmem:[%s2030_s1] sm:$0x3f]  ;;  %v13_v4 = vld [vmem:[%s2031_s0 + $0x8] sm:$0x3f]  ;;  %v14_v5 = vld [vmem:[%s2031_s0 + $0x10] sm:$0x3f] }
   0x2   :  { %142 = vperm.xlu0 %539, %v11_v1   ;;  %v12_v3 = vld [vmem:[%s2031_s0] sm:$0x3f]  ;;  %v15_v6 = vld [vmem:[%s2031_s0 + $0x18] sm:$0x3f]  ;;  %v17_v8 = vld [vmem:[%s2031_s0 + $0x28] sm:$0x3f] }
   0x3   :  { %v16_v7 = vld [vmem:[%s2031_s0 + $0x20] sm:$0x3f]  ;;  %v77_v11 = vld [vmem:[%s2031_s0 + $0x208] sm:$0x3f]  ;;  %v78_v12 = vld [vmem:[%s2031_s0 + $0x210] sm:$0x3f] }
   0x4   :  { %v76_v10 = vld [vmem:[%s2031_s0 + $0x200] sm:$0x3f]  ;;  %v79_v13 = vld [vmem:[%s2031_s0 + $0x218] sm:$0x3f]  ;;  %v81_v15 = vld [vmem:[%s2031_s0 + $0x228] sm:$0x3f] }
   0x5   :  { %v80_v14 = vld [vmem:[%s2031_s0 + $0x220] sm:$0x3f]  ;;  %v82_v16 = vld [vmem:[%s2031_s0 + $0x230] sm:$0x3f]  ;;  %v83_v17 = vld [vmem:[%s2031_s0 + $0x238] sm:$0x3f] }
   0x6   :  { %v84_v18 = vld [vmem:[%s2031_s0 + $0x240] sm:$0x3f]  ;;  %v85_v19 = vld [vmem:[%s2031_s0 + $0x248] sm:$0x3f]  ;;  %v86_v20 = vld [vmem:[%s2031_s0 + $0x250] sm:$0x3f] }
   0x7   :  { %v87_v21 = vld [vmem:[%s2031_s0 + $0x258] sm:$0x3f]  ;;  %v88_v22 = vld [vmem:[%s2031_s0 + $0x260] sm:$0x3f]  ;;  %v89_v23 = vld [vmem:[%s2031_s0 + $0x268] sm:$0x3f] }
   0x8   :  { %v90_v24 = vld [vmem:[%s2031_s0 + $0x270] sm:$0x3f]  ;;  %v91_v25 = vld [vmem:[%s2031_s0 + $0x278] sm:$0x3f]  ;;  %v92_v28 = vld [vmem:[%s2031_s0 + $0x280] sm:$0x3f] }
   0x9   :  { %v93_v29 = vld [vmem:[%s2031_s0 + $0x288] sm:$0x3f]  ;;  %v94_v30 = vld [vmem:[%s2031_s0 + $0x290] sm:$0x3f]  ;;  %v95_v31 = vld [vmem:[%s2031_s0 + $0x298] sm:$0x3f] }
   0xa   :  { %540 = vset.pattern.permute.xlu0 %v542_v2  ;;  %v96_v36 = vld [vmem:[%s2031_s0 + $0x2a0] sm:$0x3f]  ;;  %v97_v37 = vld [vmem:[%s2031_s0 + $0x2a8] sm:$0x3f]  ;;  %v98_v38 = vld [vmem:[%s2031_s0 + $0x2b0] sm:$0x3f] }
   0xb   :  { %274 = vperm.xlu0 %540, %v11_v1   ;;  %v99_v39 = vld [vmem:[%s2031_s0 + $0x2b8] sm:$0x3f]  ;;  %v100_v44 = vld [vmem:[%s2031_s0 + $0x2c0] sm:$0x3f]  ;;  %v101_v45 = vld [vmem:[%s2031_s0 + $0x2c8] sm:$0x3f] }
   0xc   :  { %v102_v46 = vld [vmem:[%s2031_s0 + $0x2d0] sm:$0x3f]  ;;  %v103_v47 = vld [vmem:[%s2031_s0 + $0x2d8] sm:$0x3f]  ;;  %v104_v52 = vld [vmem:[%s2031_s0 + $0x2e0] sm:$0x3f] }
   0xd   :  { %v105_v53 = vld [vmem:[%s2031_s0 + $0x2e8] sm:$0x3f]  ;;  %v106_v54 = vld [vmem:[%s2031_s0 + $0x2f0] sm:$0x3f]  ;;  %v107_v55 = vld [vmem:[%s2031_s0 + $0x2f8] sm:$0x3f] }
   0xe   :  { %v108_v60 = vld [vmem:[%s2031_s0 + $0x300] sm:$0x3f]  ;;  %v109_v61 = vld [vmem:[%s2031_s0 + $0x308] sm:$0x3f]  ;;  %v110_v62 = vld [vmem:[%s2031_s0 + $0x310] sm:$0x3f] }
   0xf   :  { %v111_v63 = vld [vmem:[%s2031_s0 + $0x318] sm:$0x3f] }
  0x74   :  { %v579_v9 = vpop.permute.xlu0 %142 }
  0x75   :  { %v630_v26 = vmul.f32 %v579_v9, %v12_v3  ;;  %v633_v27 = vmul.f32 %v579_v9, %v13_v4  ;;  %v648_v32 = vmul.f32 %v579_v9, %v14_v5  ;;  %v651_v33 = vmul.f32 %v579_v9, %v15_v6  ;;  %v112_v4 = vld [vmem:[%s2031_s0 + $0x320] sm:$0x3f]  ;;  %v113_v5 = vld [vmem:[%s2031_s0 + $0x328] sm:$0x3f]  ;;  %v114_v6 = vld [vmem:[%s2031_s0 + $0x330] sm:$0x3f] }
  0x76   :  { %v654_v34 = vmul.f32 %v579_v9, %v16_v7  ;;  %v657_v35 = vmul.f32 %v579_v9, %v17_v8  ;;  %v672_v40 = vmul.f32 %v579_v9, %v76_v10  ;;  %v675_v41 = vmul.f32 %v579_v9, %v77_v11  ;;  %v115_v7 = vld [vmem:[%s2031_s0 + $0x338] sm:$0x3f] }
  0x77   :  { %v678_v42 = vmul.f32 %v579_v9, %v78_v12  ;;  %v681_v43 = vmul.f32 %v579_v9, %v79_v13  ;;  %v696_v48 = vmul.f32 %v579_v9, %v80_v14  ;;  %v699_v49 = vmul.f32 %v579_v9, %v81_v15  ;;  %v116_v13 = vld [vmem:[%s2031_s0 + $0x340] sm:$0x3f]  ;;  %v117_v14 = vld [vmem:[%s2031_s0 + $0x348] sm:$0x3f]  ;;  %v118_v15 = vld [vmem:[%s2031_s0 + $0x350] sm:$0x3f] }
  0x78   :  { %v702_v50 = vmul.f32 %v579_v9, %v82_v16  ;;  %v705_v51 = vmul.f32 %v579_v9, %v83_v17  ;;  %v720_v56 = vmul.f32 %v579_v9, %v84_v18  ;;  %v723_v57 = vmul.f32 %v579_v9, %v85_v19 }
  0x79   :  { %v726_v58 = vmul.f32 %v579_v9, %v86_v20  ;;  %v729_v59 = vmul.f32 %v579_v9, %v87_v21  ;;  %v744_v0 = vmul.f32 %v579_v9, %v88_v22  ;;  %v747_v1 = vmul.f32 %v579_v9, %v89_v23  ;;  %v119_v20 = vld [vmem:[%s2031_s0 + $0x358] sm:$0x3f]  ;;  %v120_v21 = vld [vmem:[%s2031_s0 + $0x360] sm:$0x3f]  ;;  %v121_v22 = vld [vmem:[%s2031_s0 + $0x368] sm:$0x3f] }
  0x7a   :  { %v750_v2 = vmul.f32 %v579_v9, %v90_v24  ;;  %v753_v3 = vmul.f32 %v579_v9, %v91_v25  ;;  %v768_v8 = vmul.f32 %v579_v9, %v92_v28  ;;  %v771_v10 = vmul.f32 %v579_v9, %v93_v29  ;;  %v122_v29 = vld [vmem:[%s2031_s0 + $0x370] sm:$0x3f] }
  0x7b   :  { %v774_v11 = vmul.f32 %v579_v9, %v94_v30  ;;  %v777_v12 = vmul.f32 %v579_v9, %v95_v31  ;;  %v789_v16 = vmul.f32 %v579_v9, %v96_v36  ;;  %v792_v17 = vmul.f32 %v579_v9, %v97_v37  ;;  %v123_v30 = vld [vmem:[%s2031_s0 + $0x378] sm:$0x3f]  ;;  %v124_v31 = vld [vmem:[%s2031_s0 + $0x380] sm:$0x3f] }
  0x7c   :  { %v795_v18 = vmul.f32 %v579_v9, %v98_v38  ;;  %v798_v19 = vmul.f32 %v579_v9, %v99_v39  ;;  %v810_v23 = vmul.f32 %v579_v9, %v100_v44  ;;  %v813_v24 = vmul.f32 %v579_v9, %v101_v45  ;;  %v125_v44 = vld [vmem:[%s2031_s0 + $0x388] sm:$0x3f]  ;;  %v126_v45 = vld [vmem:[%s2031_s0 + $0x390] sm:$0x3f] }
  0x7d   :  { %v816_v25 = vmul.f32 %v579_v9, %v102_v46  ;;  %v819_v28 = vmul.f32 %v579_v9, %v103_v47  ;;  %v831_v36 = vmul.f32 %v579_v9, %v104_v52  ;;  %v834_v37 = vmul.f32 %v579_v9, %v105_v53  ;;  %v127_v46 = vld [vmem:[%s2031_s0 + $0x398] sm:$0x3f] }
  0x7e   :  { %2033 = vst [vmem:[#allocation2_spill] sm:$0xff] %v798_v19  ;;  %v837_v38 = vmul.f32 %v579_v9, %v106_v54  ;;  %v840_v39 = vmul.f32 %v579_v9, %v107_v55  ;;  %v852_v47 = vmul.f32 %v579_v9, %v108_v60  ;;  %v855_v52 = vmul.f32 %v579_v9, %v109_v61  ;;  %v128_v55 = vld [vmem:[%s2031_s0 + $0x3a0] sm:$0x3f]  ;;  %v130_v60 = vld [vmem:[%s2031_s0 + $0x3b0] sm:$0x3f] }
  0x7f   :  { %2034 = vst [vmem:[#allocation3_spill] sm:$0xff] %v810_v23  ;;  %v858_v53 = vmul.f32 %v579_v9, %v110_v62  ;;  %v861_v54 = vmul.f32 %v579_v9, %v111_v63  ;;  %v873_v61 = vmul.f32 %v579_v9, %v112_v4  ;;  %v876_v62 = vmul.f32 %v579_v9, %v113_v5  ;;  %v133_v4 = vld [vmem:[%s2031_s0 + $0x3c8] sm:$0x3f] }
  0x80   :  { %2035 = vst [vmem:[#allocation4_spill] sm:$0xff] %v813_v24  ;;  %v879_v63 = vmul.f32 %v579_v9, %v114_v6  ;;  %v894_v5 = vmul.f32 %v579_v9, %v116_v13  ;;  %v897_v6 = vmul.f32 %v579_v9, %v117_v14  ;;  %v135_v13 = vld [vmem:[%s2031_s0 + $0x3d8] sm:$0x3f]  ;;  %v136_v14 = vld [vmem:[%s2031_s0 + $0x3e0] sm:$0x3f] }
  0x81   :  { %2036 = vst [vmem:[#allocation5_spill] sm:$0xff] %v816_v25  ;;  %v47_v25 = vld [vmem:[%s2031_s0 + $0x118] sm:$0x3f] }
  0x82   :  { %2037 = vst [vmem:[#allocation6_spill] sm:$0xff] %v819_v28  ;;  %v45_v28 = vld [vmem:[%s2031_s0 + $0x108] sm:$0x3f] }
  0x83   :  { %2038 = vst [vmem:[#allocation7_spill] sm:$0xff] %v831_v36  ;;  %v43_v36 = vld [vmem:[%s2031_s0 + $0xf8] sm:$0x3f] }
  0x84   :  { %2039 = vst [vmem:[#allocation8_spill] sm:$0xff] %v834_v37  ;;  %v41_v37 = vld [vmem:[%s2031_s0 + $0xe8] sm:$0x3f] }
  0x85   :  { %2040 = vst [vmem:[#allocation9_spill] sm:$0xff] %v837_v38  ;;  %v174_v24 = vmul.f32 %v579_v9, %v41_v37 }
  0x86   :  { %2041 = vst [vmem:[#allocation10_spill] sm:$0xff] %v840_v39  ;;  %v129_v39 = vld [vmem:[%s2031_s0 + $0x3a8] sm:$0x3f] }
  0x87   :  { %2042 = vst [vmem:[#allocation11_spill] sm:$0xff] %v852_v47 }
  0x88   :  { %2043 = vst [vmem:[#allocation12_spill] sm:$0xff] %v855_v52  ;;  %v132_v52 = vld [vmem:[%s2031_s0 + $0x3c0] sm:$0x3f] }
  0x89   :  { %2044 = vst [vmem:[#allocation13_spill] sm:$0xff] %v858_v53  ;;  %v131_v53 = vld [vmem:[%s2031_s0 + $0x3b8] sm:$0x3f] }
  0x8a   :  { %2045 = vst [vmem:[#allocation14_spill] sm:$0xff] %v861_v54  ;;  %v882_v54 = vmul.f32 %v579_v9, %v115_v7  ;;  %v900_v7 = vmul.f32 %v579_v9, %v118_v15  ;;  %v918_v15 = vmul.f32 %v579_v9, %v120_v21  ;;  %v137_v21 = vld [vmem:[%s2031_s0 + $0x3e8] sm:$0x3f] }
  0x8b   :  { %2046 = vst [vmem:[#allocation15_spill] sm:$0xff] %v873_v61  ;;  %v21_v61 = vld [vmem:[%s2031_s0 + $0x48] sm:$0x3f] }
  0x8c   :  { %2047 = vst [vmem:[#allocation16_spill] sm:$0xff] %v876_v62  ;;  %v134_v62 = vld [vmem:[%s2031_s0 + $0x3d0] sm:$0x3f] }
  0x8d   :  { %2048 = vst [vmem:[#allocation17_spill] sm:$0xff] %v879_v63  ;;  %v18_v63 = vld [vmem:[%s2031_s0 + $0x30] sm:$0x3f] }
  0x8e   :  { %2049 = vst [vmem:[#allocation18_spill] sm:$0xff] %v882_v54  ;;  %v903_v54 = vmul.f32 %v579_v9, %v119_v20  ;;  %v921_v20 = vmul.f32 %v579_v9, %v121_v22  ;;  %v138_v22 = vld [vmem:[%s2031_s0 + $0x3f0] sm:$0x3f] }
  0x8f   :  { %2050 = vst [vmem:[#allocation19_spill] sm:$0xff] %v894_v5  ;;  %v20_v5 = vld [vmem:[%s2031_s0 + $0x40] sm:$0x3f] }
  0x90   :  { %2051 = vst [vmem:[#allocation20_spill] sm:$0xff] %v897_v6  ;;  %v19_v6 = vld [vmem:[%s2031_s0 + $0x38] sm:$0x3f] }
  0x91   :  { %2052 = vst [vmem:[#allocation21_spill] sm:$0xff] %v900_v7  ;;  %v927_v7 = vmul.f32 %v579_v9, %v123_v30  ;;  %v945_v30 = vmul.f32 %v579_v9, %v124_v31  ;;  %v22_v31 = vld [vmem:[%s2031_s0 + $0x50] sm:$0x3f] }
  0x92   :  { %2053 = vst [vmem:[#allocation22_spill] sm:$0xff] %v903_v54  ;;  %v924_v54 = vmul.f32 %v579_v9, %v122_v29  ;;  %v139_v29 = vld [vmem:[%s2031_s0 + $0x3f8] sm:$0x3f]  ;;  %v155_v47 = vmul.f32 %v579_v9, %v22_v31 }
  0x93   :  { %2054 = vst [vmem:[#allocation23_spill] sm:$0xff] %v918_v15  ;;  %v956_v15 = vpop.permute.xlu0 %274 }
  0x94   :  { %2055 = vst [vmem:[#allocation24_spill] sm:$0xff] %v921_v20  ;;  %v954_v20 = vmul.f32 %v579_v9, %v127_v46  ;;  %v971_v46 = vmul.f32 %v579_v9, %v129_v39  ;;  %v989_v39 = vmul.f32 %v579_v9, %v132_v52  ;;  %v29_v52 = vld [vmem:[%s2031_s0 + $0x88] sm:$0x3f]  ;;  %v287_v19 = vadd.f32 %v956_v15, %v155_v47 }
  0x95   :  { %2056 = vst [vmem:[#allocation25_spill] sm:$0xff] %v924_v54  ;;  %v951_v54 = vmul.f32 %v579_v9, %v126_v45  ;;  %v968_v45 = vmul.f32 %v579_v9, %v128_v55  ;;  %v26_v55 = vld [vmem:[%s2031_s0 + $0x70] sm:$0x3f]  ;;  %v1149_v47 = vmul.f32 %v579_v9, %v47_v25 }
  0x96   :  { %2057 = vst [vmem:[#allocation26_spill] sm:$0xff] %v927_v7  ;;  %v948_v7 = vmul.f32 %v579_v9, %v125_v44  ;;  %v23_v44 = vld [vmem:[%s2031_s0 + $0x58] sm:$0x3f] }
  0x97   :  { %2058 = vst [vmem:[#allocation27_spill] sm:$0xff] %v945_v30  ;;  %v25_v30 = vld [vmem:[%s2031_s0 + $0x68] sm:$0x3f]  ;;  %v156_v38 = vmul.f32 %v579_v9, %v23_v44  ;;  %v159_v44 = vmul.f32 %v579_v9, %v26_v55  ;;  %v162_v55 = vmul.f32 %v579_v9, %v29_v52 }
  0x98   :  { %2059 = vst [vmem:[#allocation28_spill] sm:$0xff] %v948_v7  ;;  %v24_v7 = vld [vmem:[%s2031_s0 + $0x60] sm:$0x3f]  ;;  %v158_v31 = vmul.f32 %v579_v9, %v25_v30 }
  0x99   :  { %2060 = vst [vmem:[#allocation29_spill] sm:$0xff] %v951_v54  ;;  %v977_v54 = vmul.f32 %v579_v9, %v131_v53  ;;  %v995_v53 = vmul.f32 %v579_v9, %v134_v62  ;;  %v1013_v62 = vmul.f32 %v579_v9, %v137_v21  ;;  %v151_v21 = vmul.f32 %v579_v9, %v18_v63  ;;  %v35_v63 = vld [vmem:[%s2031_s0 + $0xb8] sm:$0x3f] }
  0x9a   :  { %2061 = vst [vmem:[#allocation30_spill] sm:$0xff] %v954_v20  ;;  %v974_v20 = vmul.f32 %v579_v9, %v130_v60  ;;  %v992_v60 = vmul.f32 %v579_v9, %v133_v4  ;;  %v1010_v4 = vmul.f32 %v579_v9, %v136_v14  ;;  %v32_v14 = vld [vmem:[%s2031_s0 + $0xa0] sm:$0x3f] }
  0x9b   :  { %2062 = vst [vmem:[#allocation31_spill] sm:$0xff] %v968_v45  ;;  %v37_v45 = vld [vmem:[%s2031_s0 + $0xc8] sm:$0x3f]  ;;  %v165_v52 = vmul.f32 %v579_v9, %v32_v14  ;;  %v168_v14 = vmul.f32 %v579_v9, %v35_v63 }
  0x9c   :  { %2063 = vst [vmem:[#allocation32_spill] sm:$0xff] %v971_v46  ;;  %v28_v46 = vld [vmem:[%s2031_s0 + $0x80] sm:$0x3f] }
  0x9d   :  { %2064 = vst [vmem:[#allocation33_spill] sm:$0xff] %v974_v20  ;;  %v27_v20 = vld [vmem:[%s2031_s0 + $0x78] sm:$0x3f]  ;;  %v161_v30 = vmul.f32 %v579_v9, %v28_v46 }
  0x9e   :  { %2065 = vst [vmem:[#allocation34_spill] sm:$0xff] %v977_v54  ;;  %v998_v54 = vmul.f32 %v579_v9, %v135_v13  ;;  %v1016_v13 = vmul.f32 %v579_v9, %v138_v22  ;;  %v277_v22 = vadd.f32 %v956_v15, %v630_v26  ;;  %v152_v26 = vmul.f32 %v579_v9, %v19_v6 }
  0x9f   :  { %2066 = vst [vmem:[#allocation35_spill] sm:$0xff] %v989_v39  ;;  %v36_v39 = vld [vmem:[%s2031_s0 + $0xc0] sm:$0x3f]  ;;  %v157_v6 = vmul.f32 %v579_v9, %v24_v7  ;;  %v160_v7 = vmul.f32 %v579_v9, %v27_v20 }
  0xa0   :  { %2067 = vst [vmem:[#allocation36_spill] sm:$0xff] %v992_v60  ;;  %v31_v60 = vld [vmem:[%s2031_s0 + $0x98] sm:$0x3f] }
  0xa1   :  { %2068 = vst [vmem:[#allocation37_spill] sm:$0xff] %v995_v53  ;;  %v30_v53 = vld [vmem:[%s2031_s0 + $0x90] sm:$0x3f]  ;;  %v164_v46 = vmul.f32 %v579_v9, %v31_v60 }
  0xa2   :  { %2069 = vst [vmem:[#allocation38_spill] sm:$0xff] %v998_v54  ;;  %v1019_v54 = vmul.f32 %v579_v9, %v139_v29  ;;  %v278_v29 = vadd.f32 %v956_v15, %v633_v27  ;;  %v154_v27 = vmul.f32 %v579_v9, %v21_v61  ;;  %v281_v61 = vadd.f32 %v956_v15, %v654_v34 }
  0xa3   :  { %2070 = vst [vmem:[#allocation39_spill] sm:$0xff] %v1010_v4  ;;  %v153_v4 = vmul.f32 %v579_v9, %v20_v5  ;;  %v39_v5 = vld [vmem:[%s2031_s0 + $0xd8] sm:$0x3f]  ;;  %v282_v34 = vadd.f32 %v956_v15, %v657_v35  ;;  %v163_v20 = vmul.f32 %v579_v9, %v30_v53  ;;  %v283_v35 = vadd.f32 %v956_v15, %v151_v21 }
  0xa4   :  { %2071 = vst [vmem:[#allocation40_spill] sm:$0xff] %v1013_v62  ;;  %v34_v62 = vld [vmem:[%s2031_s0 + $0xb0] sm:$0x3f]  ;;  %v284_v21 = vadd.f32 %v956_v15, %v152_v26 }
  0xa5   :  { %2072 = vst [vmem:[#allocation41_spill] sm:$0xff] %v1016_v13  ;;  %v33_v13 = vld [vmem:[%s2031_s0 + $0xa8] sm:$0x3f]  ;;  %v167_v60 = vmul.f32 %v579_v9, %v34_v62  ;;  %v285_v26 = vadd.f32 %v956_v15, %v153_v4  ;;  %v170_v62 = vmul.f32 %v579_v9, %v37_v45  ;;  %v286_v4 = vadd.f32 %v956_v15, %v154_v27 }
  0xa6   :  { %2073 = vst [vmem:[#allocation42_spill] sm:$0xff] %v1019_v54  ;;  %v279_v54 = vadd.f32 %v956_v15, %v648_v32  ;;  %v280_v32 = vadd.f32 %v956_v15, %v651_v33  ;;  %v38_v33 = vld [vmem:[%s2031_s0 + $0xd0] sm:$0x3f]  ;;  %v166_v53 = vmul.f32 %v579_v9, %v33_v13  ;;  %v169_v13 = vmul.f32 %v579_v9, %v36_v39 }
  0xa7   :  { %405 = vst [vmem:[%s2032_s2] sm:$0x3f] %v277_v22  ;;  %v40_v22 = vld [vmem:[%s2031_s0 + $0xe0] sm:$0x3f]  ;;  %v171_v63 = vmul.f32 %v579_v9, %v38_v33  ;;  %v172_v39 = vmul.f32 %v579_v9, %v39_v5  ;;  %v176_v45 = vmul.f32 %v579_v9, %v43_v36  ;;  %v178_v33 = vmul.f32 %v579_v9, %v45_v28 }
  0xa8   :  { %406 = vst [vmem:[%s2032_s2 + $0x8] sm:$0x3f] %v278_v29  ;;  %v42_v29 = vld [vmem:[%s2031_s0 + $0xf0] sm:$0x3f]  ;;  %v288_v5 = vadd.f32 %v956_v15, %v156_v38  ;;  %v290_v36 = vadd.f32 %v956_v15, %v158_v31  ;;  %v291_v28 = vadd.f32 %v956_v15, %v159_v44  ;;  %v292_v38 = vadd.f32 %v956_v15, %v160_v7 }
  0xa9   :  { %407 = vst [vmem:[%s2032_s2 + $0x10] sm:$0x3f] %v279_v54  ;;  %v44_v54 = vld [vmem:[%s2031_s0 + $0x100] sm:$0x3f]  ;;  %v175_v23 = vmul.f32 %v579_v9, %v42_v29  ;;  %v295_v25 = vadd.f32 %v956_v15, %v163_v20  ;;  %v297_v31 = vadd.f32 %v956_v15, %v165_v52  ;;  %v298_v29 = vadd.f32 %v956_v15, %v166_v53 }
  0xaa   :  { %408 = vst [vmem:[%s2032_s2 + $0x18] sm:$0x3f] %v280_v32  ;;  %v46_v32 = vld [vmem:[%s2031_s0 + $0x110] sm:$0x3f]  ;;  %v177_v27 = vmul.f32 %v579_v9, %v44_v54  ;;  %v299_v44 = vadd.f32 %v956_v15, %v167_v60  ;;  %v1172_v7 = vadd.f32 %v956_v15, %v168_v14  ;;  %v1184_v20 = vadd.f32 %v956_v15, %v171_v63  ;;  %v2077_v63 = vld [vmem:[#allocation5_spill] sm:$0xff] }
  0xab   :  { %409 = vst [vmem:[%s2032_s2 + $0x20] sm:$0x3f] %v281_v61  ;;  %v173_v61 = vmul.f32 %v579_v9, %v40_v22  ;;  %v1146_v37 = vmul.f32 %v579_v9, %v46_v32  ;;  %v293_v22 = vadd.f32 %v956_v15, %v161_v30  ;;  %v1175_v30 = vadd.f32 %v956_v15, %v169_v13  ;;  %v2075_v32 = vld [vmem:[#allocation3_spill] sm:$0xff] }
  0xac   :  { %410 = vst [vmem:[%s2032_s2 + $0x28] sm:$0x3f] %v282_v34  ;;  %v289_v34 = vadd.f32 %v956_v15, %v157_v6  ;;  %v296_v6 = vadd.f32 %v956_v15, %v164_v46  ;;  %v1193_v52 = vadd.f32 %v956_v15, %v174_v24  ;;  %v1199_v53 = vadd.f32 %v956_v15, %v175_v23 }
  0xad   :  { %411 = vst [vmem:[%s2032_s2 + $0x30] sm:$0x3f] %v283_v35  ;;  %v294_v35 = vadd.f32 %v956_v15, %v162_v55  ;;  %v1178_v55 = vadd.f32 %v956_v15, %v170_v62  ;;  %v1190_v46 = vadd.f32 %v956_v15, %v173_v61  ;;  %v1205_v54 = vadd.f32 %v956_v15, %v177_v27  ;;  %v2076_v62 = vld [vmem:[#allocation4_spill] sm:$0xff]  ;;  %v2079_v61 = vld [vmem:[#allocation7_spill] sm:$0xff] }
  0xae   :  { %412 = vst [vmem:[%s2032_s2 + $0x38] sm:$0x3f] %v284_v21  ;;  %v1202_v21 = vadd.f32 %v956_v15, %v176_v45  ;;  %v1208_v60 = vadd.f32 %v956_v15, %v178_v33  ;;  %v1215_v24 = vadd.f32 %v956_v15, %v672_v40  ;;  %v1219_v23 = vadd.f32 %v956_v15, %v675_v41  ;;  %v2080_v27 = vld [vmem:[#allocation8_spill] sm:$0xff] }
  0xaf   :  { %413 = vst [vmem:[%s2032_s2 + $0x40] sm:$0x3f] %v285_v26  ;;  %v1223_v14 = vadd.f32 %v956_v15, %v678_v42  ;;  %v1227_v13 = vadd.f32 %v956_v15, %v681_v43  ;;  %v1234_v40 = vadd.f32 %v956_v15, %v696_v48  ;;  %v1238_v41 = vadd.f32 %v956_v15, %v699_v49  ;;  %v2074_v26 = vld [vmem:[#allocation2_spill] sm:$0xff] }
  0xb0   :  { %414 = vst [vmem:[%s2032_s2 + $0x48] sm:$0x3f] %v286_v4  ;;  %v1242_v42 = vadd.f32 %v956_v15, %v702_v50  ;;  %v1246_v43 = vadd.f32 %v956_v15, %v705_v51  ;;  %v1253_v48 = vadd.f32 %v956_v15, %v720_v56  ;;  %v1257_v49 = vadd.f32 %v956_v15, %v723_v57 }
  0xb1   :  { %415 = vst [vmem:[%s2032_s2 + $0x50] sm:$0x3f] %v287_v19  ;;  %v1187_v19 = vadd.f32 %v956_v15, %v172_v39  ;;  %v1261_v50 = vadd.f32 %v956_v15, %v726_v58  ;;  %v1265_v51 = vadd.f32 %v956_v15, %v729_v59  ;;  %v1272_v56 = vadd.f32 %v956_v15, %v744_v0  ;;  %v2078_v39 = vld [vmem:[#allocation6_spill] sm:$0xff] }
  0xb2   :  { %416 = vst [vmem:[%s2032_s2 + $0x58] sm:$0x3f] %v288_v5  ;;  %v1276_v57 = vadd.f32 %v956_v15, %v747_v1  ;;  %v1280_v58 = vadd.f32 %v956_v15, %v750_v2  ;;  %v1284_v59 = vadd.f32 %v956_v15, %v753_v3  ;;  %v1291_v0 = vadd.f32 %v956_v15, %v768_v8  ;;  %v2081_v5 = vld [vmem:[#allocation9_spill] sm:$0xff] }
  0xb3   :  { %417 = vst [vmem:[%s2032_s2 + $0x60] sm:$0x3f] %v289_v34  ;;  %v1295_v1 = vadd.f32 %v956_v15, %v771_v10  ;;  %v1299_v2 = vadd.f32 %v956_v15, %v774_v11  ;;  %v1303_v3 = vadd.f32 %v956_v15, %v777_v12  ;;  %v1310_v8 = vadd.f32 %v956_v15, %v789_v16 }
  0xb4   :  { %418 = vst [vmem:[%s2032_s2 + $0x68] sm:$0x3f] %v290_v36  ;;  %v1314_v10 = vadd.f32 %v956_v15, %v792_v17  ;;  %v1318_v11 = vadd.f32 %v956_v15, %v795_v18  ;;  %v1322_v12 = vadd.f32 %v956_v15, %v2074_v26  ;;  %v1329_v16 = vadd.f32 %v956_v15, %v2075_v32  ;;  %v2082_v36 = vld [vmem:[#allocation10_spill] sm:$0xff] }
  0xb5   :  { %419 = vst [vmem:[%s2032_s2 + $0x70] sm:$0x3f] %v291_v28  ;;  %v1333_v17 = vadd.f32 %v956_v15, %v2076_v62  ;;  %v1337_v18 = vadd.f32 %v956_v15, %v2077_v63  ;;  %v1341_v4 = vadd.f32 %v956_v15, %v2078_v39  ;;  %v1348_v45 = vadd.f32 %v956_v15, %v2079_v61  ;;  %v2086_v26 = vld [vmem:[#allocation14_spill] sm:$0xff]  ;;  %v2088_v63 = vld [vmem:[#allocation16_spill] sm:$0xff]  ;;  %v2089_v61 = vld [vmem:[#allocation17_spill] sm:$0xff] }
  0xb6   :  { %420 = vst [vmem:[%s2032_s2 + $0x78] sm:$0x3f] %v292_v38  ;;  %v1352_v33 = vadd.f32 %v956_v15, %v2080_v27  ;;  %v1356_v34 = vadd.f32 %v956_v15, %v2081_v5  ;;  %v1360_v28 = vadd.f32 %v956_v15, %v2082_v36  ;;  %v2083_v38 = vld [vmem:[#allocation11_spill] sm:$0xff]  ;;  %v1379_v32 = vadd.f32 %v956_v15, %v2086_v26  ;;  %v2090_v5 = vld [vmem:[#allocation18_spill] sm:$0xff]  ;;  %v2094_v26 = vld [vmem:[#allocation21_spill] sm:$0xff] }
  0xb7   :  { %421 = vst [vmem:[%s2032_s2 + $0x80] sm:$0x3f] %v293_v22  ;;  %v1367_v22 = vadd.f32 %v956_v15, %v2083_v38  ;;  %v1390_v39 = vadd.f32 %v956_v15, %v2088_v63  ;;  %v1394_v27 = vadd.f32 %v956_v15, %v2089_v61  ;;  %v1398_v36 = vadd.f32 %v956_v15, %v2090_v5  ;;  %v2096_v63 = vld [vmem:[#allocation22_spill] sm:$0xff] }
  0xb8   :  { %422 = vst [vmem:[%s2032_s2 + $0x88] sm:$0x3f] %v294_v35  ;;  %v2084_v35 = vld [vmem:[#allocation12_spill] sm:$0xff]  ;;  %v1418_v61 = vadd.f32 %v956_v15, %v2096_v63 }
  0xb9   :  { %423 = vst [vmem:[%s2032_s2 + $0x90] sm:$0x3f] %v295_v25  ;;  %v1371_v25 = vadd.f32 %v956_v15, %v2084_v35  ;;  %v2092_v35 = vld [vmem:[#allocation20_spill] sm:$0xff] }
  0xba   :  { %424 = vst [vmem:[%s2032_s2 + $0x98] sm:$0x3f] %v296_v6  ;;  %v2085_v6 = vld [vmem:[#allocation13_spill] sm:$0xff] }
  0xbb   :  { %425 = vst [vmem:[%s2032_s2 + $0xa0] sm:$0x3f] %v297_v31  ;;  %v1375_v31 = vadd.f32 %v956_v15, %v2085_v6  ;;  %v1410_v6 = vadd.f32 %v956_v15, %v2092_v35 }
  0xbc   :  { %426 = vst [vmem:[%s2032_s2 + $0xa8] sm:$0x3f] %v298_v29  ;;  %v2087_v29 = vld [vmem:[#allocation15_spill] sm:$0xff] }
  0xbd   :  { %427 = vst [vmem:[%s2032_s2 + $0xb0] sm:$0x3f] %v299_v44  ;;  %v1386_v62 = vadd.f32 %v956_v15, %v2087_v29  ;;  %v2091_v44 = vld [vmem:[#allocation19_spill] sm:$0xff]  ;;  %v1414_v29 = vadd.f32 %v956_v15, %v2094_v26 }
  0xbe   :  { %428 = vst [vmem:[%s2032_s2 + $0xb8] sm:$0x3f] %v1172_v7  ;;  %v1406_v38 = vadd.f32 %v956_v15, %v2091_v44  ;;  %v2097_v7 = vld [vmem:[#allocation23_spill] sm:$0xff]  ;;  %v2099_v44 = vld [vmem:[#allocation24_spill] sm:$0xff] }
  0xbf   :  { %2093 = vst [vmem:[#allocation2_spill] sm:$0xff] %v1410_v6  ;;  %v1426_v5 = vadd.f32 %v956_v15, %v2097_v7  ;;  %v1430_v35 = vadd.f32 %v956_v15, %v2099_v44  ;;  %v2101_v6 = vld [vmem:[#allocation25_spill] sm:$0xff] }
  0xc0   :  { %2095 = vst [vmem:[#allocation3_spill] sm:$0xff] %v1414_v29  ;;  %v1434_v26 = vadd.f32 %v956_v15, %v2101_v6  ;;  %v2103_v29 = vld [vmem:[#allocation26_spill] sm:$0xff] }
  0xc1   :  { %429 = vst [vmem:[%s2032_s2 + $0xc0] sm:$0x3f] %v1175_v30  ;;  %v1438_v63 = vadd.f32 %v956_v15, %v2103_v29  ;;  %v2104_v30 = vld [vmem:[#allocation27_spill] sm:$0xff] }
  0xc2   :  { %2098 = vst [vmem:[#allocation4_spill] sm:$0xff] %v1426_v5  ;;  %v1446_v7 = vadd.f32 %v956_v15, %v2104_v30  ;;  %v2106_v5 = vld [vmem:[#allocation28_spill] sm:$0xff]  ;;  %v2112_v30 = vld [vmem:[#allocation31_spill] sm:$0xff] }
  0xc3   :  { %2100 = vst [vmem:[#allocation5_spill] sm:$0xff] %v1430_v35  ;;  %v1450_v44 = vadd.f32 %v956_v15, %v2106_v5  ;;  %v2108_v35 = vld [vmem:[#allocation29_spill] sm:$0xff]  ;;  %v1469_v5 = vadd.f32 %v956_v15, %v2112_v30  ;;  %v2120_v30 = vld [vmem:[#allocation35_spill] sm:$0xff] }
  0xc4   :  { %2102 = vst [vmem:[#allocation6_spill] sm:$0xff] %v1434_v26  ;;  %v1454_v6 = vadd.f32 %v956_v15, %v2108_v35  ;;  %v2110_v26 = vld [vmem:[#allocation30_spill] sm:$0xff] }
  0xc5   :  { %430 = vst [vmem:[%s2032_s2 + $0xc8] sm:$0x3f] %v1178_v55  ;;  %v1458_v29 = vadd.f32 %v956_v15, %v2110_v26  ;;  %v48_v55 = vld [vmem:[%s2031_s0 + $0x120] sm:$0x3f] }
  0xc6   :  { %2105 = vst [vmem:[#allocation7_spill] sm:$0xff] %v1446_v7 }
  0xc7   :  { %2107 = vst [vmem:[#allocation8_spill] sm:$0xff] %v1450_v44  ;;  %v2114_v44 = vld [vmem:[#allocation32_spill] sm:$0xff] }
  0xc8   :  { %2109 = vst [vmem:[#allocation9_spill] sm:$0xff] %v1454_v6  ;;  %v1473_v35 = vadd.f32 %v956_v15, %v2114_v44  ;;  %v2116_v6 = vld [vmem:[#allocation33_spill] sm:$0xff]  ;;  %v1492_v44 = vadd.f32 %v956_v15, %v2120_v30  ;;  %v2128_v30 = vld [vmem:[#allocation39_spill] sm:$0xff] }
  0xc9   :  { %2111 = vst [vmem:[#allocation10_spill] sm:$0xff] %v1458_v29  ;;  %v1477_v26 = vadd.f32 %v956_v15, %v2116_v6  ;;  %v2118_v29 = vld [vmem:[#allocation34_spill] sm:$0xff] }
  0xca   :  { %431 = vst [vmem:[%s2032_s2 + $0xd0] sm:$0x3f] %v1184_v20  ;;  %v1481_v7 = vadd.f32 %v956_v15, %v2118_v29  ;;  %v49_v20 = vld [vmem:[%s2031_s0 + $0x128] sm:$0x3f] }
  0xcb   :  { %2113 = vst [vmem:[#allocation11_spill] sm:$0xff] %v1469_v5 }
  0xcc   :  { %2115 = vst [vmem:[#allocation12_spill] sm:$0xff] %v1473_v35  ;;  %v2122_v35 = vld [vmem:[#allocation36_spill] sm:$0xff] }
  0xcd   :  { %2117 = vst [vmem:[#allocation13_spill] sm:$0xff] %v1477_v26  ;;  %v1496_v6 = vadd.f32 %v956_v15, %v2122_v35  ;;  %v2124_v26 = vld [vmem:[#allocation37_spill] sm:$0xff]  ;;  %v1515_v35 = vadd.f32 %v956_v15, %v2128_v30  ;;  %v311_v30 = vadd.f32 %v956_v15, %v1146_v37  ;;  %v53_v37 = vld [vmem:[%s2031_s0 + $0x148] sm:$0x3f] }
  0xce   :  { %2119 = vst [vmem:[#allocation14_spill] sm:$0xff] %v1481_v7  ;;  %v1500_v29 = vadd.f32 %v956_v15, %v2124_v26  ;;  %v2126_v7 = vld [vmem:[#allocation38_spill] sm:$0xff] }
  0xcf   :  { %432 = vst [vmem:[%s2032_s2 + $0xd8] sm:$0x3f] %v1187_v19  ;;  %v1504_v5 = vadd.f32 %v956_v15, %v2126_v7  ;;  %v50_v19 = vld [vmem:[%s2031_s0 + $0x130] sm:$0x3f] }
  0xd0   :  { %2121 = vst [vmem:[#allocation15_spill] sm:$0xff] %v1492_v44 }
  0xd1   :  { %2123 = vst [vmem:[#allocation16_spill] sm:$0xff] %v1496_v6  ;;  %v2129_v6 = vld [vmem:[#allocation40_spill] sm:$0xff] }
  0xd2   :  { %2125 = vst [vmem:[#allocation17_spill] sm:$0xff] %v1500_v29  ;;  %v1519_v26 = vadd.f32 %v956_v15, %v2129_v6  ;;  %v2130_v29 = vld [vmem:[#allocation41_spill] sm:$0xff]  ;;  %v181_v6 = vmul.f32 %v579_v9, %v48_v55 }
  0xd3   :  { %2127 = vst [vmem:[#allocation18_spill] sm:$0xff] %v1504_v5  ;;  %v1523_v7 = vadd.f32 %v956_v15, %v2130_v29  ;;  %v2131_v5 = vld [vmem:[#allocation42_spill] sm:$0xff]  ;;  %v312_v29 = vadd.f32 %v956_v15, %v1149_v47  ;;  %v54_v47 = vld [vmem:[%s2031_s0 + $0x150] sm:$0x3f] }
  0xd4   :  { %433 = vst [vmem:[%s2032_s2 + $0xe0] sm:$0x3f] %v1190_v46  ;;  %v1527_v44 = vadd.f32 %v956_v15, %v2131_v5  ;;  %v51_v46 = vld [vmem:[%s2031_s0 + $0x138] sm:$0x3f]  ;;  %v52_v5 = vld [vmem:[%s2031_s0 + $0x140] sm:$0x3f]  ;;  %v313_v55 = vadd.f32 %v956_v15, %v181_v6 }
  0xd5   :  { %434 = vst [vmem:[%s2032_s2 + $0xe8] sm:$0x3f] %v1193_v52  ;;  %v182_v52 = vmul.f32 %v579_v9, %v49_v20  ;;  %v184_v20 = vmul.f32 %v579_v9, %v51_v46  ;;  %v185_v6 = vmul.f32 %v579_v9, %v52_v5  ;;  %v56_v46 = vld [vmem:[%s2031_s0 + $0x160] sm:$0x3f]  ;;  %v57_v5 = vld [vmem:[%s2031_s0 + $0x168] sm:$0x3f] }
  0xd6   :  { %2132 = vst [vmem:[#allocation19_spill] sm:$0xff] %v1527_v44 }
  0xd7   :  { %435 = vst [vmem:[%s2032_s2 + $0xf0] sm:$0x3f] %v1199_v53  ;;  %v183_v53 = vmul.f32 %v579_v9, %v50_v19  ;;  %v55_v19 = vld [vmem:[%s2031_s0 + $0x158] sm:$0x3f] }
  0xd8   :  { %436 = vst [vmem:[%s2032_s2 + $0xf8] sm:$0x3f] %v1202_v21  ;;  %v314_v21 = vadd.f32 %v956_v15, %v182_v52  ;;  %v186_v52 = vmul.f32 %v579_v9, %v53_v37  ;;  %v58_v37 = vld [vmem:[%s2031_s0 + $0x170] sm:$0x3f] }
  0xd9   :  { %437 = vst [vmem:[%s2032_s2 + $0x100] sm:$0x3f] %v1205_v54  ;;  %v315_v54 = vadd.f32 %v956_v15, %v183_v53  ;;  %v187_v53 = vmul.f32 %v579_v9, %v54_v47  ;;  %v59_v47 = vld [vmem:[%s2031_s0 + $0x178] sm:$0x3f] }
  0xda   :  { %438 = vst [vmem:[%s2032_s2 + $0x108] sm:$0x3f] %v1208_v60  ;;  %v316_v60 = vadd.f32 %v956_v15, %v184_v20  ;;  %v188_v20 = vmul.f32 %v579_v9, %v55_v19  ;;  %v60_v19 = vld [vmem:[%s2031_s0 + $0x180] sm:$0x3f] }
  0xdb   :  { %439 = vst [vmem:[%s2032_s2 + $0x110] sm:$0x3f] %v311_v30  ;;  %v317_v30 = vadd.f32 %v956_v15, %v185_v6  ;;  %v189_v6 = vmul.f32 %v579_v9, %v56_v46  ;;  %v61_v46 = vld [vmem:[%s2031_s0 + $0x188] sm:$0x3f] }
  0xdc   :  { %440 = vst [vmem:[%s2032_s2 + $0x118] sm:$0x3f] %v312_v29  ;;  %v318_v29 = vadd.f32 %v956_v15, %v186_v52  ;;  %v190_v52 = vmul.f32 %v579_v9, %v57_v5  ;;  %v62_v5 = vld [vmem:[%s2031_s0 + $0x190] sm:$0x3f] }
  0xdd   :  { %441 = vst [vmem:[%s2032_s2 + $0x120] sm:$0x3f] %v313_v55  ;;  %v319_v55 = vadd.f32 %v956_v15, %v187_v53  ;;  %v191_v53 = vmul.f32 %v579_v9, %v58_v37  ;;  %v63_v37 = vld [vmem:[%s2031_s0 + $0x198] sm:$0x3f] }
  0xde   :  { %442 = vst [vmem:[%s2032_s2 + $0x128] sm:$0x3f] %v314_v21  ;;  %v320_v21 = vadd.f32 %v956_v15, %v188_v20  ;;  %v192_v20 = vmul.f32 %v579_v9, %v59_v47  ;;  %v64_v47 = vld [vmem:[%s2031_s0 + $0x1a0] sm:$0x3f] }
  0xdf   :  { %443 = vst [vmem:[%s2032_s2 + $0x130] sm:$0x3f] %v315_v54  ;;  %v321_v54 = vadd.f32 %v956_v15, %v189_v6  ;;  %v193_v6 = vmul.f32 %v579_v9, %v60_v19  ;;  %v65_v19 = vld [vmem:[%s2031_s0 + $0x1a8] sm:$0x3f] }
  0xe0   :  { %444 = vst [vmem:[%s2032_s2 + $0x138] sm:$0x3f] %v316_v60  ;;  %v322_v60 = vadd.f32 %v956_v15, %v190_v52  ;;  %v194_v52 = vmul.f32 %v579_v9, %v61_v46  ;;  %v66_v46 = vld [vmem:[%s2031_s0 + $0x1b0] sm:$0x3f] }
  0xe1   :  { %445 = vst [vmem:[%s2032_s2 + $0x140] sm:$0x3f] %v317_v30  ;;  %v323_v30 = vadd.f32 %v956_v15, %v191_v53  ;;  %v195_v53 = vmul.f32 %v579_v9, %v62_v5  ;;  %v67_v5 = vld [vmem:[%s2031_s0 + $0x1b8] sm:$0x3f] }
  0xe2   :  { %446 = vst [vmem:[%s2032_s2 + $0x148] sm:$0x3f] %v318_v29  ;;  %v324_v29 = vadd.f32 %v956_v15, %v192_v20  ;;  %v196_v20 = vmul.f32 %v579_v9, %v63_v37  ;;  %v68_v37 = vld [vmem:[%s2031_s0 + $0x1c0] sm:$0x3f] }
  0xe3   :  { %447 = vst [vmem:[%s2032_s2 + $0x150] sm:$0x3f] %v319_v55  ;;  %v325_v55 = vadd.f32 %v956_v15, %v193_v6  ;;  %v197_v6 = vmul.f32 %v579_v9, %v64_v47  ;;  %v69_v47 = vld [vmem:[%s2031_s0 + $0x1c8] sm:$0x3f] }
  0xe4   :  { %448 = vst [vmem:[%s2032_s2 + $0x158] sm:$0x3f] %v320_v21  ;;  %v326_v21 = vadd.f32 %v956_v15, %v194_v52  ;;  %v198_v52 = vmul.f32 %v579_v9, %v65_v19  ;;  %v70_v19 = vld [vmem:[%s2031_s0 + $0x1d0] sm:$0x3f] }
  0xe5   :  { %449 = vst [vmem:[%s2032_s2 + $0x160] sm:$0x3f] %v321_v54  ;;  %v327_v54 = vadd.f32 %v956_v15, %v195_v53  ;;  %v199_v53 = vmul.f32 %v579_v9, %v66_v46  ;;  %v71_v46 = vld [vmem:[%s2031_s0 + $0x1d8] sm:$0x3f] }
  0xe6   :  { %450 = vst [vmem:[%s2032_s2 + $0x168] sm:$0x3f] %v322_v60  ;;  %v328_v60 = vadd.f32 %v956_v15, %v196_v20  ;;  %v200_v20 = vmul.f32 %v579_v9, %v67_v5  ;;  %v72_v5 = vld [vmem:[%s2031_s0 + $0x1e0] sm:$0x3f] }
  0xe7   :  { %451 = vst [vmem:[%s2032_s2 + $0x170] sm:$0x3f] %v323_v30  ;;  %v329_v30 = vadd.f32 %v956_v15, %v197_v6  ;;  %v201_v6 = vmul.f32 %v579_v9, %v68_v37  ;;  %v73_v37 = vld [vmem:[%s2031_s0 + $0x1e8] sm:$0x3f] }
  0xe8   :  { %452 = vst [vmem:[%s2032_s2 + $0x178] sm:$0x3f] %v324_v29  ;;  %v330_v29 = vadd.f32 %v956_v15, %v198_v52  ;;  %v202_v52 = vmul.f32 %v579_v9, %v69_v47  ;;  %v74_v47 = vld [vmem:[%s2031_s0 + $0x1f0] sm:$0x3f] }
  0xe9   :  { %453 = vst [vmem:[%s2032_s2 + $0x180] sm:$0x3f] %v325_v55  ;;  %v331_v55 = vadd.f32 %v956_v15, %v199_v53  ;;  %v203_v53 = vmul.f32 %v579_v9, %v70_v19  ;;  %v75_v19 = vld [vmem:[%s2031_s0 + $0x1f8] sm:$0x3f] }
  0xea   :  { %454 = vst [vmem:[%s2032_s2 + $0x188] sm:$0x3f] %v326_v21  ;;  %v332_v21 = vadd.f32 %v956_v15, %v200_v20  ;;  %v204_v20 = vmul.f32 %v579_v9, %v71_v46  ;;  %v206_v46 = vmul.f32 %v579_v9, %v73_v37 }
  0xeb   :  { %455 = vst [vmem:[%s2032_s2 + $0x190] sm:$0x3f] %v327_v54  ;;  %v333_v54 = vadd.f32 %v956_v15, %v201_v6  ;;  %v205_v6 = vmul.f32 %v579_v9, %v72_v5  ;;  %v208_v5 = vmul.f32 %v579_v9, %v75_v19 }
  0xec   :  { %456 = vst [vmem:[%s2032_s2 + $0x198] sm:$0x3f] %v328_v60  ;;  %v334_v60 = vadd.f32 %v956_v15, %v202_v52  ;;  %v336_v52 = vadd.f32 %v956_v15, %v204_v20 }
  0xed   :  { %457 = vst [vmem:[%s2032_s2 + $0x1a0] sm:$0x3f] %v329_v30  ;;  %v335_v30 = vadd.f32 %v956_v15, %v203_v53  ;;  %v337_v44 = vadd.f32 %v956_v15, %v205_v6 }
  0xee   :  { %458 = vst [vmem:[%s2032_s2 + $0x1a8] sm:$0x3f] %v330_v29  ;;  %v207_v29 = vmul.f32 %v579_v9, %v74_v47  ;;  %v2133_v9 = vld [vmem:[#allocation2_spill] sm:$0xff] }
  0xef   :  { %459 = vst [vmem:[%s2032_s2 + $0x1b0] sm:$0x3f] %v331_v55  ;;  %v338_v55 = vadd.f32 %v956_v15, %v206_v46 }
  0xf0   :  { %460 = vst [vmem:[%s2032_s2 + $0x1b8] sm:$0x3f] %v332_v21  ;;  %v339_v37 = vadd.f32 %v956_v15, %v207_v29  ;;  %v340_v21 = vadd.f32 %v956_v15, %v208_v5  ;;  %v2134_v15 = vld [vmem:[#allocation3_spill] sm:$0xff] }
  0xf1   :  { %461 = vst [vmem:[%s2032_s2 + $0x1c0] sm:$0x3f] %v333_v54 }
  0xf2   :  { %462 = vst [vmem:[%s2032_s2 + $0x1c8] sm:$0x3f] %v334_v60 }
  0xf3   :  { %463 = vst [vmem:[%s2032_s2 + $0x1d0] sm:$0x3f] %v335_v30 }
  0xf4   :  { %464 = vst [vmem:[%s2032_s2 + $0x1d8] sm:$0x3f] %v336_v52 }
  0xf5   :  { %465 = vst [vmem:[%s2032_s2 + $0x1e0] sm:$0x3f] %v337_v44 }
  0xf6   :  { %466 = vst [vmem:[%s2032_s2 + $0x1e8] sm:$0x3f] %v338_v55 }
  0xf7   :  { %467 = vst [vmem:[%s2032_s2 + $0x1f0] sm:$0x3f] %v339_v37 }
  0xf8   :  { %468 = vst [vmem:[%s2032_s2 + $0x1f8] sm:$0x3f] %v340_v21 }
  0xf9   :  { %469 = vst [vmem:[%s2032_s2 + $0x200] sm:$0x3f] %v1215_v24  ;;  %v2135_v24 = vld [vmem:[#allocation4_spill] sm:$0xff] }
  0xfa   :  { %470 = vst [vmem:[%s2032_s2 + $0x208] sm:$0x3f] %v1219_v23  ;;  %v2136_v23 = vld [vmem:[#allocation5_spill] sm:$0xff] }
  0xfb   :  { %471 = vst [vmem:[%s2032_s2 + $0x210] sm:$0x3f] %v1223_v14  ;;  %v2137_v14 = vld [vmem:[#allocation6_spill] sm:$0xff] }
  0xfc   :  { %472 = vst [vmem:[%s2032_s2 + $0x218] sm:$0x3f] %v1227_v13  ;;  %v2138_v13 = vld [vmem:[#allocation7_spill] sm:$0xff] }
  0xfd   :  { %473 = vst [vmem:[%s2032_s2 + $0x220] sm:$0x3f] %v1234_v40  ;;  %v2139_v40 = vld [vmem:[#allocation8_spill] sm:$0xff] }
  0xfe   :  { %474 = vst [vmem:[%s2032_s2 + $0x228] sm:$0x3f] %v1238_v41  ;;  %v2140_v41 = vld [vmem:[#allocation9_spill] sm:$0xff] }
  0xff   :  { %475 = vst [vmem:[%s2032_s2 + $0x230] sm:$0x3f] %v1242_v42  ;;  %v2141_v42 = vld [vmem:[#allocation10_spill] sm:$0xff] }
 0x100   :  { %476 = vst [vmem:[%s2032_s2 + $0x238] sm:$0x3f] %v1246_v43  ;;  %v2142_v43 = vld [vmem:[#allocation11_spill] sm:$0xff] }
 0x101   :  { %477 = vst [vmem:[%s2032_s2 + $0x240] sm:$0x3f] %v1253_v48  ;;  %v2143_v48 = vld [vmem:[#allocation12_spill] sm:$0xff] }
 0x102   :  { %478 = vst [vmem:[%s2032_s2 + $0x248] sm:$0x3f] %v1257_v49  ;;  %v2144_v49 = vld [vmem:[#allocation13_spill] sm:$0xff] }
 0x103   :  { %479 = vst [vmem:[%s2032_s2 + $0x250] sm:$0x3f] %v1261_v50  ;;  %v2145_v50 = vld [vmem:[#allocation14_spill] sm:$0xff] }
 0x104   :  { %480 = vst [vmem:[%s2032_s2 + $0x258] sm:$0x3f] %v1265_v51  ;;  %v2146_v51 = vld [vmem:[#allocation15_spill] sm:$0xff] }
 0x105   :  { %481 = vst [vmem:[%s2032_s2 + $0x260] sm:$0x3f] %v1272_v56  ;;  %v2147_v56 = vld [vmem:[#allocation16_spill] sm:$0xff] }
 0x106   :  { %482 = vst [vmem:[%s2032_s2 + $0x268] sm:$0x3f] %v1276_v57  ;;  %v2148_v57 = vld [vmem:[#allocation17_spill] sm:$0xff] }
 0x107   :  { %483 = vst [vmem:[%s2032_s2 + $0x270] sm:$0x3f] %v1280_v58  ;;  %v2149_v58 = vld [vmem:[#allocation18_spill] sm:$0xff] }
 0x108   :  { %484 = vst [vmem:[%s2032_s2 + $0x278] sm:$0x3f] %v1284_v59  ;;  %v2150_v59 = vld [vmem:[#allocation19_spill] sm:$0xff] }
 0x109   :  { %485 = vst [vmem:[%s2032_s2 + $0x280] sm:$0x3f] %v1291_v0 }
 0x10a   :  { %486 = vst [vmem:[%s2032_s2 + $0x288] sm:$0x3f] %v1295_v1 }
 0x10b   :  { %487 = vst [vmem:[%s2032_s2 + $0x290] sm:$0x3f] %v1299_v2 }
 0x10c   :  { %488 = vst [vmem:[%s2032_s2 + $0x298] sm:$0x3f] %v1303_v3 }
 0x10d   :  { %489 = vst [vmem:[%s2032_s2 + $0x2a0] sm:$0x3f] %v1310_v8 }
 0x10e   :  { %490 = vst [vmem:[%s2032_s2 + $0x2a8] sm:$0x3f] %v1314_v10 }
 0x10f   :  { %491 = vst [vmem:[%s2032_s2 + $0x2b0] sm:$0x3f] %v1318_v11 }
 0x110   :  { %492 = vst [vmem:[%s2032_s2 + $0x2b8] sm:$0x3f] %v1322_v12 }
 0x111   :  { %493 = vst [vmem:[%s2032_s2 + $0x2c0] sm:$0x3f] %v1329_v16 }
 0x112   :  { %494 = vst [vmem:[%s2032_s2 + $0x2c8] sm:$0x3f] %v1333_v17 }
 0x113   :  { %495 = vst [vmem:[%s2032_s2 + $0x2d0] sm:$0x3f] %v1337_v18 }
 0x114   :  { %496 = vst [vmem:[%s2032_s2 + $0x2d8] sm:$0x3f] %v1341_v4 }
 0x115   :  { %497 = vst [vmem:[%s2032_s2 + $0x2e0] sm:$0x3f] %v1348_v45 }
 0x116   :  { %498 = vst [vmem:[%s2032_s2 + $0x2e8] sm:$0x3f] %v1352_v33 }
 0x117   :  { %499 = vst [vmem:[%s2032_s2 + $0x2f0] sm:$0x3f] %v1356_v34 }
 0x118   :  { %500 = vst [vmem:[%s2032_s2 + $0x2f8] sm:$0x3f] %v1360_v28 }
 0x119   :  { %501 = vst [vmem:[%s2032_s2 + $0x300] sm:$0x3f] %v1367_v22 }
 0x11a   :  { %502 = vst [vmem:[%s2032_s2 + $0x308] sm:$0x3f] %v1371_v25 }
 0x11b   :  { %503 = vst [vmem:[%s2032_s2 + $0x310] sm:$0x3f] %v1375_v31 }
 0x11c   :  { %504 = vst [vmem:[%s2032_s2 + $0x318] sm:$0x3f] %v1379_v32 }
 0x11d   :  { %505 = vst [vmem:[%s2032_s2 + $0x320] sm:$0x3f] %v1386_v62 }
 0x11e   :  { %506 = vst [vmem:[%s2032_s2 + $0x328] sm:$0x3f] %v1390_v39 }
 0x11f   :  { %507 = vst [vmem:[%s2032_s2 + $0x330] sm:$0x3f] %v1394_v27 }
 0x120   :  { %508 = vst [vmem:[%s2032_s2 + $0x338] sm:$0x3f] %v1398_v36 }
 0x121   :  { %509 = vst [vmem:[%s2032_s2 + $0x340] sm:$0x3f] %v1406_v38 }
 0x122   :  { %510 = vst [vmem:[%s2032_s2 + $0x348] sm:$0x3f] %v2133_v9 }
 0x123   :  { %511 = vst [vmem:[%s2032_s2 + $0x350] sm:$0x3f] %v2134_v15 }
 0x124   :  { %512 = vst [vmem:[%s2032_s2 + $0x358] sm:$0x3f] %v1418_v61 }
 0x125   :  { %513 = vst [vmem:[%s2032_s2 + $0x360] sm:$0x3f] %v2135_v24 }
 0x126   :  { %514 = vst [vmem:[%s2032_s2 + $0x368] sm:$0x3f] %v2136_v23 }
 0x127   :  { %515 = vst [vmem:[%s2032_s2 + $0x370] sm:$0x3f] %v2137_v14 }
 0x128   :  { %516 = vst [vmem:[%s2032_s2 + $0x378] sm:$0x3f] %v1438_v63 }
 0x129   :  { %517 = vst [vmem:[%s2032_s2 + $0x380] sm:$0x3f] %v2138_v13 }
 0x12a   :  { %518 = vst [vmem:[%s2032_s2 + $0x388] sm:$0x3f] %v2139_v40 }
 0x12b   :  { %519 = vst [vmem:[%s2032_s2 + $0x390] sm:$0x3f] %v2140_v41 }
 0x12c   :  { %520 = vst [vmem:[%s2032_s2 + $0x398] sm:$0x3f] %v2141_v42 }
 0x12d   :  { %521 = vst [vmem:[%s2032_s2 + $0x3a0] sm:$0x3f] %v2142_v43 }
 0x12e   :  { %522 = vst [vmem:[%s2032_s2 + $0x3a8] sm:$0x3f] %v2143_v48 }
 0x12f   :  { %523 = vst [vmem:[%s2032_s2 + $0x3b0] sm:$0x3f] %v2144_v49 }
 0x130   :  { %524 = vst [vmem:[%s2032_s2 + $0x3b8] sm:$0x3f] %v2145_v50 }
 0x131   :  { %525 = vst [vmem:[%s2032_s2 + $0x3c0] sm:$0x3f] %v2146_v51 }
 0x132   :  { %526 = vst [vmem:[%s2032_s2 + $0x3c8] sm:$0x3f] %v2147_v56 }
 0x133   :  { %527 = vst [vmem:[%s2032_s2 + $0x3d0] sm:$0x3f] %v2148_v57 }
 0x134   :  { %528 = vst [vmem:[%s2032_s2 + $0x3d8] sm:$0x3f] %v2149_v58 }
 0x135   :  { %529 = vst [vmem:[%s2032_s2 + $0x3e0] sm:$0x3f] %v1515_v35 }
 0x136   :  { %530 = vst [vmem:[%s2032_s2 + $0x3e8] sm:$0x3f] %v1519_v26 }
 0x137   :  { %531 = vst [vmem:[%s2032_s2 + $0x3f0] sm:$0x3f] %v1523_v7 }
 0x138   :  { %532 = vst [vmem:[%s2032_s2 + $0x3f8] sm:$0x3f] %v2150_v59 }

</bundles_post_ra>
